<compile_context>
chip_gen: v5e
topology: v5e:2x2
jax: 0.10.0
libtpu: 0.0.40
codegen_flags: <defaults>
</compile_context>

<pallas_src>
import math
import functools

import numpy as np
import jax
import jax.numpy as jnp
from jax.experimental import pallas as pl
from jax.experimental.pallas import tpu as pltpu


def _round_up(a, m):
    return (a + m - 1) // m * m


def _ceil_div(a, b):
    return -(-a // b)


def _vmem_plan():
    """Per-generation VMEM / dtype plan.

    vmem_limit : explicit scoped-VMEM limit to request (None -> compiler default)
    budget     : bytes of in-kernel intermediates allowed per row tile
    bf16_rank  : run the rank==target selection in packed bf16 (v6e/v7x only)
    two_tiles  : keep >= 2 row tiles so v7x's two TensorCores both get work
    """
    kind = ""
    try:
        kind = jax.devices()[0].device_kind.lower()
    except Exception:
        pass
    if ("v7" in kind) or ("tpu7" in kind):
        # 64 MiB physical VMEM per TensorCore.
        return dict(vmem_limit=48 << 20, budget=24 << 20, bf16_rank=True, two_tiles=True)
    if "v6" in kind:
        # 128 MiB physical; plenty of headroom -> big row tiles.
        return dict(vmem_limit=100 << 20, budget=64 << 20, bf16_rank=True, two_tiles=False)
    if "v5" in kind:
        # 128 MiB physical but only a 16 MiB default scoped limit -> raise it.
        # No bf16 VPU on v5e: keep the selection compares in f32.
        return dict(vmem_limit=96 << 20, budget=48 << 20, bf16_rank=False, two_tiles=False)
    # Unknown chip (or interpret mode): stay inside conservative defaults.
    return dict(vmem_limit=None, budget=12 << 20, bf16_rank=False, two_tiles=False)


def _median_local_activation_kernel(x_ref, tri_ref, masks_ref, target_ref, w_ref,
                                    out_ref, *, rank_dtype):
    """x_ref:      (TR, Np) f32 row tile.
    tri_ref:    (Np, Np) f32 {0,1}; tri[j, i] = 1 iff i < j (hoisted stable tie-break).
    masks_ref:  (Np, K*Np) bf16 {0,1}; masks[i, k*Np+n] = 1 iff node i is in the
                (k+1)-hop neighborhood of node n (self included).
    target_ref: (1, K*Np) f32 lower-median rank per (hop, node); -1 for padded nodes.
    w_ref:      (K+1,) f32 mixing weights in SMEM."""
    x = x_ref[...]                                        # (TR, Np) f32
    TR, Np = x.shape
    KN = masks_ref.shape[1]
    K = KN // Np

    # Pairwise "strictly smaller" comparison with a stable index tie-break so the
    # rank of every neighborhood member is unique even with repeated values.
    xj = x[:, :, None]                                    # (TR, Np_j, 1)
    xi = x[:, None, :]                                    # (TR, 1, Np_i)
    tri = (tri_ref[...] > 0.0)[None]                      # (1, Np_j, Np_i) bool
    cmp = ((xi < xj) | ((xi == xj) & tri)).astype(jnp.bfloat16)   # (TR, Np, Np)

    masks = masks_ref[...]                                # (Np_i, K*Np_n) bf16
    target = target_ref[...].astype(rank_dtype)           # (1, K*Np_n)

    # Single MXU contraction covering all K hops.  {0,1} operands with f32
    # accumulation keep the integer counts (<= Np) exact; on v6e/v7x the result
    # is popped directly as bf16 so the selection compares below run packed.
    # rank_all[r, j, k*Np + n] = #{i in nbhd_k(n): x_i <(stable) x_j}
    rank_all = jnp.dot(cmp.reshape(TR * Np, Np), masks,
                       preferred_element_type=rank_dtype)
    rank_all = rank_all.reshape(TR, Np, KN)

    acc = x * w_ref[0]                                    # 0-hop term: w[0] * x
    for k in range(K):                                    # K is tiny (1-4): keep unrolled
        lo = k * Np
        rank_k = rank_all[:, :, lo:lo + Np]               # (TR, Np_j, Np_n)
        mask_k = (masks[:, lo:lo + Np] > 0.5)[None]       # (1, Np_j, Np_n) bool
        tgt_k = target[:, lo:lo + Np][:, None, :]         # (1, 1, Np_n)
        # Candidate j is the lower median of nbhd_k(n) iff it is a member and
        # its stable rank equals the target rank.
        sel = (rank_k == tgt_k) & mask_k                  # (TR, Np_j, Np_n)
        med = jnp.sum(jnp.where(sel, xj, 0.0), axis=1)    # (TR, Np_n) f32
        acc = acc + w_ref[k + 1] * med
    out_ref[...] = acc


def median_local_activation(x, masks, weight):
    """x: (B, F, N); masks: (K, N, N) {0,1}, masks[k, n, j]=1 iff node j is within
    (k+1) hops of node n (self included); weight: (K+1,).  Returns (B, F, N),
    matching MedianLocalActivation.forward (lower median, like torch.median)."""
    B, F, N = x.shape
    K = masks.shape[0]
    R = B * F

    Np = _round_up(N, 128)                                # lane-dense node axis
    KN = K * Np

    plan = _vmem_plan()
    rank_bytes = 2 if plan["bf16_rank"] else 4

    # Row-tile sizing: in-kernel live intermediates per row are roughly
    # cmp (bf16, Np^2) + rank_all (K*Np^2) + select/where temporaries (~8 B/elem).
    per_row = Np * Np * (2 + rank_bytes * K + 8)
    tr_max = max(8, min(256, (plan["budget"] // per_row) // 8 * 8))

    # Balanced row grid: never pad more than 7 rows, and on v7x keep >= 2 grid
    # steps so the "parallel" row axis can be split across both TensorCores.
    num_tiles = max(1, _ceil_div(R, tr_max))
    if plan["two_tiles"] and R > 8:
        num_tiles = max(num_tiles, 2)
    TR = _round_up(_ceil_div(R, num_tiles), 8)
    Rp = num_tiles * TR

    # Pad inputs.  Padded nodes have empty neighborhoods (target = -1 => med = 0)
    # and padded rows/columns are sliced away below, so padding never leaks.
    x2 = jnp.zeros((Rp, Np), jnp.float32).at[:R, :N].set(
        x.reshape(R, N).astype(jnp.float32))
    masks_p = jnp.zeros((K, Np, Np), jnp.float32).at[:, :N, :N].set(
        masks.astype(jnp.float32))
    # Stack all hop-masks along the lane axis: stacked[i, k*Np+n] = masks[k, n, i].
    masks_stacked = jnp.transpose(masks_p, (2, 0, 1)).reshape(Np, KN)
    masks_stacked = masks_stacked.astype(jnp.bfloat16)
    # Lower-median target rank per (hop, node), precomputed (independent of x).
    cnt = masks_p.sum(axis=-1)                            # (K, Np)
    target = jnp.floor((cnt - 1.0) * 0.5).reshape(1, KN).astype(jnp.float32)
    # Hoisted stable tie-break triangle: tri[j, i] = 1 iff i < j.
    idx = jnp.arange(Np)
    tri = (idx[None, :] < idx[:, None]).astype(jnp.float32)

    kernel = functools.partial(
        _median_local_activation_kernel,
        rank_dtype=jnp.bfloat16 if plan["bf16_rank"] else jnp.float32)

    cp_kwargs = dict(dimension_semantics=("parallel",))
    if plan["vmem_limit"] is not None:
        cp_kwargs["vmem_limit_bytes"] = plan["vmem_limit"]

    out = pl.pallas_call(
        kernel,
        out_shape=jax.ShapeDtypeStruct((Rp, Np), jnp.float32),
        grid=(Rp // TR,),
        in_specs=[
            pl.BlockSpec((TR, Np), lambda i: (i, 0)),            # x row tile
            pl.BlockSpec((Np, Np), lambda i: (0, 0)),            # tie-break triangle (resident)
            pl.BlockSpec((Np, KN), lambda i: (0, 0)),            # stacked hop masks (resident)
            pl.BlockSpec((1, KN), lambda i: (0, 0)),             # target ranks (resident)
            pl.BlockSpec(memory_space=pltpu.MemorySpace.SMEM),   # mixing weights
        ],
        out_specs=pl.BlockSpec((TR, Np), lambda i: (i, 0)),
        compiler_params=pltpu.CompilerParams(**cp_kwargs),
    )(x2, tri, masks_stacked, target, weight.astype(jnp.float32).reshape(-1))
    return out[:R, :N].reshape(B, F, N)


def compute_khop_masks(S, K):
    """Dense analogue of graphTools.computeNeighborhood: mask[k-1, n, j] = 1 iff
    node j is within k hops of node n (node itself included -> every
    neighborhood is non-empty)."""
    A = (jnp.abs(S).sum(axis=0) > 0).astype(jnp.float32)
    N = A.shape[0]
    hop1 = ((A + jnp.eye(N, dtype=jnp.float32)) > 0).astype(jnp.float32)
    masks, reach = [], hop1
    for _ in range(K):
        masks.append(reach)
        reach = ((reach @ hop1) > 0).astype(jnp.float32)
    return jnp.stack(masks, axis=0)


if __name__ == "__main__":
    B, F, N, K = 2, 4, 16, 2
    key = jax.random.PRNGKey(0)
    kx, kg, kw = jax.random.split(key, 3)

    # Random symmetric GSO (edge_features=1, no self-loops).
    upper = jnp.triu((jax.random.uniform(kg, (N, N)) < 0.25).astype(jnp.float32), k=1)
    S = (upper + upper.T)[None]                           # (1, N, N)

    masks = compute_khop_masks(S, K)                      # (K, N, N)

    # Deterministic parameter init (same distribution/shape as the nn.Module).
    stdv = 1.0 / math.sqrt(K)
    weight = jax.random.uniform(kw, (K + 1,), minval=-stdv, maxval=stdv,
                                dtype=jnp.float32)        # flattened (1, K+1)

    x = jax.random.normal(kx, (B, F, N), dtype=jnp.float32)

    y = jax.block_until_ready(median_local_activation(x, masks, weight))

    # Reference (numpy): lower median over each k-hop neighborhood, like torch.median.
    xn, mn, wn = np.asarray(x), np.asarray(masks), np.asarray(weight)
    ref = wn[0] * xn
    for k in range(K):
        med = np.zeros_like(xn)
        for n in range(N):
            idx = np.nonzero(mn[k, n] > 0.5)[0]
            vals = np.sort(xn[:, :, idx], axis=2)
            med[:, :, n] = vals[:, :, (len(idx) - 1) // 2]
        ref = ref + wn[k + 1] * med
    assert np.allclose(np.asarray(y), ref, atol=1e-5, rtol=1e-5)

    print("KERNEL_OK")
</pallas_src>

<mosaic_0001>
module attributes {stable_mosaic.version = 11 : i64} {
  func.func @_median_local_activation_kernel(%arg0: i32, %arg1: memref<8x128xf32, #tpu.memory_space<vmem>>, %arg2: memref<128x128xf32, #tpu.memory_space<vmem>>, %arg3: memref<128x256xbf16, #tpu.memory_space<vmem>>, %arg4: memref<1x256xf32, #tpu.memory_space<vmem>>, %arg5: memref<3xf32, #tpu.memory_space<smem>>, %arg6: memref<8x128xf32, #tpu.memory_space<vmem>>) attributes {dimension_semantics = [#tpu.dimension_semantics<parallel>], iteration_bounds = array<i64: 1>, scalar_prefetch = 0 : i64, scratch_operands = 0 : i64, tpu.core_type = #tpu.core_type<tc>, window_params = [{transform_indices = @transform_0, window_bounds = array<i64: 8, 128>}, {pipeline_mode = #tpu.pipeline_mode<synchronous>, transform_indices = @transform_1, window_bounds = array<i64: 128, 128>}, {pipeline_mode = #tpu.pipeline_mode<synchronous>, transform_indices = @transform_2, window_bounds = array<i64: 128, 256>}, {pipeline_mode = #tpu.pipeline_mode<synchronous>, transform_indices = @transform_3, window_bounds = array<i64: 1, 256>}, {transform_indices = @transform_4, window_bounds = array<i64: 3>}, {transform_indices = @transform_5, window_bounds = array<i64: 8, 128>}]} {
    %c0 = arith.constant 0 : index
    %c0_0 = arith.constant 0 : index
    %0 = vector.load %arg1[%c0, %c0_0] : memref<8x128xf32, #tpu.memory_space<vmem>>, vector<8x128xf32>
    %1 = vector.shape_cast %0 : vector<8x128xf32> to vector<8x128x1xf32>
    %2 = vector.shape_cast %0 : vector<8x128xf32> to vector<8x1x128xf32>
    %c0_1 = arith.constant 0 : index
    %c0_2 = arith.constant 0 : index
    %3 = vector.load %arg2[%c0_1, %c0_2] : memref<128x128xf32, #tpu.memory_space<vmem>>, vector<128x128xf32>
    %cst = arith.constant 0.000000e+00 : f32
    %4 = vector.broadcast %cst : f32 to vector<128x128xf32>
    %5 = arith.cmpf ogt, %3, %4 : vector<128x128xf32>
    %6 = vector.shape_cast %5 : vector<128x128xi1> to vector<1x128x128xi1>
    %7 = vector.broadcast %2 : vector<8x1x128xf32> to vector<8x128x128xf32>
    %8 = vector.broadcast %1 : vector<8x128x1xf32> to vector<8x128x128xf32>
    %9 = arith.cmpf olt, %7, %8 : vector<8x128x128xf32>
    %10 = vector.broadcast %2 : vector<8x1x128xf32> to vector<8x128x128xf32>
    %11 = vector.broadcast %1 : vector<8x128x1xf32> to vector<8x128x128xf32>
    %12 = arith.cmpf oeq, %10, %11 : vector<8x128x128xf32>
    %13 = vector.broadcast %6 : vector<1x128x128xi1> to vector<8x128x128xi1>
    %14 = arith.andi %12, %13 : vector<8x128x128xi1>
    %15 = arith.ori %9, %14 : vector<8x128x128xi1>
    %16 = arith.extui %15 : vector<8x128x128xi1> to vector<8x128x128xi32>
    %17 = arith.sitofp %16 : vector<8x128x128xi32> to vector<8x128x128xf32>
    %18 = arith.truncf %17 : vector<8x128x128xf32> to vector<8x128x128xbf16>
    %c0_3 = arith.constant 0 : index
    %c0_4 = arith.constant 0 : index
    %19 = vector.load %arg3[%c0_3, %c0_4] : memref<128x256xbf16, #tpu.memory_space<vmem>>, vector<128x256xbf16>
    %c0_5 = arith.constant 0 : index
    %c0_6 = arith.constant 0 : index
    %20 = vector.load %arg4[%c0_5, %c0_6] : memref<1x256xf32, #tpu.memory_space<vmem>>, vector<1x256xf32>
    %21 = vector.shape_cast %18 : vector<8x128x128xbf16> to vector<1024x128xbf16>
    %cst_7 = arith.constant dense<0.000000e+00> : vector<1024x256xf32>
    %22 = tpu.matmul %21, %19, %cst_7 {dimension_numbers = #tpu.dot_dimension_numbers<[1], [0], [0], [1], [0, 0, 1, 1], [], []>} : vector<1024x128xbf16>, vector<128x256xbf16>, vector<1024x256xf32> -> vector<1024x256xf32>
    %23 = vector.shape_cast %22 : vector<1024x256xf32> to vector<8x128x256xf32>
    %c0_8 = arith.constant 0 : index
    %24 = memref.load %arg5[%c0_8] : memref<3xf32, #tpu.memory_space<smem>>
    %25 = vector.broadcast %24 : f32 to vector<8x128xf32>
    %26 = arith.mulf %0, %25 : vector<8x128xf32>
    %27 = vector.extract_strided_slice %23 {offsets = [0, 0, 0], sizes = [8, 128, 128], strides = [1, 1, 1]} : vector<8x128x256xf32> to vector<8x128x128xf32>
    %28 = vector.extract_strided_slice %19 {offsets = [0, 0], sizes = [128, 128], strides = [1, 1]} : vector<128x256xbf16> to vector<128x128xbf16>
    %cst_9 = arith.constant 5.000000e-01 : bf16
    %29 = vector.broadcast %cst_9 : bf16 to vector<128x128xbf16>
    %30 = arith.cmpf ogt, %28, %29 : vector<128x128xbf16>
    %31 = vector.shape_cast %30 : vector<128x128xi1> to vector<1x128x128xi1>
    %32 = vector.extract_strided_slice %20 {offsets = [0, 0], sizes = [1, 128], strides = [1, 1]} : vector<1x256xf32> to vector<1x128xf32>
    %33 = vector.shape_cast %32 : vector<1x128xf32> to vector<1x1x128xf32>
    %34 = vector.broadcast %33 : vector<1x1x128xf32> to vector<8x128x128xf32>
    %35 = arith.cmpf oeq, %27, %34 : vector<8x128x128xf32>
    %36 = vector.broadcast %31 : vector<1x128x128xi1> to vector<8x128x128xi1>
    %37 = arith.andi %35, %36 : vector<8x128x128xi1>
    %cst_10 = arith.constant 0.000000e+00 : f32
    %38 = vector.shape_cast %1 : vector<8x128x1xf32> to vector<8x128x1xf32>
    %39 = vector.broadcast %38 : vector<8x128x1xf32> to vector<8x128x128xf32>
    %40 = vector.broadcast %cst_10 : f32 to vector<8x128x128xf32>
    %41 = arith.select %37, %39, %40 : vector<8x128x128xi1>, vector<8x128x128xf32>
    %cst_11 = arith.constant dense<0.000000e+00> : vector<8x128xf32>
    %42 = vector.multi_reduction <add>, %41, %cst_11 [1] : vector<8x128x128xf32> to vector<8x128xf32>
    %c1 = arith.constant 1 : index
    %43 = memref.load %arg5[%c1] : memref<3xf32, #tpu.memory_space<smem>>
    %44 = vector.broadcast %43 : f32 to vector<8x128xf32>
    %45 = arith.mulf %44, %42 : vector<8x128xf32>
    %46 = arith.addf %26, %45 : vector<8x128xf32>
    %47 = vector.extract_strided_slice %23 {offsets = [0, 0, 128], sizes = [8, 128, 128], strides = [1, 1, 1]} : vector<8x128x256xf32> to vector<8x128x128xf32>
    %48 = vector.extract_strided_slice %19 {offsets = [0, 128], sizes = [128, 128], strides = [1, 1]} : vector<128x256xbf16> to vector<128x128xbf16>
    %cst_12 = arith.constant 5.000000e-01 : bf16
    %49 = vector.broadcast %cst_12 : bf16 to vector<128x128xbf16>
    %50 = arith.cmpf ogt, %48, %49 : vector<128x128xbf16>
    %51 = vector.shape_cast %50 : vector<128x128xi1> to vector<1x128x128xi1>
    %52 = vector.extract_strided_slice %20 {offsets = [0, 128], sizes = [1, 128], strides = [1, 1]} : vector<1x256xf32> to vector<1x128xf32>
    %53 = vector.shape_cast %52 : vector<1x128xf32> to vector<1x1x128xf32>
    %54 = vector.broadcast %53 : vector<1x1x128xf32> to vector<8x128x128xf32>
    %55 = arith.cmpf oeq, %47, %54 : vector<8x128x128xf32>
    %56 = vector.broadcast %51 : vector<1x128x128xi1> to vector<8x128x128xi1>
    %57 = arith.andi %55, %56 : vector<8x128x128xi1>
    %cst_13 = arith.constant 0.000000e+00 : f32
    %58 = vector.shape_cast %1 : vector<8x128x1xf32> to vector<8x128x1xf32>
    %59 = vector.broadcast %58 : vector<8x128x1xf32> to vector<8x128x128xf32>
    %60 = vector.broadcast %cst_13 : f32 to vector<8x128x128xf32>
    %61 = arith.select %57, %59, %60 : vector<8x128x128xi1>, vector<8x128x128xf32>
    %cst_14 = arith.constant dense<0.000000e+00> : vector<8x128xf32>
    %62 = vector.multi_reduction <add>, %61, %cst_14 [1] : vector<8x128x128xf32> to vector<8x128xf32>
    %c2 = arith.constant 2 : index
    %63 = memref.load %arg5[%c2] : memref<3xf32, #tpu.memory_space<smem>>
    %64 = vector.broadcast %63 : f32 to vector<8x128xf32>
    %65 = arith.mulf %64, %62 : vector<8x128xf32>
    %66 = arith.addf %46, %65 : vector<8x128xf32>
    %c0_15 = arith.constant 0 : index
    %c0_16 = arith.constant 0 : index
    %67 = vector.load %arg6[%c0_15, %c0_16] : memref<8x128xf32, #tpu.memory_space<vmem>>, vector<8x128xf32>
    tpu.vector_store %arg6[%c0_15, %c0_16], %66 {strides = array<i32>} : memref<8x128xf32, #tpu.memory_space<vmem>>, vector<8x128xf32>,
    return
  }
  func.func @transform_0(%arg0: i32) -> (i32, i32) {
    %c0_i32 = arith.constant 0 : i32
    %c0_i32_0 = arith.constant 0 : i32
    return %arg0, %c0_i32 : i32, i32
  }
  func.func @transform_1(%arg0: i32) -> (i32, i32) {
    %c0_i32 = arith.constant 0 : i32
    %c0_i32_0 = arith.constant 0 : i32
    %c0_i32_1 = arith.constant 0 : i32
    return %c0_i32, %c0_i32_0 : i32, i32
  }
  func.func @transform_2(%arg0: i32) -> (i32, i32) {
    %c0_i32 = arith.constant 0 : i32
    %c0_i32_0 = arith.constant 0 : i32
    %c0_i32_1 = arith.constant 0 : i32
    return %c0_i32, %c0_i32_0 : i32, i32
  }
  func.func @transform_3(%arg0: i32) -> (i32, i32) {
    %c0_i32 = arith.constant 0 : i32
    %c0_i32_0 = arith.constant 0 : i32
    %c0_i32_1 = arith.constant 0 : i32
    return %c0_i32, %c0_i32_0 : i32, i32
  }
  func.func @transform_4(%arg0: i32) -> i32 {
    %c0_i32 = arith.constant 0 : i32
    %c0_i32_0 = arith.constant 0 : i32
    return %c0_i32 : i32
  }
  func.func @transform_5(%arg0: i32) -> (i32, i32) {
    %c0_i32 = arith.constant 0 : i32
    %c0_i32_0 = arith.constant 0 : i32
    return %arg0, %c0_i32 : i32, i32
  }
}

</mosaic_0001>

<bundles_post_ra>
// kernel: tpu_custom_call.1
= control target key start
LH: loop header
LB: loop body
LE: loop exit
PB: predicated region body
PF: predicated region fallthrough
CT: control target
= control target key end

     0   :  { %10 = vsyncpa [#allocation3], 0  ;;  %s9122_s0 = inlined_call_operand.hbm [shape: f32[8,128], index: 0, kind: input, shape index: {}]   ;;  %s9123_s1 = inlined_call_operand.hbm [shape: f32[128,128], index: 1, kind: input, shape index: {}]   ;;  %s9124_s2 = inlined_call_operand.hbm [shape: bf16[128,256], index: 2, kind: input, shape index: {}]   ;;  %s9125_s3 = inlined_call_operand.vmem [shape: f32[1,256], index: 3, kind: input, shape index: {}]   ;;  %s9126_s4 = inlined_call_operand.vmem [shape: f32[3], index: 4, kind: input, shape index: {}]   ;;  %s9127_s5 = inlined_call_operand.hbm [shape: f32[8,128], index: 5, kind: output, shape index: {}]  }
   0x1   :  { %11 = vsyncpa [#allocation7], 0 }
   0x2   :  { %12 = vsyncpa [#allocation5], 0  ;;  %s29_s20 = sshll.u32 %s9123_s1, 4  ;;  %s30_s20 = int_to_ptr.hbm [resolvable:$true] %s29_s20 }
   0x3   :  { %13 = vsyncpa [#allocation4], 0  ;;  %s4796_s21 = smov [#allocation6]   ;;  %s19_s25 = sshll.u32 %s9122_s0, 4  ;;  %s20_s25 = int_to_ptr.hbm [resolvable:$true] %s19_s25 }
   0x4   :  { %s31_s22 = sshll.u32 %s4796_s21, 4  ;;  %s4797_s26 = smov 128   ;;  %s32_s22 = int_to_ptr.vmem [resolvable:$true] %s31_s22 }
   0x5   :  { %s4798_s27 = smov 8   ;;  %s4799_s28 = smov [#allocation2]  }
   0x6   :  { %37 = dma.hbm_to_vmem [thread:$0]  %s30_s20, 2048, %s32_s22, [#allocation7], %s4797_s26, %s4797_s26, %s4798_s27  }
   0x7   :  { %s21_s29 = sshll.u32 %s4799_s28, 4  ;;  %s42_s7 = sshll.u32 %s9124_s2, 4  ;;  %s22_s29 = int_to_ptr.vmem [resolvable:$true] %s21_s29  ;;  %s43_s7 = int_to_ptr.hbm [resolvable:$true] %s42_s7 }
   0x8   :  { %24 = dma.hbm_to_vmem [thread:$0]  %s20_s25, 128, %s22_s29, [#allocation3]  }
   0x9   :  { %s58_s9 = sshll.u32 %s9126_s4, 4  ;;  %s4800_s10 = smov [#allocation8]   ;;  %s59_s9 = int_to_ptr.vmem [resolvable:$true] %s58_s9 }
   0xa   :  { %s44_s11 = sshll.u32 %s4800_s10, 4  ;;  %s4801_s0 = smov [#allocation9]   ;;  %s45_s11 = int_to_ptr.vmem [resolvable:$true] %s44_s11 }
   0xb   :  { %50 = dma.hbm_to_vmem [thread:$0]  %s43_s7, 2048, %s45_s11, [#allocation7], %s4797_s26, %s4797_s26, %s4798_s27  }
   0xc   :  { %61 = dma.vmem_to_smem %s59_s9, 16, %s4801_s0, [#allocation5]  }
   0xd   :  { %4788 = dma.done.wait [#allocation3], 128  }
   0xe   :  { %4789 = vsyncadd [#allocation3], 4294967168 }
   0xf   :  { %4790 = dma.done.wait [#allocation7], 4096  }
  0x10   :  { %4791 = vsyncadd [#allocation7], 4294963200 }
  0x11   :  { %4792 = dma.done.wait [#allocation5], 16  }
  0x12   :  { %4793 = vsyncadd [#allocation5], 4294967280 }
  0x13   :  { %78 = sfence }
  0x14   :  { %v81_v0 = vlaneseq  ;;  %v4855_v4 = vld [vmem:[#allocation2] sm:$0xff]  ;;  %v4519_v15 = vld [vmem:[#allocation8 + $0x70] sm:$0xf]  ;;  %v4541_v17 = vld [vmem:[#allocation8 + $0x74] sm:$0xf]  ;;  %s7409_s12 = sld [smem:[#allocation9 + $0x2]] }
  0x15   :  { %v4860_v5 = vperm.slane %v4855_v4, 0  ;;  %v4902_v13 = vperm.slane %v4855_v4, 4  ;;  %v4542_v16 = vld [vmem:[#allocation8 + $0x74] sm:$0xf0]  ;;  %v4521_v19 = vld [vmem:[#allocation8 + $0x78] sm:$0xf0] }
  0x16   :  { %v4846_v1 = vshrl.u32 %v81_v0, 7  ;;  %v4520_v18 = vor.u32 %v4542_v16, %v4519_v15  ;;  %v4511_v20 = vld [vmem:[#allocation8 + $0x60] sm:$0xf]  ;;  %v4540_v21 = vld [vmem:[#allocation8 + $0x64] sm:$0xf0]  ;;  %v4524_v22 = vor.u32 %v4541_v17, %v4521_v19  ;;  %v9143_v19 = vmov 0.0  }
  0x17   :  { %v4539_v23 = vld [vmem:[#allocation8 + $0x64] sm:$0xf]  ;;  %v4513_v24 = vld [vmem:[#allocation8 + $0x68] sm:$0xf0]  ;;  %v4512_v25 = vor.u32 %v4540_v21, %v4511_v20  ;;  %v4503_v27 = vld [vmem:[#allocation8 + $0x50] sm:$0xf] }
  0x18   :  { %9515 = vst [vmem:[#allocation15_spill] sm:$0xff] %v4846_v1  ;;  %4567 = vset.pattern.permute.xlu0 %v4846_v1  ;;  %v4850_v2 = vadd.s32 32, %v4846_v1  ;;  %v4853_v3 = vadd.s32 16, %v4846_v1  ;;  %v4866_v6 = vadd.s32 8, %v4846_v1  ;;  %v4869_v7 = vadd.s32 40, %v4846_v1  ;;  %2321 = vmatpush.bf16.msra.mxu0 %v4520_v18  ;;  %v4936_v15 = vld [vmem:[#allocation6] sm:$0xff] }
  0x19   :  { %v4872_v8 = vadd.s32 24, %v4846_v1  ;;  %v4881_v9 = vadd.s32 64, %v4846_v1  ;;  %v4884_v10 = vadd.s32 56, %v4846_v1  ;;  %v4887_v11 = vadd.s32 48, %v4846_v1  ;;  %4543 = vmatpush.bf16.msra.mxu2 %v4520_v18  ;;  %2650 = vmatpush.bf16.msra.mxu1 %v4524_v22  ;;  %v4538_v28 = vld [vmem:[#allocation8 + $0x54] sm:$0xf0] }
  0x1a   :  { %9516 = vst [vmem:[#allocation16_spill] sm:$0xff] %v4850_v2  ;;  %4571 = vset.pattern.permute.xlu2 %v4850_v2  ;;  %4569 = vset.pattern.permute.xlu1 %v4853_v3  ;;  %v4896_v12 = vadd.s32 72, %v4846_v1  ;;  %v4908_v14 = vadd.s32 80, %v4846_v1  ;;  %v4516_v26 = vor.u32 %v4539_v23, %v4513_v24  ;;  %v4537_v29 = vld [vmem:[#allocation8 + $0x54] sm:$0xf]  ;;  %v4504_v30 = vor.u32 %v4538_v28, %v4503_v27  ;;  %v4951_v18 = vld [vmem:[#allocation6 + $0x8] sm:$0xff] }
  0x1b   :  { %9517 = vst [vmem:[#allocation17_spill] sm:$0xff] %v4853_v3  ;;  %4551 = vmatpush.bf16.msra.mxu3 %v4524_v22  ;;  %v4505_v31 = vld [vmem:[#allocation8 + $0x58] sm:$0xf0]  ;;  %v4495_v32 = vld [vmem:[#allocation8 + $0x40] sm:$0xf]  ;;  %v4923_v37 = vadd.s32 88, %v4846_v1 }
  0x1c   :  { %9518 = vst [vmem:[#allocation18_spill] sm:$0xff] %v4866_v6  ;;  %2322 = vmatpush.bf16.msra.mxu0 %v4512_v25  ;;  %v4536_v33 = vld [vmem:[#allocation8 + $0x44] sm:$0xf0]  ;;  %v4508_v34 = vor.u32 %v4537_v29, %v4505_v31  ;;  %v4535_v35 = vld [vmem:[#allocation8 + $0x44] sm:$0xf]  ;;  %v4930_v62 = vadd.s32 96, %v4846_v1 }
  0x1d   :  { %9519 = vst [vmem:[#allocation19_spill] sm:$0xff] %v4869_v7  ;;  %4544 = vmatpush.bf16.msra.mxu2 %v4512_v25  ;;  %2651 = vmatpush.bf16.msra.mxu1 %v4516_v26  ;;  %v4497_v36 = vld [vmem:[#allocation8 + $0x48] sm:$0xf0]  ;;  %v4496_v38 = vor.u32 %v4536_v33, %v4495_v32  ;;  %v4487_v40 = vld [vmem:[#allocation8 + $0x30] sm:$0xf]  ;;  %vm9131_vm1 = vcmp.gt.f32.partialorder %v4936_v15, 0.0 }
  0x1e   :  { %9520 = vst [vmem:[#allocation20_spill] sm:$0xff] %v4872_v8  ;;  %v4500_v39 = vor.u32 %v4535_v35, %v4497_v36  ;;  %v4534_v41 = vld [vmem:[#allocation8 + $0x34] sm:$0xf0]  ;;  %v4533_v42 = vld [vmem:[#allocation8 + $0x34] sm:$0xf]  ;;  %vm9130_vm5 = vcmp.gt.f32.partialorder %v4951_v18, 0.0 }
  0x1f   :  { %9521 = vst [vmem:[#allocation21_spill] sm:$0xff] %v4881_v9  ;;  %4552 = vmatpush.bf16.msra.mxu3 %v4516_v26  ;;  %v4488_v43 = vor.u32 %v4534_v41, %v4487_v40  ;;  %v4489_v44 = vld [vmem:[#allocation8 + $0x38] sm:$0xf0]  ;;  %v4479_v45 = vld [vmem:[#allocation8 + $0x20] sm:$0xf]  ;;  %v4970_v25 = vadd.s32 112, %v4846_v1 }
  0x20   :  { %85 = vperm.xlu0 %4567, %v4860_v5   ;;  %9522 = vst [vmem:[#allocation22_spill] sm:$0xff] %v4884_v10  ;;  %2323 = vmatpush.bf16.msra.mxu0 %v4504_v30  ;;  %v4492_v46 = vor.u32 %v4533_v42, %v4489_v44  ;;  %v4532_v47 = vld [vmem:[#allocation8 + $0x24] sm:$0xf0]  ;;  %v4531_v48 = vld [vmem:[#allocation8 + $0x24] sm:$0xf]  ;;  %v4967_v24 = vld [vmem:[#allocation6 + $0x18] sm:$0xff] }
  0x21   :  { %9523 = vst [vmem:[#allocation23_spill] sm:$0xff] %v4887_v11  ;;  %4545 = vmatpush.bf16.msra.mxu2 %v4504_v30  ;;  %2652 = vmatpush.bf16.msra.mxu1 %v4508_v34  ;;  %v4481_v49 = vld [vmem:[#allocation8 + $0x28] sm:$0xf0]  ;;  %v4480_v50 = vor.u32 %v4532_v47, %v4479_v45  ;;  %v4471_v52 = vld [vmem:[#allocation8 + $0x10] sm:$0xf]  ;;  %v4973_v26 = vadd.s32 104, %v4846_v1 }
  0x22   :  { %109 = vperm.xlu2 %4571, %v4860_v5   ;;  %97 = vperm.xlu1 %4569, %v4860_v5   ;;  %9524 = vst [vmem:[#allocation24_spill] sm:$0xff] %v4896_v12  ;;  %v4484_v51 = vor.u32 %v4531_v48, %v4481_v49  ;;  %v4530_v53 = vld [vmem:[#allocation8 + $0x14] sm:$0xf0]  ;;  %v4529_v54 = vld [vmem:[#allocation8 + $0x14] sm:$0xf]  ;;  %vm9133_vm10 = vcmp.gt.f32.partialorder %v4967_v24, 0.0 }
  0x23   :  { %9525 = vst [vmem:[#allocation25_spill] sm:$0xff] %v4908_v14  ;;  %4553 = vmatpush.bf16.msra.mxu3 %v4508_v34  ;;  %v4472_v55 = vor.u32 %v4530_v53, %v4471_v52  ;;  %v4473_v56 = vld [vmem:[#allocation8 + $0x18] sm:$0xf0]  ;;  %v4463_v57 = vld [vmem:[#allocation8] sm:$0xf]  ;;  %v4976_v28 = vld [vmem:[#allocation6 + $0x10] sm:$0xff] }
  0x24   :  { %9526 = vst [vmem:[#allocation26_spill] sm:$0xff] %v4923_v37  ;;  %2324 = vmatpush.bf16.msra.mxu0 %v4496_v38  ;;  %v4528_v58 = vld [vmem:[#allocation8 + $0x4] sm:$0xf0]  ;;  %v4476_v59 = vor.u32 %v4529_v54, %v4473_v56  ;;  %v4527_v60 = vld [vmem:[#allocation8 + $0x4] sm:$0xf]  ;;  %vm9132_vm12 = vcmp.gt.f32.partialorder %v4976_v28, 0.0 }
  0x25   :  { %2653 = vmatpush.bf16.msra.mxu1 %v4500_v39  ;;  %4546 = vmatpush.bf16.msra.mxu2 %v4496_v38  ;;  %v4465_v61 = vld [vmem:[#allocation8 + $0x8] sm:$0xf0]  ;;  %9527 = vst [vmem:[#allocation27_spill] sm:$0xff] %v4930_v62  ;;  %v4464_v63 = vor.u32 %v4528_v58, %v4463_v57  ;;  %v5002_v38 = vld [vmem:[#allocation6 + $0x20] sm:$0xff]  ;;  %v5030_v48 = vadd.s32 120, %v4846_v1  ;;  %v5033_v49 = vperm.slane %v4855_v4, 5 }
  0x26   :  { %v4468_v0 = vor.u32 %v4527_v60, %v4465_v61  ;;  %9528 = vst [vmem:[#allocation28_spill] sm:$0xff] %v4936_v15  ;;  %v5006_v40 = vld [vmem:[#allocation6 + $0x28] sm:$0xff]  ;;  %s9097_s13 = sld [smem:[#allocation9]]  ;;  %s4803_s14 = smov [#allocation10]  }
  0x27   :  { %4554 = vmatpush.bf16.msra.mxu3 %v4500_v39  ;;  %9529 = vst [vmem:[#allocation29_spill] sm:$0xff] %v4951_v18  ;;  %s4319_s15 = sshll.u32 %s4803_s14, 4  ;;  %s4321_s18 = sshll.u32 %s9127_s5, 4  ;;  %s4320_s15 = int_to_ptr.vmem [resolvable:$true] %s4319_s15  ;;  %s4322_s18 = int_to_ptr.hbm [resolvable:$true] %s4321_s18 }
  0x28   :  { %4568 = vset.pattern.permute.xlu0 %v4866_v6  ;;  %2325 = vmatpush.bf16.msra.mxu0 %v4488_v43  ;;  %9530 = vst [vmem:[#allocation30_spill] sm:$0xff] %v4967_v24 }
  0x29   :  { %2654 = vmatpush.bf16.msra.mxu1 %v4492_v46  ;;  %4547 = vmatpush.bf16.msra.mxu2 %v4488_v43  ;;  %9531 = vst [vmem:[#allocation31_spill] sm:$0xff] %v4970_v25 }
  0x2a   :  { %4572 = vset.pattern.permute.xlu2 %v4869_v7  ;;  %4570 = vset.pattern.permute.xlu1 %v4872_v8  ;;  %9532 = vst [vmem:[#allocation32_spill] sm:$0xff] %v4976_v28 }
  0x2b   :  { %4555 = vmatpush.bf16.msra.mxu3 %v4492_v46  ;;  %9533 = vst [vmem:[#allocation33_spill] sm:$0xff] %v5002_v38 }
  0x2c   :  { %2326 = vmatpush.bf16.msra.mxu0 %v4480_v50 }
  0x2d   :  { %2655 = vmatpush.bf16.msra.mxu1 %v4484_v51  ;;  %4548 = vmatpush.bf16.msra.mxu2 %v4480_v50  ;;  %v860_v50 = vrot.slane %v4855_v4, 4 }
  0x2f   :  { %4556 = vmatpush.bf16.msra.mxu3 %v4484_v51  ;;  %v5037_v51 = vld [vmem:[#allocation6 + $0x38] sm:$0xff]  ;;  %v5047_v56 = vperm.slane %v860_v50, 0 }
  0x30   :  { %91 = vperm.xlu0 %4568, %v4860_v5   ;;  %2327 = vmatpush.bf16.msra.mxu0 %v4472_v55  ;;  %9534 = vst [vmem:[#allocation34_spill] sm:$0xff] %v5037_v51 }
  0x31   :  { %2656 = vmatpush.bf16.msra.mxu1 %v4476_v59  ;;  %4549 = vmatpush.bf16.msra.mxu2 %v4472_v55  ;;  %v5043_v55 = vld [vmem:[#allocation6 + $0x30] sm:$0xff] }
  0x32   :  { %115 = vperm.xlu2 %4572, %v4860_v5   ;;  %103 = vperm.xlu1 %4570, %v4860_v5   ;;  %9535 = vst [vmem:[#allocation35_spill] sm:$0xff] %v5043_v55 }
  0x33   :  { %4557 = vmatpush.bf16.msra.mxu3 %v4476_v59 }
  0x34   :  { %2328 = vmatpush.bf16.msra.mxu0 %v4464_v63 }
  0x35   :  { %2657 = vmatpush.bf16.msra.mxu1 %v4468_v0  ;;  %4550 = vmatpush.bf16.msra.mxu2 %v4464_v63 }
  0x37   :  { %4558 = vmatpush.bf16.msra.mxu3 %v4468_v0 }
  0x38   :  { %4575 = vset.pattern.permute.xlu0 %v4881_v9 }
  0x3a   :  { %4574 = vset.pattern.permute.xlu2 %v4884_v10  ;;  %4573 = vset.pattern.permute.xlu1 %v4887_v11 }
  0x40   :  { %133 = vperm.xlu0 %4575, %v4860_v5  }
  0x42   :  { %127 = vperm.xlu2 %4574, %v4860_v5   ;;  %121 = vperm.xlu1 %4573, %v4860_v5  }
  0x48   :  { %4580 = vset.pattern.permute.xlu0 %v4853_v3 }
  0x4a   :  { %4577 = vset.pattern.permute.xlu2 %v4846_v1  ;;  %4576 = vset.pattern.permute.xlu1 %v4896_v12 }
  0x50   :  { %485 = vperm.xlu0 %4580, %v4902_v13  }
  0x52   :  { %473 = vperm.xlu2 %4577, %v4902_v13   ;;  %139 = vperm.xlu1 %4576, %v4860_v5  }
  0x58   :  { %4585 = vset.pattern.permute.xlu0 %v4887_v11 }
  0x5a   :  { %4579 = vset.pattern.permute.xlu2 %v4908_v14  ;;  %4578 = vset.pattern.permute.xlu1 %v4866_v6 }
  0x60   :  { %509 = vperm.xlu0 %4585, %v4902_v13  }
  0x62   :  { %145 = vperm.xlu2 %4579, %v4860_v5   ;;  %479 = vperm.xlu1 %4578, %v4902_v13  }
  0x68   :  { %4590 = vset.pattern.permute.xlu0 %v4908_v14 }
  0x6a   :  { %4582 = vset.pattern.permute.xlu2 %v4850_v2  ;;  %4581 = vset.pattern.permute.xlu1 %v4872_v8 }
  0x70   :  { %533 = vperm.xlu0 %4590, %v4902_v13  }
  0x72   :  { %497 = vperm.xlu2 %4582, %v4902_v13   ;;  %491 = vperm.xlu1 %4581, %v4902_v13  }
  0x78   :  { %4594 = vset.pattern.permute.xlu0 %v4970_v25 }
  0x7a   :  { %4584 = vset.pattern.permute.xlu2 %v4923_v37  ;;  %4583 = vset.pattern.permute.xlu1 %v4869_v7 }
  0x7c   :  { %v4985_v32 = vpop.permute.xlu2 %109 }
  0x80   :  { %169 = vperm.xlu0 %4594, %v4860_v5  }
  0x82   :  { %151 = vperm.xlu2 %4584, %v4860_v5   ;;  %503 = vperm.xlu1 %4583, %v4902_v13  }
  0x88   :  { %4599 = vset.pattern.permute.xlu0 %v4866_v6 }
  0x8a   :  { %4587 = vset.pattern.permute.xlu2 %v4930_v62  ;;  %4586 = vset.pattern.permute.xlu1 %v4884_v10 }
  0x8c   :  { %v5004_v39 = vpop.permute.xlu2 %115 }
  0x90   :  { %576 = vperm.xlu0 %4599, %v5033_v49  }
  0x92   :  { %157 = vperm.xlu2 %4587, %v4860_v5   ;;  %515 = vperm.xlu1 %4586, %v4902_v13   ;;  %v4938_v16 = vpop.permute.xlu0 %85 }
  0x93   :  { %vm1040_vm0 = vcmp.eq.f32.partialorder %v4860_v5, %v4938_v16  ;;  %vm912_vm2 = vcmp.lt.f32.partialorder %v4860_v5, %v4938_v16 }
  0x94   :  { %vm1200_vm3 = vmand %vm1040_vm0, %vm9131_vm1  ;;  %v4949_v17 = vpop.permute.xlu1 %97 }
  0x95   :  { %vm1328_vm4 = vmor %vm912_vm2, %vm1200_vm3  ;;  %vm1042_vm13 = vcmp.eq.f32.partialorder %v4860_v5, %v4949_v17  ;;  %vm914_vm0 = vcmp.lt.f32.partialorder %v4860_v5, %v4949_v17 }
  0x96   :  { %v4333_v20 = vsel %vm1328_vm4, 1.0, %v9143_v19  ;;  %vm1202_vm2 = vmand %vm1042_vm13, %vm9132_vm12 }
  0x97   :  { %v1712_v22 = vpack.c.bf16 %v4333_v20, %v4333_v20  ;;  %vm1330_vm4 = vmor %vm914_vm0, %vm1202_vm2 }
  0x98   :  { %v4335_v35 = vsel %vm1330_vm4, 1.0, %v9143_v19  ;;  %vm9128_vm4 = vcmp.gt.f32.partialorder %v5037_v51, 0.0  ;;  %4604 = vset.pattern.permute.xlu0 %v4853_v3 }
  0x99   :  { %v1985_v30 = vunpack.c.l.b16 %v1712_v22  ;;  %v1714_v41 = vpack.c.bf16 %v4335_v35, %v4335_v35  ;;  %v5091_v35 = vld [vmem:[#allocation6 + $0x48] sm:$0xff] }
  0x9a   :  { %4589 = vset.pattern.permute.xlu2 %v4896_v12  ;;  %4588 = vset.pattern.permute.xlu1 %v4881_v9  ;;  %9537 = vst [vmem:[#allocation37_spill] sm:$0xff] %v5091_v35 }
  0x9b   :  { %v1987_v43 = vunpack.c.l.b16 %v1714_v41 }
  0x9c   :  { %v5025_v45 = vpop.permute.xlu2 %127 }
  0xa2   :  { %527 = vperm.xlu2 %4589, %v4902_v13   ;;  %521 = vperm.xlu1 %4588, %v4902_v13   ;;  %v4957_v21 = vpop.permute.xlu0 %91 }
  0xa3   :  { %vm913_vm6 = vcmp.lt.f32.partialorder %v4860_v5, %v4957_v21  ;;  %vm1041_vm7 = vcmp.eq.f32.partialorder %v4860_v5, %v4957_v21 }
  0xa4   :  { %v4963_v23 = vpop.permute.xlu1 %103  ;;  %vm1201_vm8 = vmand %vm1041_vm7, %vm9130_vm5  ;;  %vm1044_vm7 = vcmp.eq.f32.partialorder %v4860_v5, %v4985_v32 }
  0xa5   :  { %vm1329_vm9 = vmor %vm913_vm6, %vm1201_vm8  ;;  %vm1043_vm11 = vcmp.eq.f32.partialorder %v4860_v5, %v4963_v23  ;;  %vm915_vm14 = vcmp.lt.f32.partialorder %v4860_v5, %v4963_v23  ;;  %vm9197_vm6 = vcmp.gt.f32.partialorder %v5002_v38, 0.0  ;;  %vm9129_vm8 = vcmp.gt.f32.partialorder %v5006_v40, 0.0 }
  0xa6   :  { %v4334_v27 = vsel %vm1329_vm9, 1.0, %v9143_v19  ;;  %vm1203_vm15 = vmand %vm1043_vm11, %vm9133_vm10  ;;  %vm1045_vm9 = vcmp.eq.f32.partialorder %v4860_v5, %v5004_v39  ;;  %vm916_vm11 = vcmp.lt.f32.partialorder %v4860_v5, %v4985_v32 }
  0xa7   :  { %v1713_v29 = vpack.c.bf16 %v4334_v27, %v4334_v27  ;;  %vm1331_vm3 = vmor %vm915_vm14, %vm1203_vm15  ;;  %vm917_vm14 = vcmp.lt.f32.partialorder %v4860_v5, %v5004_v39  ;;  %v5080_v27 = vld [vmem:[#allocation6 + $0x40] sm:$0xff] }
  0xa8   :  { %v4336_v34 = vsel %vm1331_vm3, 1.0, %v9143_v19  ;;  %vm1204_vm13 = vmand %vm1044_vm7, %vm9197_vm6  ;;  %vm1047_vm3 = vcmp.eq.f32.partialorder %v4860_v5, %v5025_v45  ;;  %9536 = vst [vmem:[#allocation36_spill] sm:$0xff] %v5080_v27 }
  0xa9   :  { %v1986_v31 = vunpack.c.l.b16 %v1713_v29  ;;  %v1715_v36 = vpack.c.bf16 %v4336_v34, %v4336_v34  ;;  %vm1205_vm15 = vmand %vm1045_vm9, %vm9129_vm8  ;;  %vm9134_vm9 = vcmp.gt.f32.partialorder %v5043_v55, 0.0  ;;  %v5083_v29 = vperm.slane %v4855_v4, 1 }
  0xaa   :  { %4592 = vset.pattern.permute.xlu2 %v4973_v26  ;;  %4591 = vset.pattern.permute.xlu1 %v4923_v37  ;;  %vm1332_vm0 = vmor %vm916_vm11, %vm1204_vm13  ;;  %vm919_vm11 = vcmp.lt.f32.partialorder %v4860_v5, %v5025_v45 }
  0xab   :  { %v2113_v33 = vpack.c.b16 %v1986_v31, %v1985_v30  ;;  %v1988_v42 = vunpack.c.l.b16 %v1715_v36  ;;  %vm1333_vm2 = vmor %vm917_vm14, %vm1205_vm15  ;;  %v4337_v46 = vsel %vm1332_vm0, 1.0, %v9143_v19  ;;  %194 = vperm.xlu0 %4604, %v5083_v29  }
  0xac   :  { %v4338_v47 = vsel %vm1333_vm2, 1.0, %v9143_v19  ;;  %v1716_v52 = vpack.c.bf16 %v4337_v46, %v4337_v46  ;;  %v5050_v57 = vpop.permute.xlu2 %473  ;;  %vm1207_vm13 = vmand %vm1047_vm3, %vm9128_vm4 }
  0xad   :  { %2329 = vmatmul.bf16.vlgmr.msra.gmra.mxu0 %v2113_v33  ;;  %2658 = vmatmul.bf16.vlgmr.msra.gmra.mxu1 %v2113_v33  ;;  %v2114_v44 = vpack.c.b16 %v1988_v42, %v1987_v43  ;;  %v1717_v53 = vpack.c.bf16 %v4338_v47, %v4338_v47  ;;  %vm1104_vm14 = vcmp.eq.f32.partialorder %v5047_v56, %v5050_v57  ;;  %vm1335_vm2 = vmor %vm919_vm11, %vm1207_vm13 }
  0xae   :  { %v1989_v58 = vunpack.c.l.b16 %v1716_v52  ;;  %vm976_vm3 = vcmp.lt.f32.partialorder %v5047_v56, %v5050_v57  ;;  %vm1264_vm4 = vmand %vm1104_vm14, %vm9131_vm1  ;;  %v4340_v22 = vsel %vm1335_vm2, 1.0, %v9143_v19  ;;  %vm9173_vm2 = vcmp.gt.f32.partialorder %v5091_v35, 0.0 }
  0xaf   :  { %v1990_v59 = vunpack.c.l.b16 %v1717_v53  ;;  %v1719_v33 = vpack.c.bf16 %v4340_v22, %v4340_v22 }
  0xb1   :  { %v2115_v60 = vpack.c.b16 %v1990_v59, %v1989_v58  ;;  %v1992_v41 = vunpack.c.l.b16 %v1719_v33  ;;  %v5141_v33 = vld [vmem:[#allocation6 + $0x58] sm:$0xff] }
  0xb2   :  { %163 = vperm.xlu2 %4592, %v4860_v5   ;;  %539 = vperm.xlu1 %4591, %v4902_v13   ;;  %v5074_v63 = vpop.permute.xlu0 %133  ;;  %9540 = vst [vmem:[#allocation40_spill] sm:$0xff] %v5141_v33 }
  0xb3   :  { %4608 = vset.pattern.permute.xlu0 %v4869_v7 }
  0xb4   :  { %v5041_v54 = vpop.permute.xlu1 %121 }
  0xb5   :  { %vm1046_vm7 = vcmp.eq.f32.partialorder %v4860_v5, %v5041_v54  ;;  %vm918_vm15 = vcmp.lt.f32.partialorder %v4860_v5, %v5041_v54 }
  0xb6   :  { %vm1206_vm0 = vmand %vm1046_vm7, %vm9134_vm9 }
  0xb7   :  { %vm1334_vm8 = vmor %vm918_vm15, %vm1206_vm0 }
  0xb8   :  { %vm1392_vm7 = vmor %vm976_vm3, %vm1264_vm4  ;;  %v4339_v20 = vsel %vm1334_vm8, 1.0, %v9143_v19  ;;  %vm9181_vm8 = vcmp.gt.f32.partialorder %v5080_v27, 0.0  ;;  %vm1048_vm4 = vcmp.eq.f32.partialorder %v4860_v5, %v5074_v63  ;;  %vm920_vm3 = vcmp.lt.f32.partialorder %v4860_v5, %v5074_v63 }
  0xb9   :  { %v4397_v30 = vsel %vm1392_vm7, 1.0, %v9143_v19  ;;  %v1718_v31 = vpack.c.bf16 %v4339_v20, %v4339_v20  ;;  %vm1208_vm7 = vmand %vm1048_vm4, %vm9181_vm8 }
  0xba   :  { %4593 = vset.pattern.permute.xlu1 %v4930_v62  ;;  %551 = vperm.xlu2 %4592, %v4902_v13   ;;  %v1776_v4 = vpack.c.bf16 %v4397_v30, %v4397_v30  ;;  %vm1336_vm4 = vmor %vm920_vm3, %vm1208_vm7 }
  0xbb   :  { %v1991_v36 = vunpack.c.l.b16 %v1718_v31  ;;  %v4341_v53 = vsel %vm1336_vm4, 1.0, %v9143_v19  ;;  %212 = vperm.xlu0 %4608, %v5083_v29  }
  0xbc   :  { %v5076_v0 = vpop.permute.xlu2 %145  ;;  %v1720_v20 = vpack.c.bf16 %v4341_v53, %v4341_v53 }
  0xbd   :  { %2334 = vmatmul.bf16.gmra.mxu0 %v2114_v44  ;;  %2663 = vmatmul.bf16.gmra.mxu1 %v2114_v44  ;;  %v2049_v44 = vunpack.c.l.b16 %v1776_v4  ;;  %v2116_v47 = vpack.c.b16 %v1992_v41, %v1991_v36 }
  0xbe   :  { %v1993_v36 = vunpack.c.l.b16 %v1720_v20 }
  0xc2   :  { %545 = vperm.xlu1 %4593, %v4902_v13   ;;  %4596 = vset.pattern.permute.xlu2 %v5030_v48 }
  0xc3   :  { %4611 = vset.pattern.permute.xlu0 %v4881_v9 }
  0xc4   :  { %v5068_v61 = vpop.permute.xlu1 %139 }
  0xc5   :  { %vm1049_vm15 = vcmp.eq.f32.partialorder %v4860_v5, %v5068_v61 }
  0xca   :  { %4595 = vset.pattern.permute.xlu1 %v4970_v25  ;;  %563 = vperm.xlu2 %4596, %v4902_v13  }
  0xcb   :  { %618 = vperm.xlu0 %4611, %v5033_v49  }
  0xcc   :  { %v5117_v46 = vpop.permute.xlu2 %497 }
  0xcd   :  { %2339 = vmatmul.bf16.gmra.mxu0 %v2115_v60  ;;  %2668 = vmatmul.bf16.gmra.mxu1 %v2115_v60  ;;  %v5131_v60 = vld [vmem:[#allocation6 + $0x50] sm:$0xff] }
  0xce   :  { %9538 = vst [vmem:[#allocation38_spill] sm:$0xff] %v5131_v60  ;;  %vm9180_vm7 = vcmp.gt.f32.partialorder %v5131_v60, 0.0 }
  0xd2   :  { %557 = vperm.xlu1 %4595, %v4902_v13   ;;  %4598 = vset.pattern.permute.xlu2 %v4846_v1  ;;  %v5102_v13 = vpop.permute.xlu0 %485 }
  0xd3   :  { %4615 = vset.pattern.permute.xlu0 %v4923_v37 }
  0xd4   :  { %v5089_v34 = vpop.permute.xlu1 %479 }
  0xd5   :  { %vm977_vm11 = vcmp.lt.f32.partialorder %v5047_v56, %v5089_v34  ;;  %vm1105_vm13 = vcmp.eq.f32.partialorder %v5047_v56, %v5089_v34 }
  0xd6   :  { %vm1265_vm14 = vmand %vm1105_vm13, %vm9130_vm5  ;;  %vm1106_vm13 = vcmp.eq.f32.partialorder %v5047_v56, %v5102_v13  ;;  %vm921_vm5 = vcmp.lt.f32.partialorder %v4860_v5, %v5068_v61 }
  0xd7   :  { %vm1393_vm0 = vmor %vm977_vm11, %vm1265_vm14  ;;  %vm978_vm14 = vcmp.lt.f32.partialorder %v5047_v56, %v5102_v13 }
  0xd8   :  { %v4398_v42 = vsel %vm1393_vm0, 1.0, %v9143_v19  ;;  %vm1209_vm11 = vmand %vm1049_vm15, %vm9173_vm2 }
  0xd9   :  { %v1777_v43 = vpack.c.bf16 %v4398_v42, %v4398_v42  ;;  %vm1266_vm0 = vmand %vm1106_vm13, %vm9132_vm12 }
  0xda   :  { %4597 = vset.pattern.permute.xlu1 %v5030_v48  ;;  %570 = vperm.xlu2 %4598, %v5033_v49   ;;  %vm1337_vm1 = vmor %vm921_vm5, %vm1209_vm11  ;;  %vm1050_vm5 = vcmp.eq.f32.partialorder %v4860_v5, %v5076_v0 }
  0xdb   :  { %v2050_v50 = vunpack.c.l.b16 %v1777_v43  ;;  %vm1394_vm15 = vmor %vm978_vm14, %vm1266_vm0  ;;  %v4342_v58 = vsel %vm1337_vm1, 1.0, %v9143_v19  ;;  %vm9170_vm14 = vcmp.gt.f32.partialorder %v5141_v33, 0.0  ;;  %vm922_vm0 = vcmp.lt.f32.partialorder %v4860_v5, %v5076_v0  ;;  %636 = vperm.xlu0 %4615, %v5033_v49  }
  0xdc   :  { %v4399_v59 = vsel %vm1394_vm15, 1.0, %v9143_v19  ;;  %v1721_v22 = vpack.c.bf16 %v4342_v58, %v4342_v58  ;;  %v5137_v30 = vpop.permute.xlu2 %151  ;;  %vm1210_vm15 = vmand %vm1050_vm5, %vm9180_vm7  ;;  %vm980_vm5 = vcmp.lt.f32.partialorder %v5047_v56, %v5117_v46 }
  0xdd   :  { %2344 = vmatmul.bf16.gmra.mxu0 %v2116_v47  ;;  %2673 = vmatmul.bf16.gmra.mxu1 %v2116_v47  ;;  %v2145_v52 = vpack.c.b16 %v2050_v50, %v2049_v44  ;;  %9539 = vst [vmem:[#allocation39_spill] sm:$0xff] %v5137_v30  ;;  %v1778_v4 = vpack.c.bf16 %v4399_v59, %v4399_v59 }
  0xde   :  { %vm1051_vm11 = vcmp.eq.f32.partialorder %v4860_v5, %v5137_v30  ;;  %v1994_v41 = vunpack.c.l.b16 %v1721_v22 }
  0xdf   :  { %2489 = vmatmul.bf16.vlgmr.msra.gmra.mxu2 %v2145_v52  ;;  %2818 = vmatmul.bf16.vlgmr.msra.gmra.mxu3 %v2145_v52  ;;  %v2051_v44 = vunpack.c.l.b16 %v1778_v4 }
  0xe0   :  { %v2117_v47 = vpack.c.b16 %v1994_v41, %v1993_v36  ;;  %v5188_v41 = vpop.permute.xlu0 %509 }
  0xe1   :  { %9543 = vst [vmem:[#allocation42_spill] sm:$0xff] %v5188_v41 }
  0xe2   :  { %175 = vperm.xlu1 %4597, %v4860_v5   ;;  %4601 = vset.pattern.permute.xlu2 %v4866_v6 }
  0xe3   :  { %4620 = vset.pattern.permute.xlu0 %v4930_v62 }
  0xe4   :  { %v5139_v31 = vpop.permute.xlu1 %491 }
  0xe5   :  { %vm979_vm1 = vcmp.lt.f32.partialorder %v5047_v56, %v5139_v31  ;;  %vm1107_vm3 = vcmp.eq.f32.partialorder %v5047_v56, %v5139_v31 }
  0xe6   :  { %vm1267_vm13 = vmand %vm1107_vm3, %vm9133_vm10  ;;  %vm1108_vm3 = vcmp.eq.f32.partialorder %v5047_v56, %v5117_v46 }
  0xe7   :  { %vm1395_vm4 = vmor %vm979_vm1, %vm1267_vm13  ;;  %vm923_vm1 = vcmp.lt.f32.partialorder %v4860_v5, %v5137_v30 }
  0xe8   :  { %v4400_v42 = vsel %vm1395_vm4, 1.0, %v9143_v19  ;;  %vm1211_vm13 = vmand %vm1051_vm11, %vm9170_vm14 }
  0xe9   :  { %v1779_v43 = vpack.c.bf16 %v4400_v42, %v4400_v42  ;;  %vm1338_vm4 = vmor %vm922_vm0, %vm1210_vm15 }
  0xea   :  { %4600 = vset.pattern.permute.xlu1 %v4846_v1  ;;  %188 = vperm.xlu2 %4601, %v5083_v29   ;;  %vm1268_vm12 = vmand %vm1108_vm3, %vm9197_vm6  ;;  %v4343_v53 = vsel %vm1338_vm4, 1.0, %v9143_v19 }
  0xeb   :  { %v2052_v50 = vunpack.c.l.b16 %v1779_v43  ;;  %vm1339_vm10 = vmor %vm923_vm1, %vm1211_vm13  ;;  %v1722_v20 = vpack.c.bf16 %v4343_v53, %v4343_v53  ;;  %vm1110_vm1 = vcmp.eq.f32.partialorder %v5047_v56, %v5188_v41  ;;  %vm982_vm13 = vcmp.lt.f32.partialorder %v5047_v56, %v5188_v41  ;;  %254 = vperm.xlu0 %4620, %v5083_v29  }
  0xec   :  { %vm1396_vm11 = vmor %vm980_vm5, %vm1268_vm12  ;;  %v4344_v58 = vsel %vm1339_vm10, 1.0, %v9143_v19  ;;  %vm9542_vm10 = vcmp.gt.f32.partialorder %v5006_v40, 0.0 }
  0xed   :  { %2349 = vmatmul.bf16.gmra.mxu0 %v2117_v47  ;;  %2678 = vmatmul.bf16.gmra.mxu1 %v2117_v47  ;;  %v2146_v52 = vpack.c.b16 %v2052_v50, %v2051_v44  ;;  %v4401_v59 = vsel %vm1396_vm11, 1.0, %v9143_v19  ;;  %v1723_v22 = vpack.c.bf16 %v4344_v58, %v4344_v58  ;;  %v1995_v42 = vunpack.c.l.b16 %v1722_v20  ;;  %v5190_v44 = vpop.permute.xlu2 %157  ;;  %vm1270_vm4 = vmand %vm1110_vm1, %vm9134_vm9 }
  0xee   :  { %v1780_v36 = vpack.c.bf16 %v4401_v59, %v4401_v59  ;;  %9544 = vst [vmem:[#allocation43_spill] sm:$0xff] %v5190_v44  ;;  %v5202_v59 = vld [vmem:[#allocation6 + $0x60] sm:$0xff]  ;;  %vm1052_vm5 = vcmp.eq.f32.partialorder %v4860_v5, %v5190_v44  ;;  %vm1398_vm11 = vmor %vm982_vm13, %vm1270_vm4  ;;  %vm9548_vm13 = vcmp.gt.f32.partialorder %v5037_v51, 0.0 }
  0xef   :  { %2494 = vmatmul.bf16.gmra.mxu2 %v2146_v52  ;;  %2823 = vmatmul.bf16.gmra.mxu3 %v2146_v52  ;;  %v1996_v43 = vunpack.c.l.b16 %v1723_v22  ;;  %9545 = vst [vmem:[#allocation44_spill] sm:$0xff] %v5202_v59 }
  0xf0   :  { %v2053_v52 = vunpack.c.l.b16 %v1780_v36  ;;  %v4403_v36 = vsel %vm1398_vm11, 1.0, %v9143_v19 }
  0xf1   :  { %v2118_v53 = vpack.c.b16 %v1996_v43, %v1995_v42  ;;  %v1782_v43 = vpack.c.bf16 %v4403_v36, %v4403_v36 }
  0xf2   :  { %182 = vperm.xlu1 %4600, %v5083_v29   ;;  %4603 = vset.pattern.permute.xlu2 %v4872_v8 }
  0xf3   :  { %4624 = vset.pattern.permute.xlu0 %v5030_v48 }
  0xf4   :  { %v5180_v4 = vpop.permute.xlu1 %503 }
  0xf5   :  { %9541 = vst [vmem:[#allocation41_spill] sm:$0xff] %v5180_v4  ;;  %vm981_vm0 = vcmp.lt.f32.partialorder %v5047_v56, %v5180_v4  ;;  %vm1109_vm12 = vcmp.eq.f32.partialorder %v5047_v56, %v5180_v4 }
  0xf6   :  { %vm1269_vm15 = vmand %vm1109_vm12, %vm9542_vm10  ;;  %vm924_vm12 = vcmp.lt.f32.partialorder %v4860_v5, %v5190_v44 }
  0xf7   :  { %vm1397_vm3 = vmor %vm981_vm0, %vm1269_vm15  ;;  %vm9196_vm0 = vcmp.gt.f32.partialorder %v5202_v59, 0.0 }
  0xf8   :  { %v4402_v47 = vsel %vm1397_vm3, 1.0, %v9143_v19  ;;  %vm1212_vm10 = vmand %vm1052_vm5, %vm9196_vm0 }
  0xf9   :  { %v1781_v50 = vpack.c.bf16 %v4402_v47, %v4402_v47  ;;  %vm1340_vm1 = vmor %vm924_vm12, %vm1212_vm10 }
  0xfa   :  { %4602 = vset.pattern.permute.xlu1 %v4853_v3  ;;  %588 = vperm.xlu2 %4603, %v5033_v49  }
  0xfb   :  { %v2054_v58 = vunpack.c.l.b16 %v1781_v50  ;;  %v5228_v50 = vld [vmem:[#allocation6 + $0x68] sm:$0xff]  ;;  %272 = vperm.xlu0 %4624, %v5083_v29  }
  0xfc   :  { %v5210_v22 = vpop.permute.xlu2 %527  ;;  %9549 = vst [vmem:[#allocation47_spill] sm:$0xff] %v5228_v50  ;;  %vm9169_vm10 = vcmp.gt.f32.partialorder %v5228_v50, 0.0 }
  0xfd   :  { %2354 = vmatmul.bf16.gmra.mxu0 %v2118_v53  ;;  %2683 = vmatmul.bf16.gmra.mxu1 %v2118_v53  ;;  %v2147_v20 = vpack.c.b16 %v2054_v58, %v2053_v52  ;;  %9546 = vst [vmem:[#allocation45_spill] sm:$0xff] %v5210_v22  ;;  %vm1113_vm5 = vcmp.eq.f32.partialorder %v5047_v56, %v5210_v22  ;;  %v2055_v53 = vunpack.c.l.b16 %v1782_v43  ;;  %v4345_v58 = vsel %vm1340_vm1, 1.0, %v9143_v19 }
  0xfe   :  { %vm985_vm9 = vcmp.lt.f32.partialorder %v5047_v56, %v5210_v22  ;;  %vm1273_vm12 = vmand %vm1113_vm5, %vm9173_vm2 }
  0xff   :  { %2499 = vmatmul.bf16.gmra.mxu2 %v2147_v20  ;;  %2828 = vmatmul.bf16.gmra.mxu3 %v2147_v20  ;;  %vm1401_vm1 = vmor %vm985_vm9, %vm1273_vm12 }
 0x102   :  { %582 = vperm.xlu1 %4602, %v5033_v49   ;;  %4606 = vset.pattern.permute.xlu2 %v4850_v2 }
 0x103   :  { %4627 = vset.pattern.permute.xlu0 %v4853_v3  ;;  %v1843_v3 = vld [vmem:[#allocation8 + $0x18] sm:$0xff] }
 0x104   :  { %v5217_v42 = vpop.permute.xlu1 %515 }
 0x105   :  { %9547 = vst [vmem:[#allocation46_spill] sm:$0xff] %v5217_v42  ;;  %vm983_vm15 = vcmp.lt.f32.partialorder %v5047_v56, %v5217_v42  ;;  %vm1111_vm3 = vcmp.eq.f32.partialorder %v5047_v56, %v5217_v42 }
 0x106   :  { %vm1271_vm4 = vmand %vm1111_vm3, %vm9548_vm13 }
 0x107   :  { %vm1399_vm11 = vmor %vm983_vm15, %vm1271_vm4 }
 0x108   :  { %v4404_v47 = vsel %vm1399_vm11, 1.0, %v9143_v19 }
 0x109   :  { %v1783_v52 = vpack.c.bf16 %v4404_v47, %v4404_v47  ;;  %v1724_v47 = vpack.c.bf16 %v4345_v58, %v4345_v58 }
 0x10a   :  { %4605 = vset.pattern.permute.xlu1 %v4872_v8  ;;  %594 = vperm.xlu2 %4606, %v5033_v49   ;;  %v4406_v8 = vsel %vm1401_vm1, 1.0, %v9143_v19 }
 0x10b   :  { %v2056_v20 = vunpack.c.l.b16 %v1783_v52  ;;  %v1997_v2 = vunpack.c.l.b16 %v1724_v47 }
 0x10c   :  { %v5239_v36 = vpop.permute.xlu2 %163 }
 0x10d   :  { %9550 = vst [vmem:[#allocation48_spill] sm:$0xff] %v5239_v36  ;;  %vm925_vm15 = vcmp.lt.f32.partialorder %v4860_v5, %v5239_v36  ;;  %vm1053_vm3 = vcmp.eq.f32.partialorder %v4860_v5, %v5239_v36  ;;  %v2148_v43 = vpack.c.b16 %v2056_v20, %v2055_v53  ;;  %v1785_v20 = vpack.c.bf16 %v4406_v8, %v4406_v8 }
 0x10e   :  { %vm1213_vm13 = vmand %vm1053_vm3, %vm9169_vm10 }
 0x10f   :  { %2504 = vmatmul.bf16.gmra.mxu2 %v2148_v43  ;;  %2833 = vmatmul.bf16.gmra.mxu3 %v2148_v43  ;;  %vm1341_vm4 = vmor %vm925_vm15, %vm1213_vm13  ;;  %v5260_v43 = vpop.permute.xlu0 %533 }
 0x110   :  { %v4346_v52 = vsel %vm1341_vm4, 1.0, %v9143_v19  ;;  %9552 = vst [vmem:[#allocation50_spill] sm:$0xff] %v5260_v43  ;;  %vm1114_vm15 = vcmp.eq.f32.partialorder %v5047_v56, %v5260_v43  ;;  %vm986_vm3 = vcmp.lt.f32.partialorder %v5047_v56, %v5260_v43 }
 0x111   :  { %v1725_v35 = vpack.c.bf16 %v4346_v52, %v4346_v52  ;;  %v2058_v52 = vunpack.c.l.b16 %v1785_v20  ;;  %vm1274_vm1 = vmand %vm1114_vm15, %vm9180_vm7  ;;  %v1840_v20 = vld [vmem:[#allocation8] sm:$0xff] }
 0x112   :  { %200 = vperm.xlu1 %4605, %v5083_v29   ;;  %206 = vperm.xlu2 %4606, %v5083_v29   ;;  %vm1402_vm13 = vmor %vm986_vm3, %vm1274_vm1  ;;  %v2982_v33 = vunpack.c.l.bf16 %v1840_v20 }
 0x113   :  { %v1998_v36 = vunpack.c.l.b16 %v1725_v35 }
 0x114   :  { %v5252_v53 = vpop.permute.xlu1 %521  ;;  %vm5307_vm1 = vcmp.gt.f32.partialorder %v2982_v33, 0.5 }
 0x115   :  { %9551 = vst [vmem:[#allocation49_spill] sm:$0xff] %v5252_v53  ;;  %vm984_vm9 = vcmp.lt.f32.partialorder %v5047_v56, %v5252_v53  ;;  %vm1112_vm5 = vcmp.eq.f32.partialorder %v5047_v56, %v5252_v53  ;;  %v2119_v58 = vpack.c.b16 %v1998_v36, %v1997_v2  ;;  %v4407_v36 = vsel %vm1402_vm13, 1.0, %v9143_v19 }
 0x116   :  { %vm1272_vm11 = vmand %vm1112_vm5, %vm9181_vm8 }
 0x117   :  { %2359 = vmatmul.bf16.gmra.mxu0 %v2119_v58  ;;  %2688 = vmatmul.bf16.gmra.mxu1 %v2119_v58  ;;  %vm1400_vm12 = vmor %vm984_vm9, %vm1272_vm11 }
 0x118   :  { %v4405_v35 = vsel %vm1400_vm12, 1.0, %v9143_v19 }
 0x119   :  { %v1784_v47 = vpack.c.bf16 %v4405_v35, %v4405_v35  ;;  %v1856_v35 = vld [vmem:[%s9125_s3] sm:$0x3]  ;;  %s7397_s3 = sld [smem:[#allocation9 + $0x1]] }
 0x11a   :  { %4607 = vset.pattern.permute.xlu1 %v4869_v7  ;;  %4610 = vset.pattern.permute.xlu2 %v4884_v10  ;;  %v3699_v19 = vrot.slane %v1856_v35, 1  ;;  %v9555_v10 = vmov 0.0   ;;  %v5294_v55 = vperm.slane %v1856_v35, 0  ;;  %v5380_v35 = vld [vmem:[#allocation2] sm:$0xff] }
 0x11b   :  { %v2057_v2 = vunpack.c.l.b16 %v1784_v47  ;;  %v1786_v47 = vpack.c.bf16 %v4407_v36, %v4407_v36  ;;  %v861_v59 = vrot.slane %v5380_v35, 5 }
 0x11d   :  { %v2149_v8 = vpack.c.b16 %v2058_v52, %v2057_v2  ;;  %v5287_v52 = vpop.permute.xlu2 %551  ;;  %v1841_v2 = vld [vmem:[#allocation8 + $0x8] sm:$0xff]  ;;  %v2059_v27 = vunpack.c.l.b16 %v1786_v47 }
 0x11e   :  { %9554 = vst [vmem:[#allocation52_spill] sm:$0xff] %v5287_v52  ;;  %vm1117_vm12 = vcmp.eq.f32.partialorder %v5047_v56, %v5287_v52  ;;  %v3636_v22 = vrot.slane %v1841_v2, 4  ;;  %vm989_vm15 = vcmp.lt.f32.partialorder %v5047_v56, %v5287_v52 }
 0x11f   :  { %2509 = vmatmul.bf16.gmra.mxu2 %v2149_v8  ;;  %2838 = vmatmul.bf16.gmra.mxu3 %v2149_v8  ;;  %v3635_v8 = vrot.slane %v1840_v20, 4  ;;  %vm1277_vm3 = vmand %vm1117_vm12, %vm9169_vm10  ;;  %v9558_v20 = vmov 0 }
 0x120   :  { %v5305_v51 = vunpack.c.l.bf16 %v3636_v22  ;;  %v9559_v20 = vsel %vm5307_vm1, 4294967295, %v9558_v20 }
 0x121   :  { %v5297_v42 = vunpack.c.l.bf16 %v3635_v8  ;;  %9560 = vst [vmem:[#allocation55_spill] sm:$0xff] %v9559_v20 }
 0x122   :  { %600 = vperm.xlu1 %4607, %v5033_v49   ;;  %612 = vperm.xlu2 %4610, %v5033_v49   ;;  %9557 = vst [vmem:[#allocation54_spill] sm:$0xff] %v5305_v51 }
 0x123   :  { %9556 = vst [vmem:[#allocation53_spill] sm:$0xff] %v5297_v42 }
 0x124   :  { %v5276_v58 = vpop.permute.xlu1 %539 }
 0x125   :  { %9553 = vst [vmem:[#allocation51_spill] sm:$0xff] %v5276_v58  ;;  %vm987_vm4 = vcmp.lt.f32.partialorder %v5047_v56, %v5276_v58  ;;  %vm1115_vm9 = vcmp.eq.f32.partialorder %v5047_v56, %v5276_v58  ;;  %v5344_v8 = vpop.permute.xlu2 %563 }
 0x126   :  { %vm1275_vm5 = vmand %vm1115_vm9, %vm9170_vm14  ;;  %vm9199_vm9 = vcmp.gt.f32.partialorder %v5297_v42, 0.5  ;;  %9571 = vst [vmem:[#allocation58_spill] sm:$0xff] %v5344_v8  ;;  %vm1119_vm7 = vcmp.eq.f32.partialorder %v5047_v56, %v5344_v8 }
 0x127   :  { %vm1403_vm11 = vmor %vm987_vm4, %vm1275_vm5 }
 0x128   :  { %v4408_v60 = vsel %vm1403_vm11, 1.0, %v9555_v10  ;;  %vm1405_vm4 = vmor %vm989_vm15, %vm1277_vm3  ;;  %vm9201_vm15 = vcmp.gt.f32.partialorder %v5305_v51, 0.5 }
 0x129   :  { %v1787_v43 = vpack.c.bf16 %v4408_v60, %v4408_v60  ;;  %v5299_v60 = vperm.slane %v3699_v19, 0  ;;  %v1842_v19 = vld [vmem:[#allocation8 + $0x10] sm:$0xff] }
 0x12a   :  { %4609 = vset.pattern.permute.xlu1 %v4887_v11  ;;  %v2330_v58 = vpop.f32.mrf.mxu0  ;;  %v2659_v36 = vpop.f32.mrf.mxu1  ;;  %224 = vperm.xlu2 %4610, %v5083_v29   ;;  %v2983_v11 = vunpack.c.l.bf16 %v1841_v2 }
 0x12b   :  { %v2060_v53 = vunpack.c.l.b16 %v1787_v43  ;;  %vm3017_vm13 = vcmp.eq.f32.partialorder %v2330_v58, %v5294_v55  ;;  %vm3702_vm5 = vcmp.eq.f32.partialorder %v2659_v36, %v5299_v60  ;;  %v9561_v43 = vmov 0  ;;  %v5346_v36 = vld [vmem:[#allocation6 + $0x78] sm:$0xff] }
 0x12c   :  { %vm5314_vm11 = vcmp.gt.f32.partialorder %v2983_v11, 0.5  ;;  %vm5320_vm12 = vmand %vm3017_vm13, %vm5307_vm1  ;;  %v4410_v58 = vsel %vm1405_vm4, 1.0, %v9555_v10  ;;  %9572 = vst [vmem:[#allocation59_spill] sm:$0xff] %v5346_v36  ;;  %vm9202_vm8 = vcmp.gt.f32.partialorder %v5346_v36, 0.0 }
 0x12d   :  { %v2150_v47 = vpack.c.b16 %v2060_v53, %v2059_v27  ;;  %v9562_v43 = vsel %vm5314_vm11, 4294967295, %v9561_v43  ;;  %v3637_v53 = vrot.slane %v1842_v19, 4  ;;  %vm5330_vm3 = vmand %vm3702_vm5, %vm9199_vm9  ;;  %v3305_v50 = vsel %vm5320_vm12, %v4938_v16, 0.0 }
 0x12e   :  { %9563 = vst [vmem:[#allocation56_spill] sm:$0xff] %v9562_v43 }
 0x12f   :  { %2514 = vmatmul.bf16.gmra.mxu2 %v2150_v47  ;;  %2843 = vmatmul.bf16.gmra.mxu3 %v2150_v47 }
 0x132   :  { %606 = vperm.xlu1 %4609, %v5033_v49   ;;  %v2332_v33 = vpop.f32.mrf.mxu0  ;;  %v2661_v22 = vpop.f32.mrf.mxu1  ;;  %4613 = vset.pattern.permute.xlu2 %v4881_v9  ;;  %v5358_v9 = vunpack.c.l.bf16 %v3637_v53  ;;  %v3990_v53 = vsel %vm5330_vm3, %v4938_v16, 0.0 }
 0x133   :  { %vm3018_vm13 = vcmp.eq.f32.partialorder %v2332_v33, %v5294_v55  ;;  %vm3703_vm10 = vcmp.eq.f32.partialorder %v2661_v22, %v5299_v60  ;;  %v2984_v33 = vunpack.c.l.bf16 %v1842_v19  ;;  %v1789_v22 = vpack.c.bf16 %v4410_v58, %v4410_v58  ;;  %v5370_v19 = vpop.permute.xlu0 %169 }
 0x134   :  { %vm5338_vm14 = vmand %vm3018_vm13, %vm5314_vm11  ;;  %v5342_v2 = vpop.permute.xlu1 %545  ;;  %vm1054_vm9 = vcmp.eq.f32.partialorder %v4860_v5, %v5370_v19 }
 0x135   :  { %9570 = vst [vmem:[#allocation57_spill] sm:$0xff] %v5342_v2  ;;  %vm5350_vm4 = vmand %vm3703_vm10, %vm9201_vm15  ;;  %vm988_vm5 = vcmp.lt.f32.partialorder %v5047_v56, %v5342_v2  ;;  %vm1116_vm13 = vcmp.eq.f32.partialorder %v5047_v56, %v5342_v2  ;;  %v3306_v52 = vsel %vm5338_vm14, %v4957_v21, 0.0  ;;  %v9575_v2 = vmov 0 }
 0x136   :  { %vm1276_vm2 = vmand %vm1116_vm13, %vm9196_vm0  ;;  %v3991_v27 = vsel %vm5350_vm4, %v4957_v21, 0.0  ;;  %v2062_v44 = vunpack.c.l.b16 %v1789_v22  ;;  %v3433_v41 = vadd.f32 %v3306_v52, %v3305_v50  ;;  %vm9198_vm14 = vcmp.gt.f32.partialorder %v5358_v9, 0.5 }
 0x137   :  { %vm1404_vm10 = vmor %vm988_vm5, %vm1276_vm2  ;;  %vm5383_vm2 = vcmp.gt.f32.partialorder %v2984_v33, 0.5  ;;  %v3638_v21 = vrot.slane %v1843_v3, 4  ;;  %v4118_v47 = vadd.f32 %v3991_v27, %v3990_v53  ;;  %vm991_vm13 = vcmp.lt.f32.partialorder %v5047_v56, %v5344_v8  ;;  %v5410_v27 = vpop.permute.xlu2 %570  ;;  %v1844_v8 = vld [vmem:[#allocation8 + $0x20] sm:$0xff] }
 0x138   :  { %v4409_v58 = vsel %vm1404_vm10, 1.0, %v9555_v10  ;;  %v9576_v2 = vsel %vm5383_vm2, 4294967295, %v9575_v2  ;;  %vm5397_vm4 = vmand %vm1119_vm7, %vm9202_vm8  ;;  %v5405_v52 = vperm.slane %v861_v59, 0  ;;  %v2985_v53 = vunpack.c.l.bf16 %v1843_v3  ;;  %9579 = vst [vmem:[#allocation60_spill] sm:$0xff] %v5410_v27  ;;  %v5417_v59 = vld [vmem:[#allocation6 + $0x70] sm:$0xff] }
 0x139   :  { %v1788_v1 = vpack.c.bf16 %v4409_v58, %v4409_v58  ;;  %vm1407_vm7 = vmor %vm991_vm13, %vm5397_vm4  ;;  %9581 = vst [vmem:[#allocation62_spill] sm:$0xff] %v5417_v59  ;;  %v9582_v3 = vmov 0  ;;  %vm9586_vm0 = vcmp.gt.f32.partialorder %v4936_v15, 0.0 }
 0x13a   :  { %218 = vperm.xlu1 %4609, %v5083_v29   ;;  %v2335_v16 = vpop.f32.mrf.mxu0  ;;  %v2664_v11 = vpop.f32.mrf.mxu1  ;;  %230 = vperm.xlu2 %4613, %v5083_v29   ;;  %vm992_vm15 = vcmp.lt.f32.partialorder %v5405_v52, %v5410_v27 }
 0x13b   :  { %vm3019_vm12 = vcmp.eq.f32.partialorder %v2335_v16, %v5294_v55  ;;  %vm3704_vm3 = vcmp.eq.f32.partialorder %v2664_v11, %v5299_v60  ;;  %v2061_v33 = vunpack.c.l.b16 %v1788_v1  ;;  %v5413_v11 = vunpack.c.l.bf16 %v3638_v21 }
 0x13c   :  { %vm3179_vm5 = vmand %vm3019_vm12, %vm5383_vm2  ;;  %vm1120_vm12 = vcmp.eq.f32.partialorder %v5405_v52, %v5410_v27  ;;  %v3639_v21 = vrot.slane %v1844_v8, 4 }
 0x13d   :  { %v3307_v22 = vsel %vm3179_vm5, %v4949_v17, 0.0  ;;  %vm3864_vm10 = vmand %vm3704_vm3, %vm9198_vm14  ;;  %v2151_v1 = vpack.c.b16 %v2062_v44, %v2061_v33  ;;  %9580 = vst [vmem:[#allocation61_spill] sm:$0xff] %v5413_v11  ;;  %vm5421_vm3 = vcmp.gt.f32.partialorder %v2985_v53, 0.5  ;;  %vm9200_vm5 = vcmp.gt.f32.partialorder %v5413_v11, 0.5 }
 0x13e   :  { %v3434_v58 = vadd.f32 %v3433_v41, %v3307_v22  ;;  %v3992_v16 = vsel %vm3864_vm10, %v4949_v17, 0.0  ;;  %v9583_v3 = vsel %vm5421_vm3, 4294967295, %v9582_v3  ;;  %v5425_v41 = vpop.permute.xlu0 %576  ;;  %vm9225_vm10 = vcmp.gt.f32.partialorder %v5417_v59, 0.0  ;;  %vm5436_vm6 = vmand %vm1120_vm12, %vm9586_vm0 }
 0x13f   :  { %v4119_v4 = vadd.f32 %v4118_v47, %v3992_v16  ;;  %2519 = vmatmul.bf16.gmra.mxu2 %v2151_v1  ;;  %2848 = vmatmul.bf16.gmra.mxu3 %v2151_v1  ;;  %9584 = vst [vmem:[#allocation63_spill] sm:$0xff] %v9583_v3  ;;  %v4412_v47 = vsel %vm1407_vm7, 1.0, %v9555_v10  ;;  %v2986_v1 = vunpack.c.l.bf16 %v1844_v8  ;;  %v1845_v8 = vld [vmem:[#allocation8 + $0x28] sm:$0xff]  ;;  %vm993_vm8 = vcmp.lt.f32.partialorder %v5405_v52, %v5425_v41 }
 0x140   :  { %9585 = vst [vmem:[#allocation64_spill] sm:$0xff] %v5425_v41  ;;  %v1791_v16 = vpack.c.bf16 %v4412_v47, %v4412_v47  ;;  %v9598_v47 = vmov 0 }
 0x142   :  { %4612 = vset.pattern.permute.xlu1 %v4896_v12  ;;  %v2337_v17 = vpop.f32.mrf.mxu0  ;;  %v2666_v44 = vpop.f32.mrf.mxu1  ;;  %4614 = vset.pattern.permute.xlu2 %v4908_v14  ;;  %v2064_v12 = vunpack.c.l.b16 %v1791_v16 }
 0x143   :  { %vm3020_vm4 = vcmp.eq.f32.partialorder %v2337_v17, %v5294_v55  ;;  %vm3705_vm13 = vcmp.eq.f32.partialorder %v2666_v44, %v5299_v60  ;;  %v5460_v17 = vunpack.c.l.bf16 %v3639_v21 }
 0x144   :  { %vm5442_vm14 = vmand %vm3020_vm4, %vm5421_vm3  ;;  %v5446_v22 = vpop.permute.xlu1 %557  ;;  %vm1121_vm4 = vcmp.eq.f32.partialorder %v5405_v52, %v5425_v41  ;;  %vm9595_vm3 = vcmp.gt.f32.partialorder %v4951_v18, 0.0 }
 0x145   :  { %9591 = vst [vmem:[#allocation65_spill] sm:$0xff] %v5446_v22  ;;  %vm5450_vm7 = vmand %vm3705_vm13, %vm9200_vm5  ;;  %vm990_vm0 = vcmp.lt.f32.partialorder %v5047_v56, %v5446_v22  ;;  %vm1118_vm12 = vcmp.eq.f32.partialorder %v5047_v56, %v5446_v22  ;;  %v3308_v21 = vsel %vm5442_vm14, %v4963_v23, 0.0  ;;  %vm9228_vm14 = vcmp.gt.f32.partialorder %v5460_v17, 0.5 }
 0x146   :  { %9594 = vst [vmem:[#allocation66_spill] sm:$0xff] %v5460_v17  ;;  %vm1278_vm13 = vmand %vm1118_vm12, %vm9225_vm10  ;;  %v3993_v7 = vsel %vm5450_vm7, %v4963_v23, 0.0  ;;  %v3435_v53 = vadd.f32 %v3434_v58, %v3308_v21  ;;  %v2987_v56 = vunpack.c.l.bf16 %v1845_v8  ;;  %v1846_v21 = vld [vmem:[#allocation8 + $0x30] sm:$0xff] }
 0x147   :  { %vm1406_vm5 = vmor %vm990_vm0, %vm1278_vm13  ;;  %vm5480_vm0 = vcmp.gt.f32.partialorder %v2986_v1, 0.5  ;;  %v3640_v1 = vrot.slane %v1845_v8, 4  ;;  %v3641_v30 = vrot.slane %v1846_v21, 4 }
 0x148   :  { %v4411_v44 = vsel %vm1406_vm5, 1.0, %v9555_v10  ;;  %vm5473_vm2 = vmand %vm1121_vm4, %vm9595_vm3  ;;  %v9599_v47 = vsel %vm5480_vm0, 4294967295, %v9598_v47 }
 0x149   :  { %9600 = vst [vmem:[#allocation67_spill] sm:$0xff] %v9599_v47  ;;  %v1790_v22 = vpack.c.bf16 %v4411_v44, %v4411_v44  ;;  %vm5486_vm5 = vmand %vm1054_vm9, %vm9225_vm10  ;;  %v4120_v44 = vadd.f32 %v4119_v4, %v3993_v7  ;;  %v5524_v41 = vunpack.c.l.bf16 %v3640_v1  ;;  %v857_v4 = vrot.slane %v5380_v35, 1 }
 0x14a   :  { %624 = vperm.xlu1 %4612, %v5033_v49   ;;  %v2340_v50 = vpop.f32.mrf.mxu0  ;;  %v2669_v6 = vpop.f32.mrf.mxu1  ;;  %vm5500_vm9 = vmor %vm992_vm15, %vm5436_vm6  ;;  %630 = vperm.xlu2 %4614, %v5033_v49   ;;  %vm926_vm15 = vcmp.lt.f32.partialorder %v4860_v5, %v5370_v19 }
 0x14b   :  { %vm3021_vm3 = vcmp.eq.f32.partialorder %v2340_v50, %v5294_v55  ;;  %vm3706_vm7 = vcmp.eq.f32.partialorder %v2669_v6, %v5299_v60  ;;  %v2063_v23 = vunpack.c.l.b16 %v1790_v22  ;;  %vm5512_vm12 = vmor %vm993_vm8, %vm5473_vm2  ;;  %9607 = vst [vmem:[#allocation68_spill] sm:$0xff] %v5524_v41  ;;  %v4413_v7 = vsel %vm5500_vm9, 1.0, %v9555_v10 }
 0x14c   :  { %vm3181_vm6 = vmand %vm3021_vm3, %vm5480_vm0  ;;  %vm5535_vm2 = vcmp.gt.f32.partialorder %v2987_v56, 0.5  ;;  %vm9227_vm13 = vcmp.gt.f32.partialorder %v5524_v41, 0.5  ;;  %v1792_v16 = vpack.c.bf16 %v4413_v7, %v4413_v7  ;;  %v5565_v7 = vpop.permute.xlu2 %188 }
 0x14d   :  { %v3309_v6 = vsel %vm3181_vm6, %v4985_v32, 0.0  ;;  %vm3866_vm4 = vmand %vm3706_vm7, %vm9228_vm14  ;;  %v2152_v22 = vpack.c.b16 %v2064_v12, %v2063_v23  ;;  %v4414_v12 = vsel %vm5512_vm12, 1.0, %v9555_v10  ;;  %9616 = vst [vmem:[#allocation71_spill] sm:$0xff] %v5565_v7 }
 0x14e   :  { %v3436_v50 = vadd.f32 %v3435_v53, %v3309_v6  ;;  %v3994_v27 = vsel %vm3866_vm4, %v4985_v32, 0.0  ;;  %vm1342_vm8 = vmor %vm926_vm15, %vm5486_vm5  ;;  %v9608_v32 = vmov 0  ;;  %v1793_v23 = vpack.c.bf16 %v4414_v12, %v4414_v12 }
 0x14f   :  { %v4121_v58 = vadd.f32 %v4120_v44, %v3994_v27  ;;  %2524 = vmatmul.bf16.gmra.mxu2 %v2152_v22  ;;  %2853 = vmatmul.bf16.gmra.mxu3 %v2152_v22  ;;  %v9609_v32 = vsel %vm5535_vm2, 4294967295, %v9608_v32  ;;  %v4347_v1 = vsel %vm1342_vm8, 1.0, %v9555_v10  ;;  %v5553_v44 = vperm.slane %v857_v4, 0 }
 0x150   :  { %9610 = vst [vmem:[#allocation69_spill] sm:$0xff] %v9609_v32  ;;  %v2988_v22 = vunpack.c.l.bf16 %v1846_v21  ;;  %v1726_v56 = vpack.c.bf16 %v4347_v1, %v4347_v1  ;;  %v5567_v12 = vunpack.c.l.bf16 %v3641_v30  ;;  %vm9617_vm15 = vcmp.gt.f32.partialorder %v5346_v36, 0.0 }
 0x151   :  { %v2065_v4 = vunpack.c.l.b16 %v1792_v16  ;;  %v9618_v21 = vmov 0  ;;  %vm929_vm10 = vcmp.lt.f32.partialorder %v5553_v44, %v5565_v7  ;;  %v9711_v32 = vmov 0 }
 0x152   :  { %236 = vperm.xlu1 %4612, %v5083_v29   ;;  %v2342_v27 = vpop.f32.mrf.mxu0  ;;  %v2671_v8 = vpop.f32.mrf.mxu1  ;;  %4617 = vset.pattern.permute.xlu2 %v4923_v37  ;;  %v1999_v1 = vunpack.c.l.b16 %v1726_v56 }
 0x153   :  { %vm3022_vm5 = vcmp.eq.f32.partialorder %v2342_v27, %v5294_v55  ;;  %vm3707_vm9 = vcmp.eq.f32.partialorder %v2671_v8, %v5299_v60  ;;  %v2066_v27 = vunpack.c.l.b16 %v1793_v23 }
 0x154   :  { %vm5547_vm3 = vmand %vm3022_vm5, %vm5535_vm2  ;;  %v5551_v53 = vpop.permute.xlu1 %175  ;;  %vm1057_vm5 = vcmp.eq.f32.partialorder %v5553_v44, %v5565_v7 }
 0x155   :  { %9613 = vst [vmem:[#allocation70_spill] sm:$0xff] %v5551_v53  ;;  %vm5557_vm7 = vmand %vm3707_vm9, %vm9227_vm13  ;;  %vm927_vm12 = vcmp.lt.f32.partialorder %v4860_v5, %v5551_v53  ;;  %vm1055_vm6 = vcmp.eq.f32.partialorder %v4860_v5, %v5551_v53  ;;  %v3310_v5 = vsel %vm5547_vm3, %v5004_v39, 0.0  ;;  %vm5577_vm9 = vcmp.gt.f32.partialorder %v2988_v22, 0.5  ;;  %v1847_v53 = vld [vmem:[#allocation8 + $0x38] sm:$0xff] }
 0x156   :  { %vm1215_vm4 = vmand %vm1055_vm6, %vm9617_vm15  ;;  %v9619_v21 = vsel %vm5577_vm9, 4294967295, %v9618_v21  ;;  %v3995_v16 = vsel %vm5557_vm7, %v5004_v39, 0.0  ;;  %v2153_v22 = vpack.c.b16 %v2066_v27, %v2065_v4  ;;  %vm9620_vm15 = vcmp.gt.f32.partialorder %v4951_v18, 0.0 }
 0x157   :  { %vm1343_vm8 = vmor %vm927_vm12, %vm1215_vm4  ;;  %vm9226_vm12 = vcmp.gt.f32.partialorder %v5567_v12, 0.5  ;;  %v3437_v6 = vadd.f32 %v3436_v50, %v3310_v5  ;;  %v3642_v56 = vrot.slane %v1847_v53, 4  ;;  %v2989_v50 = vunpack.c.l.bf16 %v1847_v53  ;;  %v1848_v5 = vld [vmem:[#allocation8 + $0x40] sm:$0xff] }
 0x158   :  { %v4348_v8 = vsel %vm1343_vm8, 1.0, %v9555_v10  ;;  %vm5594_vm7 = vmand %vm1057_vm5, %vm9620_vm15 }
 0x159   :  { %v1727_v30 = vpack.c.bf16 %v4348_v8, %v4348_v8  ;;  %v4122_v8 = vadd.f32 %v4121_v58, %v3995_v16  ;;  %v5606_v58 = vunpack.c.l.bf16 %v3642_v56  ;;  %vm1345_vm5 = vmor %vm929_vm10, %vm5594_vm7  ;;  %v5624_v56 = vpop.permute.xlu2 %588 }
 0x15a   :  { %4616 = vset.pattern.permute.xlu1 %v4908_v14  ;;  %v2345_v23 = vpop.f32.mrf.mxu0  ;;  %v2674_v36 = vpop.f32.mrf.mxu1  ;;  %248 = vperm.xlu2 %4617, %v5083_v29  }
 0x15b   :  { %vm3023_vm3 = vcmp.eq.f32.partialorder %v2345_v23, %v5294_v55  ;;  %vm3708_vm6 = vcmp.eq.f32.partialorder %v2674_v36, %v5299_v60  ;;  %v2000_v33 = vunpack.c.l.b16 %v1727_v30  ;;  %9623 = vst [vmem:[#allocation72_spill] sm:$0xff] %v5606_v58  ;;  %vm9245_vm10 = vcmp.gt.f32.partialorder %v5606_v58, 0.5 }
 0x15c   :  { %vm3183_vm4 = vmand %vm3023_vm3, %vm5577_vm9  ;;  %vm5612_vm3 = vcmp.gt.f32.partialorder %v2989_v50, 0.5 }
 0x15d   :  { %v3311_v23 = vsel %vm3183_vm4, %v5041_v54, 0.0  ;;  %vm3868_vm8 = vmand %vm3708_vm6, %vm9226_vm12  ;;  %v2120_v36 = vpack.c.b16 %v2000_v33, %v1999_v1  ;;  %v3643_v33 = vrot.slane %v1848_v5, 4  ;;  %vm1123_vm12 = vcmp.eq.f32.partialorder %v5405_v52, %v5624_v56 }
 0x15e   :  { %v3438_v4 = vadd.f32 %v3437_v6, %v3311_v23  ;;  %v3996_v27 = vsel %vm3868_vm8, %v5041_v54, 0.0  ;;  %v9624_v54 = vmov 0  ;;  %v4350_v6 = vsel %vm1345_vm5, 1.0, %v9555_v10 }
 0x15f   :  { %v4123_v30 = vadd.f32 %v4122_v8, %v3996_v27  ;;  %2364 = vmatmul.bf16.gmra.mxu0 %v2120_v36  ;;  %2529 = vmatmul.bf16.gmra.mxu2 %v2153_v22  ;;  %v9625_v54 = vsel %vm5612_vm3, 4294967295, %v9624_v54  ;;  %v2990_v8 = vunpack.c.l.bf16 %v1848_v5  ;;  %v1729_v27 = vpack.c.bf16 %v4350_v6, %v4350_v6  ;;  %v1849_v5 = vld [vmem:[#allocation8 + $0x48] sm:$0xff] }
 0x160   :  { %2693 = vmatmul.bf16.gmra.mxu1 %v2120_v36  ;;  %2858 = vmatmul.bf16.gmra.mxu3 %v2153_v22  ;;  %9626 = vst [vmem:[#allocation73_spill] sm:$0xff] %v9625_v54  ;;  %v5636_v36 = vunpack.c.l.bf16 %v3643_v33  ;;  %v9634_v33 = vmov 0  ;;  %v3644_v14 = vrot.slane %v1849_v5, 4 }
 0x161   :  { %vm5651_vm14 = vcmp.gt.f32.partialorder %v2990_v8, 0.5 }
 0x162   :  { %242 = vperm.xlu1 %4616, %v5083_v29   ;;  %v2347_v1 = vpop.f32.mrf.mxu0  ;;  %v2490_v16 = vpop.f32.mrf.mxu2  ;;  %4619 = vset.pattern.permute.xlu2 %v4973_v26  ;;  %9630 = vst [vmem:[#allocation75_spill] sm:$0xff] %v5636_v36  ;;  %v9635_v33 = vsel %vm5651_vm14, 4294967295, %v9634_v33 }
 0x163   :  { %vm3024_vm6 = vcmp.eq.f32.partialorder %v2347_v1, %v5294_v55  ;;  %v2676_v53 = vpop.f32.mrf.mxu1  ;;  %v5617_v22 = vpop.f32.mrf.mxu3  ;;  %9636 = vst [vmem:[#allocation76_spill] sm:$0xff] %v9635_v33 }
 0x164   :  { %vm3709_vm15 = vcmp.eq.f32.partialorder %v2676_v53, %v5299_v60  ;;  %v5622_v39 = vpop.permute.xlu1 %182  ;;  %vm5630_vm4 = vmand %vm3024_vm6, %vm5612_vm3  ;;  %vm9633_vm6 = vcmp.gt.f32.partialorder %v4936_v15, 0.0  ;;  %v2002_v15 = vunpack.c.l.b16 %v1729_v27 }
 0x165   :  { %9627 = vst [vmem:[#allocation74_spill] sm:$0xff] %v5622_v39  ;;  %vm1056_vm7 = vcmp.eq.f32.partialorder %v5553_v44, %v5622_v39  ;;  %vm928_vm8 = vcmp.lt.f32.partialorder %v5553_v44, %v5622_v39  ;;  %vm5640_vm5 = vmand %vm3709_vm15, %vm9245_vm10  ;;  %v3312_v1 = vsel %vm5630_vm4, %v5025_v45, 0.0  ;;  %vm9246_vm15 = vcmp.gt.f32.partialorder %v5636_v36, 0.5 }
 0x166   :  { %vm1216_vm13 = vmand %vm1056_vm7, %vm9633_vm6  ;;  %vm995_vm7 = vcmp.lt.f32.partialorder %v5405_v52, %v5624_v56  ;;  %vm9637_vm6 = vcmp.gt.f32.partialorder %v4967_v24, 0.0  ;;  %v3997_v23 = vsel %vm5640_vm5, %v5025_v45, 0.0  ;;  %v3439_v37 = vadd.f32 %v3438_v4, %v3312_v1 }
 0x167   :  { %vm1344_vm3 = vmor %vm928_vm8, %vm1216_vm13  ;;  %v2991_v45 = vunpack.c.l.bf16 %v1849_v5 }
 0x168   :  { %v4349_v39 = vsel %vm1344_vm3, 1.0, %v9555_v10  ;;  %vm5662_vm4 = vmand %vm1123_vm12, %vm9637_vm6  ;;  %vm3081_vm6 = vcmp.eq.f32.partialorder %v2490_v16, %v5294_v55 }
 0x169   :  { %v1728_v27 = vpack.c.bf16 %v4349_v39, %v4349_v39  ;;  %vm5682_vm5 = vmor %vm995_vm7, %vm5662_vm4  ;;  %v4124_v39 = vadd.f32 %v4123_v30, %v3997_v23  ;;  %vm3766_vm4 = vcmp.eq.f32.partialorder %v5617_v22, %v5299_v60 }
 0x16a   :  { %4618 = vset.pattern.permute.xlu1 %v4930_v62  ;;  %v2350_v53 = vpop.f32.mrf.mxu0  ;;  %v2492_v6 = vpop.f32.mrf.mxu2  ;;  %648 = vperm.xlu2 %4619, %v5033_v49   ;;  %vm5702_vm7 = vmand %vm3081_vm6, %vm5307_vm1 }
 0x16b   :  { %vm3025_vm13 = vcmp.eq.f32.partialorder %v2350_v53, %v5294_v55  ;;  %v2679_v7 = vpop.f32.mrf.mxu1  ;;  %v2821_v18 = vpop.f32.mrf.mxu3  ;;  %vm3082_vm12 = vcmp.eq.f32.partialorder %v2492_v6, %v5294_v55  ;;  %v2001_v50 = vunpack.c.l.b16 %v1728_v27  ;;  %v5698_v53 = vunpack.c.l.bf16 %v3644_v14  ;;  %v1850_v6 = vld [vmem:[#allocation8 + $0x50] sm:$0xff] }
 0x16c   :  { %vm3185_vm3 = vmand %vm3025_vm13, %vm5651_vm14  ;;  %vm3710_vm8 = vcmp.eq.f32.partialorder %v2679_v7, %v5299_v60  ;;  %vm3767_vm10 = vcmp.eq.f32.partialorder %v2821_v18, %v5299_v60  ;;  %v9650_v14 = vmov 0  ;;  %v3645_v22 = vrot.slane %v1850_v6, 4 }
 0x16d   :  { %v3313_v59 = vsel %vm3185_vm3, %v5074_v63, 0.0  ;;  %vm3870_vm13 = vmand %vm3710_vm8, %vm9246_vm15  ;;  %v2121_v5 = vpack.c.b16 %v2002_v15, %v2001_v50  ;;  %9644 = vst [vmem:[#allocation77_spill] sm:$0xff] %v5698_v53  ;;  %v4416_v50 = vsel %vm5682_vm5, 1.0, %v9555_v10  ;;  %vm9659_vm5 = vnez %v9576_v2 }
 0x16e   :  { %v5686_v1 = vadd.f32 %v3439_v37, %v3313_v59  ;;  %vm5693_vm3 = vmand %vm3082_vm12, %vm5314_vm11  ;;  %v3998_v16 = vsel %vm3870_vm13, %v5074_v63, 0.0  ;;  %vm9647_vm12 = vcmp.gt.f32.partialorder %v5305_v51, 0.5  ;;  %vm5716_vm13 = vcmp.gt.f32.partialorder %v2991_v45, 0.5 }
 0x16f   :  { %v5708_v18 = vadd.f32 %v4124_v39, %v3998_v16  ;;  %vm5712_vm8 = vmand %vm3767_vm10, %vm9647_vm12  ;;  %2369 = vmatmul.bf16.gmra.mxu0 %v2121_v5  ;;  %v9651_v14 = vsel %vm5716_vm13, 4294967295, %v9650_v14  ;;  %v3370_v15 = vsel %vm5693_vm3, %v5089_v34, 0.0  ;;  %vm9653_vm10 = vcmp.gt.f32.partialorder %v5297_v42, 0.5  ;;  %v5753_v16 = vpop.permute.xlu2 %594 }
 0x170   :  { %2698 = vmatmul.bf16.gmra.mxu1 %v2121_v5  ;;  %9652 = vst [vmem:[#allocation78_spill] sm:$0xff] %v9651_v14  ;;  %vm5727_vm6 = vmand %vm3766_vm4, %vm9653_vm10  ;;  %v3369_v45 = vsel %vm5702_vm7, %v5050_v57, 0.0  ;;  %v4055_v39 = vsel %vm5712_vm8, %v5089_v34, 0.0  ;;  %v2992_v34 = vunpack.c.l.bf16 %v1850_v6 }
 0x171   :  { %9658 = vst [vmem:[#allocation79_spill] sm:$0xff] %v5753_v16  ;;  %v3517_v5 = vadd.f32 %v3370_v15, %v3369_v45  ;;  %v4054_v37 = vsel %vm5727_vm6, %v5050_v57, 0.0  ;;  %v5771_v15 = vunpack.c.l.bf16 %v3645_v22  ;;  %v1795_v57 = vpack.c.bf16 %v4416_v50, %v4416_v50 }
 0x172   :  { %642 = vperm.xlu1 %4618, %v5033_v49   ;;  %v2352_v63 = vpop.f32.mrf.mxu0  ;;  %v2495_v30 = vpop.f32.mrf.mxu2  ;;  %4622 = vset.pattern.permute.xlu2 %v4970_v25  ;;  %v4202_v6 = vadd.f32 %v4055_v39, %v4054_v37  ;;  %v9667_v25 = vmov 0 }
 0x173   :  { %vm3026_vm12 = vcmp.eq.f32.partialorder %v2352_v63, %v5294_v55  ;;  %vm3083_vm15 = vcmp.eq.f32.partialorder %v2495_v30, %v5294_v55  ;;  %v2681_v23 = vpop.f32.mrf.mxu1  ;;  %v2824_v27 = vpop.f32.mrf.mxu3  ;;  %9663 = vst [vmem:[#allocation80_spill] sm:$0xff] %v5771_v15  ;;  %v2068_v37 = vunpack.c.l.b16 %v1795_v57 }
 0x174   :  { %vm5745_vm4 = vmand %vm3026_vm12, %vm5716_vm13  ;;  %vm3711_vm10 = vcmp.eq.f32.partialorder %v2681_v23, %v5299_v60  ;;  %v5751_v4 = vpop.permute.xlu1 %582  ;;  %vm9660_vm12 = vcmp.gt.f32.partialorder %v5698_v53, 0.5  ;;  %v5773_v30 = vpop.permute.xlu0 %194  ;;  %vm9665_vm6 = vcmp.eq.f32.partialorder %v2824_v27, %v5299_v60 }
 0x175   :  { %vm3243_vm7 = vmand %vm3083_vm15, %vm9659_vm5  ;;  %vm1122_vm8 = vcmp.eq.f32.partialorder %v5405_v52, %v5751_v4  ;;  %vm994_vm11 = vcmp.lt.f32.partialorder %v5405_v52, %v5751_v4  ;;  %vm9664_vm15 = vcmp.gt.f32.partialorder %v5358_v9, 0.5  ;;  %v3314_v22 = vsel %vm5745_vm4, %v5068_v61, 0.0 }
 0x176   :  { %v3371_v59 = vsel %vm3243_vm7, %v5102_v13, 0.0  ;;  %vm5765_vm3 = vmand %vm3711_vm10, %vm9660_vm12  ;;  %vm9666_vm10 = vcmp.gt.f32.partialorder %v4976_v28, 0.0  ;;  %vm5785_vm5 = vcmp.gt.f32.partialorder %v2992_v34, 0.5 }
 0x177   :  { %v3518_v23 = vadd.f32 %v3517_v5, %v3371_v59  ;;  %vm3928_vm7 = vmand %vm9665_vm6, %vm9664_vm15  ;;  %v9668_v25 = vsel %vm5785_vm5, 4294967295, %v9667_v25  ;;  %vm9255_vm15 = vcmp.gt.f32.partialorder %v5771_v15, 0.5  ;;  %v3999_v50 = vsel %vm5765_vm3, %v5068_v61, 0.0  ;;  %v5818_v63 = vpop.permute.xlu2 %206 }
 0x178   :  { %v4056_v8 = vsel %vm3928_vm7, %v5102_v13, 0.0  ;;  %vm1282_vm12 = vmand %vm1122_vm8, %vm9666_vm10  ;;  %9669 = vst [vmem:[#allocation81_spill] sm:$0xff] %v9668_v25  ;;  %vm1058_vm8 = vcmp.eq.f32.partialorder %v5553_v44, %v5773_v30  ;;  %v3441_v59 = vadd.f32 %v5686_v1, %v3314_v22  ;;  %vm930_vm3 = vcmp.lt.f32.partialorder %v5553_v44, %v5773_v30 }
 0x179   :  { %v4203_v45 = vadd.f32 %v4202_v6, %v4056_v8  ;;  %vm1410_vm1 = vmor %vm994_vm11, %vm1282_vm12  ;;  %v4126_v61 = vadd.f32 %v5708_v18, %v3999_v50 }
 0x17a   :  { %4621 = vset.pattern.permute.xlu1 %v4973_v26  ;;  %v2355_v27 = vpop.f32.mrf.mxu0  ;;  %v2497_v39 = vpop.f32.mrf.mxu2  ;;  %v4415_v13 = vsel %vm1410_vm1, 1.0, %v9555_v10  ;;  %654 = vperm.xlu2 %4622, %v5033_v49   ;;  %vm9670_vm7 = vmmov %vm9666_vm10 }
 0x17b   :  { %vm3027_vm4 = vcmp.eq.f32.partialorder %v2355_v27, %v5294_v55  ;;  %v2684_v7 = vpop.f32.mrf.mxu1  ;;  %v2826_v5 = vpop.f32.mrf.mxu3  ;;  %v1794_v34 = vpack.c.bf16 %v4415_v13, %v4415_v13  ;;  %vm3084_vm11 = vcmp.eq.f32.partialorder %v2497_v39, %v5294_v55  ;;  %vm1218_vm10 = vmand %vm1058_vm8, %vm9670_vm7 }
 0x17c   :  { %vm3187_vm1 = vmand %vm3027_vm4, %vm5785_vm5  ;;  %vm3712_vm6 = vcmp.eq.f32.partialorder %v2684_v7, %v5299_v60  ;;  %vm3769_vm4 = vcmp.eq.f32.partialorder %v2826_v5, %v5299_v60  ;;  %v5829_v18 = vpop.permute.xlu0 %212  ;;  %v5849_v5 = vperm.slane %v5380_v35, 6 }
 0x17d   :  { %v3315_v6 = vsel %vm3187_vm1, %v5076_v0, 0.0  ;;  %v2067_v8 = vunpack.c.l.b16 %v1794_v34  ;;  %vm3872_vm12 = vmand %vm3712_vm6, %vm9255_vm15  ;;  %vm9671_vm1 = vnez %v9583_v3  ;;  %9674 = vst [vmem:[#allocation82_spill] sm:$0xff] %v5829_v18  ;;  %vm9677_vm6 = vcmp.gt.f32.partialorder %v5413_v11, 0.5  ;;  %v1851_v34 = vld [vmem:[#allocation8 + $0x58] sm:$0xff] }
 0x17e   :  { %v5813_v1 = vadd.f32 %v3441_v59, %v3315_v6  ;;  %vm5822_vm5 = vmand %vm3084_vm11, %vm9671_vm1  ;;  %v4000_v22 = vsel %vm3872_vm12, %v5076_v0, 0.0  ;;  %vm1060_vm11 = vcmp.eq.f32.partialorder %v5553_v44, %v5818_v63  ;;  %vm9680_vm12 = vcmp.gt.f32.partialorder %v5002_v38, 0.0  ;;  %679 = vperm.xlu0 %4627, %v5849_v5  }
 0x17f   :  { %v2154_v27 = vpack.c.b16 %v2068_v37, %v2067_v8  ;;  %v5827_v39 = vadd.f32 %v4126_v61, %v4000_v22  ;;  %vm5831_vm8 = vmor %vm930_vm3, %vm1218_vm10  ;;  %v3372_v0 = vsel %vm5822_vm5, %v5139_v31, 0.0  ;;  %vm1061_vm10 = vcmp.eq.f32.partialorder %v5553_v44, %v5829_v18 }
 0x180   :  { %vm5837_vm7 = vmand %vm3769_vm4, %vm9677_vm6  ;;  %v3519_v61 = vadd.f32 %v3518_v23, %v3372_v0  ;;  %v3646_v22 = vrot.slane %v1851_v34, 4  ;;  %vm933_vm1 = vcmp.lt.f32.partialorder %v5553_v44, %v5829_v18  ;;  %v9715_v18 = vld [vmem:[#allocation42_spill] sm:$0xff] }
 0x181   :  { %2534 = vmatmul.bf16.gmra.mxu2 %v2154_v27  ;;  %2863 = vmatmul.bf16.gmra.mxu3 %v2154_v27  ;;  %v4057_v59 = vsel %vm5837_vm7, %v5139_v31, 0.0  ;;  %vm5865_vm4 = vmand %vm1060_vm11, %vm9680_vm12  ;;  %v2993_v31 = vunpack.c.l.bf16 %v1851_v34  ;;  %vm9683_vm11 = vcmp.gt.f32.partialorder %v5006_v40, 0.0 }
 0x182   :  { %260 = vperm.xlu1 %4621, %v5083_v29   ;;  %v2500_v7 = vpop.f32.mrf.mxu2  ;;  %266 = vperm.xlu2 %4622, %v5083_v29   ;;  %v4351_v29 = vsel %vm5831_vm8, 1.0, %v9555_v10  ;;  %vm5879_vm12 = vmand %vm1061_vm10, %vm9683_vm11  ;;  %v4204_v23 = vadd.f32 %v4203_v45, %v4057_v59  ;;  %v2357_v13 = vpop.f32.mrf.mxu0  ;;  %vm932_vm10 = vcmp.lt.f32.partialorder %v5553_v44, %v5818_v63  ;;  %vm9687_vm11 = vcmp.gt.f32.partialorder %v4967_v24, 0.0  ;;  %v1852_v45 = vld [vmem:[#allocation8 + $0x60] sm:$0xff] }
 0x183   :  { %vm3085_vm3 = vcmp.eq.f32.partialorder %v2500_v7, %v5294_v55  ;;  %v2829_v37 = vpop.f32.mrf.mxu3  ;;  %v1730_v0 = vpack.c.bf16 %v4351_v29, %v4351_v29  ;;  %vm5896_vm14 = vcmp.gt.f32.partialorder %v2993_v31, 0.5  ;;  %v5901_v59 = vunpack.c.l.bf16 %v3646_v22  ;;  %v9695_v31 = vld [vmem:[#allocation18_spill] sm:$0xff] }
 0x184   :  { %vm3770_vm5 = vcmp.eq.f32.partialorder %v2829_v37, %v5299_v60  ;;  %v5858_v6 = vpop.permute.xlu1 %200  ;;  %vm3245_vm6 = vmand %vm3085_vm3, %vm5480_vm0  ;;  %vm9686_vm3 = vcmp.gt.f32.partialorder %v5460_v17, 0.5  ;;  %v9688_v37 = vmov 0  ;;  %v3647_v24 = vrot.slane %v1852_v45, 4 }
 0x185   :  { %vm1059_vm7 = vcmp.eq.f32.partialorder %v5553_v44, %v5858_v6  ;;  %v3373_v57 = vsel %vm3245_vm6, %v5117_v46, 0.0  ;;  %vm931_vm8 = vcmp.lt.f32.partialorder %v5553_v44, %v5858_v6  ;;  %vm3930_vm15 = vmand %vm3770_vm5, %vm9686_vm3  ;;  %vm1124_vm6 = vcmp.eq.f32.partialorder %v5405_v52, %v5753_v16  ;;  %9691 = vst [vmem:[#allocation84_spill] sm:$0xff] %v5901_v59 }
 0x186   :  { %v3520_v50 = vadd.f32 %v3519_v61, %v3373_v57  ;;  %v4058_v7 = vsel %vm3930_vm15, %v5117_v46, 0.0  ;;  %vm1219_vm0 = vmand %vm1059_vm7, %vm9687_vm11  ;;  %v9689_v37 = vsel %vm5896_vm14, 4294967295, %v9688_v37  ;;  %vm3028_vm5 = vcmp.eq.f32.partialorder %v2357_v13, %v5294_v55  ;;  %v2686_v57 = vpop.f32.mrf.mxu1 }
 0x187   :  { %v4205_v34 = vadd.f32 %v4204_v23, %v4058_v7  ;;  %vm1347_vm13 = vmor %vm931_vm8, %vm1219_vm0  ;;  %9690 = vst [vmem:[#allocation83_spill] sm:$0xff] %v9689_v37  ;;  %vm9692_vm15 = vcmp.gt.f32.partialorder %v5002_v38, 0.0  ;;  %v2003_v7 = vunpack.c.l.b16 %v1730_v0  ;;  %vm3713_vm11 = vcmp.eq.f32.partialorder %v2686_v57, %v5299_v60  ;;  %v9779_v37 = vld [vmem:[#allocation51_spill] sm:$0xff] }
 0x188   :  { %v4352_v29 = vsel %vm1347_vm13, 1.0, %v9555_v10  ;;  %vm5910_vm7 = vmand %vm1124_vm6, %vm9692_vm15 }
 0x189   :  { %v1731_v23 = vpack.c.bf16 %v4352_v29, %v4352_v29  ;;  %vm1348_vm13 = vmor %vm932_vm10, %vm5865_vm4  ;;  %vm996_vm4 = vcmp.lt.f32.partialorder %v5405_v52, %v5753_v16  ;;  %vm9279_vm10 = vcmp.gt.f32.partialorder %v5901_v59, 0.5 }
 0x18a   :  { %4623 = vset.pattern.permute.xlu1 %v5030_v48  ;;  %v2502_v46 = vpop.f32.mrf.mxu2  ;;  %4626 = vset.pattern.permute.xlu2 %v9695_v31  ;;  %vm1349_vm3 = vmor %vm933_vm1, %vm5879_vm12  ;;  %v9696_v31 = vld [vmem:[#allocation19_spill] sm:$0xff]  ;;  %vm9701_vm12 = vcmp.gt.f32.partialorder %v5524_v41, 0.5 }
 0x18b   :  { %vm3086_vm0 = vcmp.eq.f32.partialorder %v2502_v46, %v5294_v55  ;;  %v2831_v22 = vpop.f32.mrf.mxu3  ;;  %4631 = vset.pattern.permute.xlu0 %v9696_v31  ;;  %vm5932_vm6 = vmand %vm3028_vm5, %vm5896_vm14  ;;  %v2004_v0 = vunpack.c.l.b16 %v1731_v23  ;;  %v2994_v46 = vunpack.c.l.bf16 %v1852_v45  ;;  %v4353_v23 = vsel %vm1348_vm13, 1.0, %v9555_v10  ;;  %v9707_v45 = vld [vmem:[#allocation39_spill] sm:$0xff] }
 0x18c   :  { %vm3771_vm8 = vcmp.eq.f32.partialorder %v2831_v22, %v5299_v60  ;;  %vm5942_vm1 = vmand %vm3086_vm0, %vm5535_vm2  ;;  %v5952_v22 = vunpack.c.l.bf16 %v3647_v24  ;;  %v4354_v57 = vsel %vm1349_vm3, 1.0, %v9555_v10  ;;  %v3316_v41 = vsel %vm5932_vm6, %v9707_v45, 0.0  ;;  %v9710_v24 = vld [vmem:[#allocation41_spill] sm:$0xff] }
 0x18d   :  { %vm5948_vm5 = vmand %vm3771_vm8, %vm9701_vm12  ;;  %v2122_v29 = vpack.c.b16 %v2004_v0, %v2003_v7  ;;  %v3374_v0 = vsel %vm5942_vm1, %v9710_v24, 0.0  ;;  %v1732_v38 = vpack.c.bf16 %v4353_v23, %v4353_v23  ;;  %v1733_v16 = vpack.c.bf16 %v4354_v57, %v4354_v57  ;;  %v9717_v7 = vld [vmem:[#allocation43_spill] sm:$0xff] }
 0x18e   :  { %9704 = vst [vmem:[#allocation85_spill] sm:$0xff] %v5952_v22  ;;  %vm5958_vm15 = vmor %vm996_vm4, %vm5910_vm7  ;;  %v4059_v61 = vsel %vm5948_vm5, %v9710_v24, 0.0  ;;  %vm5978_vm7 = vcmp.gt.f32.partialorder %v2994_v46, 0.5  ;;  %vm9278_vm8 = vcmp.gt.f32.partialorder %v5952_v22, 0.5  ;;  %v3443_v46 = vadd.f32 %v5813_v1, %v3316_v41 }
 0x18f   :  { %vm5967_vm0 = vmand %vm3713_vm11, %vm9279_vm10  ;;  %2374 = vmatmul.bf16.gmra.mxu0 %v2122_v29  ;;  %2703 = vmatmul.bf16.gmra.mxu1 %v2122_v29  ;;  %v9712_v32 = vsel %vm5978_vm7, 4294967295, %v9711_v32  ;;  %v5985_v29 = vpop.permute.xlu2 %612  ;;  %v3521_v23 = vadd.f32 %v3520_v50, %v3374_v0  ;;  %v4206_v57 = vadd.f32 %v4205_v34, %v4059_v61  ;;  %vm9716_vm4 = vcmp.gt.f32.partialorder %v5567_v12, 0.5 }
 0x190   :  { %9713 = vst [vmem:[#allocation39_spill] sm:$0xff] %v9712_v32  ;;  %v4001_v13 = vsel %vm5967_vm0, %v9707_v45, 0.0  ;;  %vm9839_vm2 = vnez %v9562_v43 }
 0x191   :  { %9714 = vst [vmem:[#allocation41_spill] sm:$0xff] %v5985_v29  ;;  %v4128_v34 = vadd.f32 %v5827_v39, %v4001_v13  ;;  %v6027_v39 = vperm.slane %v5380_v35, 2 }
 0x192   :  { %660 = vperm.xlu1 %4623, %v5033_v49   ;;  %v2505_v8 = vpop.f32.mrf.mxu2  ;;  %673 = vperm.xlu2 %4626, %v5849_v5   ;;  %v4417_v49 = vsel %vm5958_vm15, 1.0, %v9555_v10 }
 0x193   :  { %vm3087_vm13 = vcmp.eq.f32.partialorder %v2505_v8, %v5294_v55  ;;  %v2834_v27 = vpop.f32.mrf.mxu3  ;;  %697 = vperm.xlu0 %4631, %v5849_v5   ;;  %v1796_v13 = vpack.c.bf16 %v4417_v49, %v4417_v49  ;;  %v9722_v49 = vld [vmem:[#allocation23_spill] sm:$0xff] }
 0x194   :  { %vm3247_vm3 = vmand %vm3087_vm13, %vm5577_vm9  ;;  %vm3772_vm6 = vcmp.eq.f32.partialorder %v2834_v27, %v5299_v60  ;;  %v5997_v24 = vpop.permute.xlu1 %600  ;;  %v2360_v8 = vpop.f32.mrf.mxu0 }
 0x195   :  { %v3375_v28 = vsel %vm3247_vm3, %v9715_v18, 0.0  ;;  %vm3932_vm11 = vmand %vm3772_vm6, %vm9716_vm4  ;;  %vm1125_vm1 = vcmp.eq.f32.partialorder %v5405_v52, %v5997_v24  ;;  %vm3029_vm12 = vcmp.eq.f32.partialorder %v2360_v8, %v5294_v55  ;;  %v2689_v41 = vpop.f32.mrf.mxu1  ;;  %vm997_vm5 = vcmp.lt.f32.partialorder %v5405_v52, %v5997_v24 }
 0x196   :  { %v3522_v1 = vadd.f32 %v3521_v23, %v3375_v28  ;;  %v4060_v50 = vsel %vm3932_vm11, %v9715_v18, 0.0  ;;  %vm3189_vm15 = vmand %vm3029_vm12, %vm5978_vm7  ;;  %vm3714_vm0 = vcmp.eq.f32.partialorder %v2689_v41, %v5299_v60  ;;  %vm1127_vm3 = vcmp.eq.f32.partialorder %v5405_v52, %v5985_v29  ;;  %v9719_v23 = vld [vmem:[#allocation15_spill] sm:$0xff] }
 0x197   :  { %v4207_v45 = vadd.f32 %v4206_v57, %v4060_v50  ;;  %v3317_v0 = vsel %vm3189_vm15, %v9717_v7, 0.0  ;;  %vm3874_vm13 = vmand %vm3714_vm0, %vm9278_vm8  ;;  %vm9718_vm6 = vcmp.gt.f32.partialorder %v5006_v40, 0.0  ;;  %vm999_vm12 = vcmp.lt.f32.partialorder %v5405_v52, %v5985_v29  ;;  %v9720_v57 = vld [vmem:[#allocation34_spill] sm:$0xff] }
 0x198   :  { %v6018_v28 = vadd.f32 %v3443_v46, %v3317_v0  ;;  %v4002_v61 = vsel %vm3874_vm13, %v9717_v7, 0.0  ;;  %vm1285_vm4 = vmand %vm1125_vm1, %vm9718_vm6  ;;  %vm9721_vm15 = vcmp.gt.f32.partialorder %v9720_v57, 0.0  ;;  %v2005_v18 = vunpack.c.l.b16 %v1732_v38  ;;  %v6041_v0 = vpop.permute.xlu2 %224 }
 0x199   :  { %v6029_v27 = vadd.f32 %v4128_v34, %v4002_v61  ;;  %vm1413_vm11 = vmor %vm997_vm5, %vm1285_vm4  ;;  %v2006_v41 = vunpack.c.l.b16 %v1733_v16  ;;  %v2069_v34 = vunpack.c.l.b16 %v1796_v13  ;;  %9723 = vst [vmem:[#allocation42_spill] sm:$0xff] %v6041_v0  ;;  %vm9724_vm6 = vnez %v9625_v54  ;;  %v9730_v13 = vld [vmem:[#allocation46_spill] sm:$0xff] }
 0x19a   :  { %4625 = vset.pattern.permute.xlu1 %v9719_v23  ;;  %v2507_v8 = vpop.f32.mrf.mxu2  ;;  %v4418_v46 = vsel %vm1413_vm11, 1.0, %v9555_v10  ;;  %vm1287_vm0 = vmand %vm1127_vm3, %vm9721_vm15  ;;  %285 = vperm.xlu2 %4626, %v6027_v39   ;;  %vm9727_vm4 = vcmp.gt.f32.partialorder %v5606_v58, 0.5  ;;  %vm1063_vm15 = vcmp.eq.f32.partialorder %v5553_v44, %v6041_v0 }
 0x19b   :  { %vm3088_vm1 = vcmp.eq.f32.partialorder %v2507_v8, %v5294_v55  ;;  %v2836_v35 = vpop.f32.mrf.mxu3  ;;  %v1797_v50 = vpack.c.bf16 %v4418_v46, %v4418_v46  ;;  %4636 = vset.pattern.permute.xlu0 %v9722_v49  ;;  %vm1415_vm13 = vmor %vm999_vm12, %vm1287_vm0  ;;  %v2123_v16 = vpack.c.b16 %v2006_v41, %v2005_v18  ;;  %vm9731_vm0 = vcmp.gt.f32.partialorder %v9720_v57, 0.0 }
 0x19c   :  { %vm3773_vm5 = vcmp.eq.f32.partialorder %v2836_v35, %v5299_v60  ;;  %vm6045_vm3 = vmand %vm3088_vm1, %vm9724_vm6  ;;  %v4420_v35 = vsel %vm1415_vm13, 1.0, %v9555_v10 }
 0x19d   :  { %v2070_v7 = vunpack.c.l.b16 %v1797_v50  ;;  %vm6051_vm11 = vmand %vm3773_vm5, %vm9727_vm4  ;;  %v3376_v46 = vsel %vm6045_vm3, %v9730_v13, 0.0  ;;  %vm9735_vm5 = vnez %v9635_v33  ;;  %v1799_v38 = vpack.c.bf16 %v4420_v35, %v4420_v35  ;;  %v9751_v33 = vld [vmem:[#allocation20_spill] sm:$0xff] }
 0x19e   :  { %v4061_v50 = vsel %vm6051_vm11, %v9730_v13, 0.0  ;;  %vm6068_vm1 = vmand %vm1063_vm15, %vm9731_vm0  ;;  %vm9737_vm4 = vcmp.gt.f32.partialorder %v5636_v36, 0.5 }
 0x19f   :  { %v2155_v8 = vpack.c.b16 %v2070_v7, %v2069_v34  ;;  %2379 = vmatmul.bf16.gmra.mxu0 %v2123_v16  ;;  %2708 = vmatmul.bf16.gmra.mxu1 %v2123_v16  ;;  %v9734_v34 = vld [vmem:[#allocation17_spill] sm:$0xff]  ;;  %v3523_v7 = vadd.f32 %v3522_v1, %v3376_v46  ;;  %v9738_v46 = vld [vmem:[#allocation35_spill] sm:$0xff] }
 0x1a0   :  { %v9736_v16 = vld [vmem:[#allocation49_spill] sm:$0xff]  ;;  %vm9739_vm8 = vcmp.gt.f32.partialorder %v9738_v46, 0.0 }
 0x1a1   :  { %2539 = vmatmul.bf16.gmra.mxu2 %v2155_v8  ;;  %2868 = vmatmul.bf16.gmra.mxu3 %v2155_v8 }
 0x1a2   :  { %v2510_v29 = vpop.f32.mrf.mxu2  ;;  %667 = vperm.xlu1 %4625, %v5849_v5   ;;  %4629 = vset.pattern.permute.xlu2 %v9734_v34 }
 0x1a3   :  { %vm3089_vm12 = vcmp.eq.f32.partialorder %v2510_v29, %v5294_v55  ;;  %v2839_v18 = vpop.f32.mrf.mxu3  ;;  %315 = vperm.xlu0 %4636, %v6027_v39   ;;  %v4208_v29 = vadd.f32 %v4207_v45, %v4061_v50 }
 0x1a4   :  { %vm3249_vm13 = vmand %vm3089_vm12, %vm9735_vm5  ;;  %vm3774_vm3 = vcmp.eq.f32.partialorder %v2839_v18, %v5299_v60  ;;  %v6076_v61 = vpop.permute.xlu1 %606  ;;  %vm935_vm12 = vcmp.lt.f32.partialorder %v5553_v44, %v6041_v0  ;;  %v2072_v18 = vunpack.c.l.b16 %v1799_v38 }
 0x1a5   :  { %v3377_v8 = vsel %vm3249_vm13, %v9736_v16, 0.0  ;;  %vm3934_vm11 = vmand %vm3774_vm3, %vm9737_vm4  ;;  %vm998_vm15 = vcmp.lt.f32.partialorder %v5405_v52, %v6076_v61  ;;  %vm1126_vm0 = vcmp.eq.f32.partialorder %v5405_v52, %v6076_v61 }
 0x1a6   :  { %v3524_v1 = vadd.f32 %v3523_v7, %v3377_v8  ;;  %v4062_v13 = vsel %vm3934_vm11, %v9736_v16, 0.0  ;;  %vm1286_vm10 = vmand %vm1126_vm0, %vm9739_vm8  ;;  %vm9740_vm8 = vnez %v9651_v14  ;;  %v9743_v8 = vld [vmem:[#allocation24_spill] sm:$0xff]  ;;  %v9750_v14 = vld [vmem:[#allocation45_spill] sm:$0xff] }
 0x1a7   :  { %v4209_v45 = vadd.f32 %v4208_v29, %v4062_v13  ;;  %vm1414_vm13 = vmor %vm998_vm15, %vm1286_vm10  ;;  %v9752_v29 = vld [vmem:[#allocation36_spill] sm:$0xff] }
 0x1a8   :  { %v4419_v35 = vsel %vm1414_vm13, 1.0, %v9555_v10  ;;  %vm1351_vm3 = vmor %vm935_vm12, %vm6068_vm1  ;;  %vm9744_vm1 = vcmp.gt.f32.partialorder %v5698_v53, 0.5  ;;  %vm9749_vm13 = vcmp.gt.f32.partialorder %v9738_v46, 0.0 }
 0x1a9   :  { %v1798_v50 = vpack.c.bf16 %v4419_v35, %v4419_v35  ;;  %v4356_v41 = vsel %vm1351_vm3, 1.0, %v9555_v10  ;;  %v6118_v35 = vpop.permute.xlu2 %230 }
 0x1aa   :  { %v2512_v34 = vpop.f32.mrf.mxu2  ;;  %279 = vperm.xlu1 %4625, %v6027_v39   ;;  %291 = vperm.xlu2 %4629, %v6027_v39   ;;  %9747 = vst [vmem:[#allocation43_spill] sm:$0xff] %v6118_v35 }
 0x1ab   :  { %vm3090_vm4 = vcmp.eq.f32.partialorder %v2512_v34, %v5294_v55  ;;  %v2841_v7 = vpop.f32.mrf.mxu3  ;;  %v2071_v16 = vunpack.c.l.b16 %v1798_v50  ;;  %4640 = vset.pattern.permute.xlu0 %v9743_v8  ;;  %v6120_v50 = vpop.permute.xlu0 %618  ;;  %v9756_v34 = vld [vmem:[#allocation16_spill] sm:$0xff] }
 0x1ac   :  { %vm6099_vm11 = vmand %vm3090_vm4, %vm9740_vm8  ;;  %vm3775_vm10 = vcmp.eq.f32.partialorder %v2841_v7, %v5299_v60  ;;  %v6104_v38 = vpop.permute.xlu1 %218  ;;  %9748 = vst [vmem:[#allocation15_spill] sm:$0xff] %v6120_v50  ;;  %v1735_v7 = vpack.c.bf16 %v4356_v41, %v4356_v41 }
 0x1ad   :  { %vm6110_vm15 = vmand %vm3775_vm10, %vm9744_vm1  ;;  %vm934_vm0 = vcmp.lt.f32.partialorder %v5553_v44, %v6104_v38  ;;  %vm1062_vm12 = vcmp.eq.f32.partialorder %v5553_v44, %v6104_v38  ;;  %v2156_v13 = vpack.c.b16 %v2072_v18, %v2071_v16  ;;  %vm1128_vm10 = vcmp.eq.f32.partialorder %v5405_v52, %v6120_v50 }
 0x1ae   :  { %vm1222_vm3 = vmand %vm1062_vm12, %vm9749_vm13  ;;  %v3378_v36 = vsel %vm6099_vm11, %v9750_v14, 0.0  ;;  %v4063_v16 = vsel %vm6110_vm15, %v9750_v14, 0.0  ;;  %v2008_v0 = vunpack.c.l.b16 %v1735_v7  ;;  %vm9753_vm11 = vcmp.gt.f32.partialorder %v9752_v29, 0.0 }
 0x1af   :  { %vm1350_vm4 = vmor %vm934_vm0, %vm1222_vm3  ;;  %vm1064_vm0 = vcmp.eq.f32.partialorder %v5553_v44, %v6118_v35  ;;  %v3525_v14 = vadd.f32 %v3524_v1, %v3378_v36  ;;  %vm9757_vm15 = vnez %v9668_v25 }
 0x1b0   :  { %v4355_v53 = vsel %vm1350_vm4, 1.0, %v9555_v10  ;;  %vm6139_vm12 = vmand %vm1128_vm10, %vm9753_vm11  ;;  %vm1000_vm4 = vcmp.lt.f32.partialorder %v5405_v52, %v6120_v50  ;;  %vm9759_vm10 = vcmp.gt.f32.partialorder %v5771_v15, 0.5 }
 0x1b1   :  { %2544 = vmatmul.bf16.gmra.mxu2 %v2156_v13  ;;  %v1734_v18 = vpack.c.bf16 %v4355_v53, %v4355_v53  ;;  %2873 = vmatmul.bf16.gmra.mxu3 %v2156_v13  ;;  %v9758_v13 = vld [vmem:[#allocation50_spill] sm:$0xff] }
 0x1b2   :  { %v2515_v46 = vpop.f32.mrf.mxu2  ;;  %4628 = vset.pattern.permute.xlu1 %v9751_v33  ;;  %4630 = vset.pattern.permute.xlu2 %v9756_v34  ;;  %v6153_v33 = vpop.permute.xlu2 %630 }
 0x1b3   :  { %vm3091_vm1 = vcmp.eq.f32.partialorder %v2515_v46, %v5294_v55  ;;  %v2844_v41 = vpop.f32.mrf.mxu3  ;;  %v2007_v57 = vunpack.c.l.b16 %v1734_v18  ;;  %333 = vperm.xlu0 %4640, %v6027_v39   ;;  %v4210_v46 = vadd.f32 %v4209_v45, %v4063_v16  ;;  %9760 = vst [vmem:[#allocation23_spill] sm:$0xff] %v6153_v33  ;;  %v6172_v16 = vpop.permute.xlu0 %636 }
 0x1b4   :  { %vm3251_vm13 = vmand %vm3091_vm1, %vm9757_vm15  ;;  %vm3776_vm3 = vcmp.eq.f32.partialorder %v2844_v41, %v5299_v60  ;;  %vm9761_vm1 = vcmp.gt.f32.partialorder %v9752_v29, 0.0  ;;  %9764 = vst [vmem:[#allocation46_spill] sm:$0xff] %v6172_v16 }
 0x1b5   :  { %v3379_v7 = vsel %vm3251_vm13, %v9758_v13, 0.0  ;;  %vm3936_vm11 = vmand %vm3776_vm3, %vm9759_vm10  ;;  %v2124_v18 = vpack.c.b16 %v2008_v0, %v2007_v57  ;;  %vm936_vm13 = vcmp.lt.f32.partialorder %v5553_v44, %v6118_v35  ;;  %vm1130_vm10 = vcmp.eq.f32.partialorder %v5405_v52, %v6153_v33 }
 0x1b6   :  { %v3526_v36 = vadd.f32 %v3525_v14, %v3379_v7  ;;  %v4064_v1 = vsel %vm3936_vm11, %v9758_v13, 0.0  ;;  %vm1224_vm15 = vmand %vm1064_vm0, %vm9761_vm1 }
 0x1b7   :  { %v4211_v41 = vadd.f32 %v4210_v46, %v4064_v1  ;;  %2384 = vmatmul.bf16.gmra.mxu0 %v2124_v18  ;;  %2713 = vmatmul.bf16.gmra.mxu1 %v2124_v18  ;;  %vm1416_vm3 = vmor %vm1000_vm4, %vm6139_vm12  ;;  %v9765_v46 = vld [vmem:[#allocation38_spill] sm:$0xff] }
 0x1b8   :  { %vm6167_vm11 = vmor %vm936_vm13, %vm1224_vm15  ;;  %v4421_v45 = vsel %vm1416_vm3, 1.0, %v9555_v10  ;;  %vm9766_vm1 = vcmp.gt.f32.partialorder %v9765_v46, 0.0  ;;  %vm9772_vm13 = vcmp.gt.f32.partialorder %v5901_v59, 0.5  ;;  %v9777_v59 = vld [vmem:[#allocation40_spill] sm:$0xff] }
 0x1b9   :  { %vm6178_vm12 = vmand %vm1130_vm10, %vm9766_vm1  ;;  %v1800_v1 = vpack.c.bf16 %v4421_v45, %v4421_v45  ;;  %vm1131_vm1 = vcmp.eq.f32.partialorder %v5405_v52, %v6172_v16  ;;  %vm9778_vm6 = vcmp.gt.f32.partialorder %v9777_v59, 0.0 }
 0x1ba   :  { %v2517_v57 = vpop.f32.mrf.mxu2  ;;  %685 = vperm.xlu1 %4628, %v5849_v5   ;;  %691 = vperm.xlu2 %4630, %v5849_v5   ;;  %vm1291_vm9 = vmand %vm1131_vm1, %vm9778_vm6 }
 0x1bb   :  { %vm3092_vm0 = vcmp.eq.f32.partialorder %v2517_v57, %v5294_v55  ;;  %v2846_v14 = vpop.f32.mrf.mxu3  ;;  %4643 = vset.pattern.permute.xlu0 %v4930_v62  ;;  %v9775_v57 = vld [vmem:[#allocation37_spill] sm:$0xff]  ;;  %v2073_v25 = vunpack.c.l.b16 %v1800_v1 }
 0x1bc   :  { %vm6185_vm15 = vmand %vm3092_vm0, %vm5896_vm14  ;;  %vm3777_vm4 = vcmp.eq.f32.partialorder %v2846_v14, %v5299_v60  ;;  %v6190_v7 = vpop.permute.xlu1 %624  ;;  %vm9776_vm14 = vcmp.gt.f32.partialorder %v9775_v57, 0.0  ;;  %v9785_v1 = vld [vmem:[#allocation57_spill] sm:$0xff] }
 0x1bd   :  { %9771 = vst [vmem:[#allocation49_spill] sm:$0xff] %v6190_v7  ;;  %vm6195_vm3 = vmand %vm3777_vm4, %vm9772_vm13  ;;  %vm1001_vm10 = vcmp.lt.f32.partialorder %v5405_v52, %v6190_v7  ;;  %vm1129_vm0 = vcmp.eq.f32.partialorder %v5405_v52, %v6190_v7  ;;  %vm1002_vm4 = vcmp.lt.f32.partialorder %v5405_v52, %v6153_v33  ;;  %vm1003_vm13 = vcmp.lt.f32.partialorder %v5405_v52, %v6172_v16  ;;  %v1853_v16 = vld [vmem:[#allocation8 + $0x68] sm:$0xff] }
 0x1be   :  { %vm1289_vm8 = vmand %vm1129_vm0, %vm9776_vm14  ;;  %v3380_v45 = vsel %vm6185_vm15, %v9779_v37, 0.0  ;;  %v4065_v29 = vsel %vm6195_vm3, %v9779_v37, 0.0  ;;  %v4357_v37 = vsel %vm6167_vm11, 1.0, %v9555_v10 }
 0x1bf   :  { %vm1417_vm5 = vmor %vm1001_vm10, %vm1289_vm8  ;;  %v3527_v53 = vadd.f32 %v3526_v36, %v3380_v45  ;;  %v4212_v18 = vadd.f32 %v4211_v41, %v4065_v29  ;;  %v3648_v36 = vrot.slane %v1853_v16, 4  ;;  %vm9787_vm10 = vcmp.gt.f32.partialorder %v9775_v57, 0.0 }
 0x1c0   :  { %v4422_v14 = vsel %vm1417_vm5, 1.0, %v9555_v10  ;;  %vm6222_vm14 = vmor %vm1002_vm4, %vm6178_vm12  ;;  %v1736_v45 = vpack.c.bf16 %v4357_v37, %v4357_v37 }
 0x1c1   :  { %v1801_v15 = vpack.c.bf16 %v4422_v14, %v4422_v14  ;;  %vm6228_vm5 = vmor %vm1003_vm13, %vm1291_vm9  ;;  %vm9786_vm9 = vcmp.gt.f32.partialorder %v5952_v22, 0.5  ;;  %v1854_v22 = vld [vmem:[#allocation8 + $0x70] sm:$0xff] }
 0x1c2   :  { %v2520_v7 = vpop.f32.mrf.mxu2  ;;  %297 = vperm.xlu1 %4628, %v6027_v39   ;;  %4633 = vset.pattern.permute.xlu2 %v9696_v31  ;;  %v9804_v31 = vld [vmem:[#allocation65_spill] sm:$0xff] }
 0x1c3   :  { %vm3093_vm6 = vcmp.eq.f32.partialorder %v2520_v7, %v5294_v55  ;;  %v2849_v13 = vpop.f32.mrf.mxu3  ;;  %v2074_v35 = vunpack.c.l.b16 %v1801_v15  ;;  %v6241_v15 = vpop.permute.xlu2 %248  ;;  %739 = vperm.xlu0 %4643, %v5849_v5  }
 0x1c4   :  { %vm3253_vm8 = vmand %vm3093_vm6, %vm5978_vm7  ;;  %vm3778_vm12 = vcmp.eq.f32.partialorder %v2849_v13, %v5299_v60  ;;  %v6239_v7 = vpop.permute.xlu1 %236  ;;  %9784 = vst [vmem:[#allocation24_spill] sm:$0xff] %v6241_v15  ;;  %vm1067_vm4 = vcmp.eq.f32.partialorder %v5553_v44, %v6241_v15  ;;  %vm939_vm13 = vcmp.lt.f32.partialorder %v5553_v44, %v6241_v15  ;;  %vm9789_vm6 = vcmp.gt.f32.partialorder %v9777_v59, 0.0 }
 0x1c5   :  { %v3381_v14 = vsel %vm3253_vm8, %v9785_v1, 0.0  ;;  %vm3938_vm11 = vmand %vm3778_vm12, %vm9786_vm9  ;;  %vm937_vm15 = vcmp.lt.f32.partialorder %v5553_v44, %v6239_v7  ;;  %vm1065_vm3 = vcmp.eq.f32.partialorder %v5553_v44, %v6239_v7  ;;  %v2157_v29 = vpack.c.b16 %v2074_v35, %v2073_v25 }
 0x1c6   :  { %v3528_v41 = vadd.f32 %v3527_v53, %v3381_v14  ;;  %v4066_v0 = vsel %vm3938_vm11, %v9785_v1, 0.0  ;;  %vm1225_vm0 = vmand %vm1065_vm3, %vm9787_vm10  ;;  %v4423_v25 = vsel %vm6222_vm14, 1.0, %v9555_v10  ;;  %v4424_v35 = vsel %vm6228_vm5, 1.0, %v9555_v10 }
 0x1c7   :  { %v4213_v13 = vadd.f32 %v4212_v18, %v4066_v0  ;;  %vm1353_vm1 = vmor %vm937_vm15, %vm1225_vm0  ;;  %2549 = vmatmul.bf16.gmra.mxu2 %v2157_v29  ;;  %2878 = vmatmul.bf16.gmra.mxu3 %v2157_v29  ;;  %v2995_v53 = vunpack.c.l.bf16 %v1853_v16  ;;  %v6263_v18 = vunpack.c.l.bf16 %v3648_v36  ;;  %v2009_v14 = vunpack.c.l.b16 %v1736_v45 }
 0x1c8   :  { %v4358_v32 = vsel %vm1353_vm1, 1.0, %v9555_v10  ;;  %v3649_v29 = vrot.slane %v1854_v22, 4  ;;  %vm1227_vm8 = vmand %vm1067_vm4, %vm9789_vm6  ;;  %v1802_v0 = vpack.c.bf16 %v4423_v25, %v4423_v25  ;;  %v1803_v16 = vpack.c.bf16 %v4424_v35, %v4424_v35 }
 0x1c9   :  { %v1737_v37 = vpack.c.bf16 %v4358_v32, %v4358_v32  ;;  %9788 = vst [vmem:[#allocation45_spill] sm:$0xff] %v6263_v18  ;;  %vm6274_vm12 = vcmp.gt.f32.partialorder %v2995_v53, 0.5  ;;  %v9790_v32 = vmov 0  ;;  %v2996_v45 = vunpack.c.l.bf16 %v1854_v22  ;;  %vm1355_vm9 = vmor %vm939_vm13, %vm1227_vm8 }
 0x1ca   :  { %v2522_v1 = vpop.f32.mrf.mxu2  ;;  %4632 = vset.pattern.permute.xlu1 %v9756_v34  ;;  %309 = vperm.xlu2 %4633, %v6027_v39   ;;  %v9791_v32 = vsel %vm6274_vm12, 4294967295, %v9790_v32  ;;  %vm9336_vm11 = vcmp.gt.f32.partialorder %v6263_v18, 0.5  ;;  %v6285_v35 = vunpack.c.l.bf16 %v3649_v29  ;;  %v2075_v22 = vunpack.c.l.b16 %v1802_v0  ;;  %v2691_v0 = vpop.f32.mrf.mxu1 }
 0x1cb   :  { %vm3094_vm14 = vcmp.eq.f32.partialorder %v2522_v1, %v5294_v55  ;;  %v2851_v33 = vpop.f32.mrf.mxu3  ;;  %v2010_v50 = vunpack.c.l.b16 %v1737_v37  ;;  %4647 = vset.pattern.permute.xlu0 %v5030_v48  ;;  %9792 = vst [vmem:[#allocation50_spill] sm:$0xff] %v9791_v32  ;;  %v2076_v37 = vunpack.c.l.b16 %v1803_v16  ;;  %v2362_v1 = vpop.f32.mrf.mxu0  ;;  %vm6296_vm10 = vcmp.gt.f32.partialorder %v2996_v45, 0.5  ;;  %v9802_v45 = vld [vmem:[#allocation22_spill] sm:$0xff] }
 0x1cc   :  { %vm3779_vm5 = vcmp.eq.f32.partialorder %v2851_v33, %v5299_v60  ;;  %vm6281_vm15 = vmand %vm3094_vm14, %vm6274_vm12  ;;  %9795 = vst [vmem:[#allocation51_spill] sm:$0xff] %v6285_v35  ;;  %v4360_v29 = vsel %vm1355_vm9, 1.0, %v9555_v10  ;;  %vm9325_vm0 = vcmp.gt.f32.partialorder %v6285_v35, 0.5  ;;  %vm3030_vm4 = vcmp.eq.f32.partialorder %v2362_v1, %v5294_v55  ;;  %v6314_v15 = vpop.permute.xlu2 %648  ;;  %v9814_v1 = vld [vmem:[#allocation48_spill] sm:$0xff] }
 0x1cd   :  { %v2125_v36 = vpack.c.b16 %v2010_v50, %v2009_v14  ;;  %vm6289_vm3 = vmand %vm3779_vm5, %vm9336_vm11  ;;  %v9798_v14 = vld [vmem:[#allocation52_spill] sm:$0xff]  ;;  %v9799_v50 = vmov 0  ;;  %vm3715_vm9 = vcmp.eq.f32.partialorder %v2691_v0, %v5299_v60 }
 0x1ce   :  { %v3382_v33 = vsel %vm6281_vm15, %v9798_v14, 0.0  ;;  %v9800_v50 = vsel %vm6296_vm10, 4294967295, %v9799_v50  ;;  %v4067_v59 = vsel %vm6289_vm3, %v9798_v14, 0.0  ;;  %v1739_v14 = vpack.c.bf16 %v4360_v29, %v4360_v29  ;;  %9803 = vst [vmem:[#allocation52_spill] sm:$0xff] %v6314_v15 }
 0x1cf   :  { %2389 = vmatmul.bf16.gmra.mxu0 %v2125_v36  ;;  %2718 = vmatmul.bf16.gmra.mxu1 %v2125_v36  ;;  %9801 = vst [vmem:[#allocation57_spill] sm:$0xff] %v9800_v50  ;;  %v2158_v36 = vpack.c.b16 %v2076_v37, %v2075_v22  ;;  %v3529_v25 = vadd.f32 %v3528_v41, %v3382_v33  ;;  %vm9806_vm15 = vcmp.gt.f32.partialorder %v9765_v46, 0.0  ;;  %v9849_v50 = vld [vmem:[#allocation60_spill] sm:$0xff] }
 0x1d0   :  { %v2012_v0 = vunpack.c.l.b16 %v1739_v14 }
 0x1d2   :  { %v2525_v34 = vpop.f32.mrf.mxu2  ;;  %303 = vperm.xlu1 %4632, %v6027_v39   ;;  %4635 = vset.pattern.permute.xlu2 %v9802_v45 }
 0x1d3   :  { %vm3095_vm1 = vcmp.eq.f32.partialorder %v2525_v34, %v5294_v55  ;;  %v2854_v16 = vpop.f32.mrf.mxu3  ;;  %757 = vperm.xlu0 %4647, %v5849_v5   ;;  %v4214_v34 = vadd.f32 %v4213_v13, %v4067_v59 }
 0x1d4   :  { %vm3255_vm13 = vmand %vm3095_vm1, %vm6296_vm10  ;;  %vm3780_vm6 = vcmp.eq.f32.partialorder %v2854_v16, %v5299_v60  ;;  %v6312_v53 = vpop.permute.xlu1 %242  ;;  %v9812_v16 = vld [vmem:[#allocation47_spill] sm:$0xff] }
 0x1d5   :  { %v3383_v22 = vsel %vm3255_vm13, %v9804_v31, 0.0  ;;  %vm3940_vm8 = vmand %vm3780_vm6, %vm9325_vm0  ;;  %vm938_vm14 = vcmp.lt.f32.partialorder %v5553_v44, %v6312_v53  ;;  %vm1066_vm5 = vcmp.eq.f32.partialorder %v5553_v44, %v6312_v53  ;;  %vm1133_vm13 = vcmp.eq.f32.partialorder %v5405_v52, %v6314_v15 }
 0x1d6   :  { %v6325_v41 = vadd.f32 %v3529_v25, %v3383_v22  ;;  %v4068_v37 = vsel %vm3940_vm8, %v9804_v31, 0.0  ;;  %vm1226_vm3 = vmand %vm1066_vm5, %vm9806_vm15  ;;  %vm9813_vm5 = vcmp.gt.f32.partialorder %v9812_v16, 0.0 }
 0x1d7   :  { %v6330_v59 = vadd.f32 %v4214_v34, %v4068_v37  ;;  %vm1354_vm1 = vmor %vm938_vm14, %vm1226_vm3  ;;  %2554 = vmatmul.bf16.gmra.mxu2 %v2158_v36  ;;  %2883 = vmatmul.bf16.gmra.mxu3 %v2158_v36  ;;  %vm1005_vm14 = vcmp.lt.f32.partialorder %v5405_v52, %v6314_v15 }
 0x1d8   :  { %9805 = vst [vmem:[#allocation65_spill] sm:$0xff] %v6325_v41  ;;  %vm6338_vm6 = vmand %vm3030_vm4, %vm6274_vm12  ;;  %v4359_v31 = vsel %vm1354_vm1, 1.0, %v9555_v10 }
 0x1d9   :  { %9807 = vst [vmem:[#allocation86_spill] sm:$0xff] %v6330_v59  ;;  %vm6345_vm8 = vmand %vm3715_vm9, %vm9336_vm11  ;;  %v1738_v29 = vpack.c.bf16 %v4359_v31, %v4359_v31  ;;  %v3318_v36 = vsel %vm6338_vm6, %v9814_v1, 0.0 }
 0x1da   :  { %vm1293_vm15 = vmand %vm1133_vm13, %vm9813_vm5  ;;  %4634 = vset.pattern.permute.xlu1 %v9722_v49  ;;  %709 = vperm.xlu2 %4635, %v5849_v5   ;;  %v4003_v34 = vsel %vm6345_vm8, %v9814_v1, 0.0  ;;  %v3445_v13 = vadd.f32 %v6018_v28, %v3318_v36  ;;  %v9817_v36 = vld [vmem:[#allocation21_spill] sm:$0xff] }
 0x1db   :  { %v2011_v25 = vunpack.c.l.b16 %v1738_v29  ;;  %4652 = vset.pattern.permute.xlu0 %v9719_v23  ;;  %vm1421_vm9 = vmor %vm1005_vm14, %vm1293_vm15  ;;  %v4130_v31 = vadd.f32 %v6029_v27, %v4003_v34  ;;  %v6385_v34 = vpop.f32.mrf.mxu2 }
 0x1dc   :  { %v2365_v14 = vpop.f32.mrf.mxu0  ;;  %v4426_v28 = vsel %vm1421_vm9, 1.0, %v9555_v10  ;;  %9818 = vst [vmem:[#allocation88_spill] sm:$0xff] %v6385_v34 }
 0x1dd   :  { %vm3031_vm4 = vcmp.eq.f32.partialorder %v2365_v14, %v5294_v55  ;;  %v2694_v22 = vpop.f32.mrf.mxu1  ;;  %v2126_v37 = vpack.c.b16 %v2012_v0, %v2011_v25  ;;  %v1805_v25 = vpack.c.bf16 %v4426_v28, %v4426_v28  ;;  %v6389_v14 = vpop.permute.xlu0 %254 }
 0x1de   :  { %vm3191_vm3 = vmand %vm3031_vm4, %vm6296_vm10  ;;  %vm3716_vm1 = vcmp.eq.f32.partialorder %v2694_v22, %v5299_v60  ;;  %v6391_v22 = vpop.f32.mrf.mxu3  ;;  %vm1068_vm4 = vcmp.eq.f32.partialorder %v5553_v44, %v6389_v14  ;;  %vm940_vm9 = vcmp.lt.f32.partialorder %v5553_v44, %v6389_v14 }
 0x1df   :  { %v3319_v33 = vsel %vm3191_vm3, %v5370_v19, 0.0  ;;  %vm3876_vm13 = vmand %vm3716_vm1, %vm9325_vm0  ;;  %2394 = vmatmul.bf16.gmra.mxu0 %v2126_v37  ;;  %2723 = vmatmul.bf16.gmra.mxu1 %v2126_v37  ;;  %9821 = vst [vmem:[#allocation89_spill] sm:$0xff] %v6391_v22 }
 0x1e0   :  { %v6371_v29 = vadd.f32 %v3445_v13, %v3319_v33  ;;  %v4004_v0 = vsel %vm3876_vm13, %v5370_v19, 0.0  ;;  %v9819_v19 = vld [vmem:[#allocation44_spill] sm:$0xff]  ;;  %v6396_v33 = vpop.permute.xlu2 %654 }
 0x1e1   :  { %v6374_v1 = vadd.f32 %v4130_v31, %v4004_v0  ;;  %vm9820_vm14 = vcmp.gt.f32.partialorder %v9819_v19, 0.0  ;;  %v2078_v31 = vunpack.c.l.b16 %v1805_v25  ;;  %9822 = vst [vmem:[#allocation90_spill] sm:$0xff] %v6396_v33 }
 0x1e2   :  { %9815 = vst [vmem:[#allocation48_spill] sm:$0xff] %v6371_v29  ;;  %703 = vperm.xlu1 %4634, %v5849_v5   ;;  %4638 = vset.pattern.permute.xlu2 %v9817_v36  ;;  %vm9823_vm3 = vmmov %vm9820_vm14 }
 0x1e3   :  { %9816 = vst [vmem:[#allocation87_spill] sm:$0xff] %v6374_v1  ;;  %vm1228_vm1 = vmand %vm1068_vm4, %vm9823_vm3  ;;  %v2530_v25 = vpop.f32.mrf.mxu2  ;;  %vm1006_vm3 = vcmp.lt.f32.partialorder %v5405_v52, %v6396_v33 }
 0x1e4   :  { %v6379_v27 = vpop.permute.xlu1 %642  ;;  %v6404_v59 = vpop.f32.mrf.mxu0  ;;  %vm1356_vm13 = vmor %vm940_vm9, %vm1228_vm1 }
 0x1e5   :  { %vm1004_vm6 = vcmp.lt.f32.partialorder %v5405_v52, %v6379_v27  ;;  %vm1132_vm8 = vcmp.eq.f32.partialorder %v5405_v52, %v6379_v27  ;;  %v6406_v41 = vpop.f32.mrf.mxu1 }
 0x1e6   :  { %vm1292_vm5 = vmand %vm1132_vm8, %vm9820_vm14 }
 0x1e7   :  { %vm1420_vm15 = vmor %vm1004_vm6, %vm1292_vm5  ;;  %vm1134_vm6 = vcmp.eq.f32.partialorder %v5405_v52, %v6396_v33  ;;  %vm9826_vm5 = vcmp.gt.f32.partialorder %v9812_v16, 0.0 }
 0x1e8   :  { %v4425_v37 = vsel %vm1420_vm15, 1.0, %v9555_v10  ;;  %v6413_v34 = vpop.permute.xlu2 %266 }
 0x1e9   :  { %v1804_v13 = vpack.c.bf16 %v4425_v37, %v4425_v37  ;;  %v2859_v37 = vpop.f32.mrf.mxu3  ;;  %9825 = vst [vmem:[#allocation92_spill] sm:$0xff] %v6413_v34  ;;  %vm1070_vm9 = vcmp.eq.f32.partialorder %v5553_v44, %v6413_v34 }
 0x1ea   :  { %4637 = vset.pattern.permute.xlu1 %v9802_v45  ;;  %715 = vperm.xlu2 %4638, %v5849_v5   ;;  %vm3782_vm7 = vcmp.eq.f32.partialorder %v2859_v37, %v5299_v60 }
 0x1eb   :  { %v2077_v0 = vunpack.c.l.b16 %v1804_v13  ;;  %v4361_v13 = vsel %vm1356_vm13, 1.0, %v9555_v10  ;;  %v2532_v45 = vpop.f32.mrf.mxu2 }
 0x1ec   :  { %v2370_v36 = vpop.f32.mrf.mxu0 }
 0x1ed   :  { %v2159_v28 = vpack.c.b16 %v2078_v31, %v2077_v0  ;;  %v1740_v31 = vpack.c.bf16 %v4361_v13, %v4361_v13  ;;  %v6423_v0 = vpop.permute.xlu0 %272  ;;  %v6439_v15 = vpop.f32.mrf.mxu1 }
 0x1ee   :  { %9827 = vst [vmem:[#allocation93_spill] sm:$0xff] %v6423_v0  ;;  %vm1071_vm0 = vcmp.eq.f32.partialorder %v5553_v44, %v6423_v0 }
 0x1ef   :  { %2559 = vmatmul.bf16.gmra.mxu2 %v2159_v28  ;;  %2888 = vmatmul.bf16.gmra.mxu3 %v2159_v28  ;;  %v9828_v28 = vld [vmem:[#allocation62_spill] sm:$0xff]  ;;  %v2013_v16 = vunpack.c.l.b16 %v1740_v31 }
 0x1f0   :  { %vm9829_vm1 = vcmp.gt.f32.partialorder %v9828_v28, 0.0  ;;  %v9833_v31 = vld [vmem:[#allocation26_spill] sm:$0xff] }
 0x1f1   :  { %vm1294_vm13 = vmand %vm1134_vm6, %vm9829_vm1  ;;  %v2861_v33 = vpop.f32.mrf.mxu3 }
 0x1f2   :  { %321 = vperm.xlu1 %4637, %v6027_v39   ;;  %327 = vperm.xlu2 %4638, %v6027_v39   ;;  %vm6441_vm6 = vmor %vm1006_vm3, %vm1294_vm13  ;;  %vm9836_vm3 = vnez %v9559_v20  ;;  %vm3783_vm10 = vcmp.eq.f32.partialorder %v2861_v33, %v5299_v60 }
 0x1f4   :  { %v6411_v22 = vpop.permute.xlu1 %260 }
 0x1f5   :  { %9824 = vst [vmem:[#allocation91_spill] sm:$0xff] %v6411_v22  ;;  %vm941_vm8 = vcmp.lt.f32.partialorder %v5553_v44, %v6411_v22  ;;  %vm1069_vm14 = vcmp.eq.f32.partialorder %v5553_v44, %v6411_v22  ;;  %v2701_v32 = vpop.f32.mrf.mxu1 }
 0x1f6   :  { %vm1229_vm15 = vmand %vm1069_vm14, %vm9826_vm5 }
 0x1f7   :  { %vm1357_vm4 = vmor %vm941_vm8, %vm1229_vm15  ;;  %vm942_vm8 = vcmp.lt.f32.partialorder %v5553_v44, %v6413_v34  ;;  %vm3097_vm15 = vcmp.eq.f32.partialorder %v2530_v25, %v5294_v55  ;;  %v9834_v34 = vld [vmem:[#allocation59_spill] sm:$0xff] }
 0x1f8   :  { %v4362_v19 = vsel %vm1357_vm4, 1.0, %v9555_v10  ;;  %vm9830_vm14 = vmmov %vm9829_vm1  ;;  %vm943_vm4 = vcmp.lt.f32.partialorder %v5553_v44, %v6423_v0  ;;  %vm9835_vm1 = vcmp.gt.f32.partialorder %v9834_v34, 0.0  ;;  %v2372_v0 = vpop.f32.mrf.mxu0  ;;  %v4427_v44 = vsel %vm6441_vm6, 1.0, %v9555_v10 }
 0x1f9   :  { %v1741_v13 = vpack.c.bf16 %v4362_v19, %v4362_v19  ;;  %vm1230_vm5 = vmand %vm1070_vm9, %vm9830_vm14  ;;  %vm3098_vm14 = vcmp.eq.f32.partialorder %v2532_v45, %v5294_v55 }
 0x1fa   :  { %4639 = vset.pattern.permute.xlu1 %v9743_v8  ;;  %4642 = vset.pattern.permute.xlu2 %v9833_v31  ;;  %vm1231_vm9 = vmand %vm1071_vm0, %vm9835_vm1 }
 0x1fb   :  { %v2014_v19 = vunpack.c.l.b16 %v1741_v13  ;;  %vm1358_vm11 = vmor %vm942_vm8, %vm1230_vm5  ;;  %vm9842_vm8 = vcmp.gt.f32.partialorder %v5305_v51, 0.5 }
 0x1fc   :  { %vm6454_vm13 = vmand %vm3097_vm15, %vm9836_vm3  ;;  %v4363_v13 = vsel %vm1358_vm11, 1.0, %v9555_v10  ;;  %vm3033_vm15 = vcmp.eq.f32.partialorder %v2370_v36, %v5294_v55 }
 0x1fd   :  { %v2127_v25 = vpack.c.b16 %v2014_v19, %v2013_v16  ;;  %vm1359_vm12 = vmor %vm943_vm4, %vm1231_vm9  ;;  %v6472_v16 = vld [vmem:[#allocation2] sm:$0xff]  ;;  %vm9845_vm4 = vcmp.gt.f32.partialorder %v5297_v42, 0.5  ;;  %v3385_v36 = vsel %vm6454_vm13, %v9849_v50, 0.0  ;;  %v1742_v22 = vpack.c.bf16 %v4363_v13, %v4363_v13 }
 0x1fe   :  { %vm6462_vm0 = vmand %vm3098_vm14, %vm9839_vm2  ;;  %v862_v33 = vrot.slane %v6472_v16, 6  ;;  %v4364_v37 = vsel %vm1359_vm12, 1.0, %v9555_v10  ;;  %vm3034_vm13 = vcmp.eq.f32.partialorder %v2372_v0, %v5294_v55 }
 0x1ff   :  { %2399 = vmatmul.bf16.gmra.mxu0 %v2127_v25  ;;  %2728 = vmatmul.bf16.gmra.mxu1 %v2127_v25  ;;  %vm6468_vm5 = vmand %vm3783_vm10, %vm9842_vm8  ;;  %v9848_v25 = vld [vmem:[#allocation64_spill] sm:$0xff]  ;;  %v1743_v13 = vpack.c.bf16 %v4364_v37, %v4364_v37  ;;  %vm9853_vm10 = vnez %v9576_v2 }
 0x200   :  { %vm6480_vm1 = vmand %vm3782_vm7, %vm9845_vm4  ;;  %v3386_v31 = vsel %vm6462_vm0, %v9848_v25, 0.0  ;;  %v4071_v1 = vsel %vm6468_vm5, %v9848_v25, 0.0  ;;  %v6508_v45 = vperm.slane %v862_v33, 0  ;;  %vm9855_vm0 = vcmp.gt.f32.partialorder %v5358_v9, 0.5 }
 0x201   :  { %vm6500_vm7 = vmand %vm3033_vm15, %vm9836_vm3  ;;  %v4070_v35 = vsel %vm6480_vm1, %v9849_v50, 0.0  ;;  %v3538_v25 = vadd.f32 %v3386_v31, %v3385_v36  ;;  %vm3719_vm5 = vcmp.eq.f32.partialorder %v2701_v32, %v5299_v60  ;;  %vm9856_vm15 = vcmp.gt.f32.partialorder %v9834_v34, 0.0  ;;  %v9862_v36 = vld [vmem:[#allocation25_spill] sm:$0xff] }
 0x202   :  { %721 = vperm.xlu1 %4639, %v5849_v5   ;;  %733 = vperm.xlu2 %4642, %v5849_v5   ;;  %v2016_v0 = vunpack.c.l.b16 %v1743_v13 }
 0x204   :  { %v2535_v29 = vpop.f32.mrf.mxu2  ;;  %v2864_v18 = vpop.f32.mrf.mxu3 }
 0x205   :  { %vm3099_vm12 = vcmp.eq.f32.partialorder %v2535_v29, %v5294_v55  ;;  %vm3784_vm11 = vcmp.eq.f32.partialorder %v2864_v18, %v5299_v60  ;;  %v6506_v28 = vpop.permute.xlu1 %660  ;;  %v6519_v18 = vpop.permute.xlu2 %673  ;;  %v4223_v29 = vadd.f32 %v4071_v1, %v4070_v35  ;;  %v2015_v1 = vunpack.c.l.b16 %v1742_v22  ;;  %v9868_v35 = vld [vmem:[#allocation71_spill] sm:$0xff] }
 0x206   :  { %9852 = vst [vmem:[#allocation64_spill] sm:$0xff] %v6506_v28  ;;  %vm3259_vm6 = vmand %vm3099_vm12, %vm9853_vm10  ;;  %vm1007_vm9 = vcmp.lt.f32.partialorder %v5405_v52, %v6506_v28  ;;  %vm1135_vm14 = vcmp.eq.f32.partialorder %v5405_v52, %v6506_v28  ;;  %v1806_v52 = vpack.c.bf16 %v4427_v44, %v4427_v44  ;;  %vm1137_vm12 = vcmp.eq.f32.partialorder %v6508_v45, %v6519_v18 }
 0x207   :  { %9854 = vst [vmem:[#allocation60_spill] sm:$0xff] %v6519_v18  ;;  %v3387_v33 = vsel %vm3259_vm6, %v5751_v4, 0.0  ;;  %vm3944_vm8 = vmand %vm3784_vm11, %vm9855_vm0  ;;  %vm3718_vm11 = vcmp.eq.f32.partialorder %v6439_v15, %v5299_v60  ;;  %v858_v44 = vrot.slane %v6472_v16, 2  ;;  %v9863_v15 = vld [vmem:[#allocation29_spill] sm:$0xff] }
 0x208   :  { %v6526_v50 = vadd.f32 %v3538_v25, %v3387_v33  ;;  %v4072_v31 = vsel %vm3944_vm8, %v5751_v4, 0.0  ;;  %vm1295_vm4 = vmand %vm1135_vm14, %vm9856_vm15  ;;  %vm9859_vm14 = vcmp.gt.f32.partialorder %v5305_v51, 0.5  ;;  %vm9865_vm15 = vcmp.gt.f32.partialorder %v5297_v42, 0.5 }
 0x209   :  { %v6531_v37 = vadd.f32 %v4223_v29, %v4072_v31  ;;  %vm1423_vm1 = vmor %vm1007_vm9, %vm1295_vm4  ;;  %vm1009_vm9 = vcmp.lt.f32.partialorder %v6508_v45, %v6519_v18  ;;  %v2128_v29 = vpack.c.b16 %v2016_v0, %v2015_v1  ;;  %v2079_v33 = vunpack.c.l.b16 %v1806_v52 }
 0x20a   :  { %vm6539_vm6 = vmand %vm3034_vm13, %vm9839_vm2  ;;  %v4428_v4 = vsel %vm1423_vm1, 1.0, %v9555_v10  ;;  %4641 = vset.pattern.permute.xlu1 %v9862_v36  ;;  %345 = vperm.xlu2 %4642, %v6027_v39   ;;  %vm9864_vm13 = vcmp.gt.f32.partialorder %v9863_v15, 0.0  ;;  %v6578_v1 = vperm.slane %v858_v44, 0 }
 0x20b   :  { %vm6546_vm0 = vmand %vm3719_vm5, %vm9859_vm14  ;;  %v1807_v22 = vpack.c.bf16 %v4428_v4, %v4428_v4  ;;  %v3322_v25 = vsel %vm6539_vm6, %v9868_v35, 0.0  ;;  %v9869_v4 = vld [vmem:[#allocation74_spill] sm:$0xff] }
 0x20c   :  { %vm1297_vm8 = vmand %vm1137_vm12, %vm9864_vm13  ;;  %v3321_v28 = vsel %vm6500_vm7, %v9869_v4, 0.0  ;;  %v4007_v18 = vsel %vm6546_vm0, %v9868_v35, 0.0  ;;  %v2375_v51 = vpop.f32.mrf.mxu0  ;;  %v2704_v43 = vpop.f32.mrf.mxu1 }
 0x20d   :  { %vm6559_vm4 = vmand %vm3718_vm11, %vm9865_vm15  ;;  %v2080_v31 = vunpack.c.l.b16 %v1807_v22  ;;  %vm3035_vm1 = vcmp.eq.f32.partialorder %v2375_v51, %v5294_v55  ;;  %vm3720_vm12 = vcmp.eq.f32.partialorder %v2704_v43, %v5299_v60  ;;  %v3454_v0 = vadd.f32 %v3322_v25, %v3321_v28  ;;  %v6585_v32 = vpop.permute.xlu2 %285  ;;  %v2537_v25 = vpop.f32.mrf.mxu2 }
 0x20e   :  { %vm6572_vm5 = vmor %vm1009_vm9, %vm1297_vm8  ;;  %v4006_v46 = vsel %vm6559_vm4, %v9869_v4, 0.0  ;;  %vm9872_vm11 = vcmp.gt.f32.partialorder %v5358_v9, 0.5  ;;  %vm1073_vm14 = vcmp.eq.f32.partialorder %v6578_v1, %v6585_v32  ;;  %vm945_vm15 = vcmp.lt.f32.partialorder %v6578_v1, %v6585_v32 }
 0x20f   :  { %2404 = vmatmul.bf16.gmra.mxu0 %v2128_v29  ;;  %v2160_v52 = vpack.c.b16 %v2080_v31, %v2079_v33  ;;  %2733 = vmatmul.bf16.gmra.mxu1 %v2128_v29  ;;  %vm3195_vm7 = vmand %vm3035_vm1, %vm9853_vm10  ;;  %v4139_v19 = vadd.f32 %v4007_v18, %v4006_v46  ;;  %v4430_v28 = vsel %vm6572_vm5, 1.0, %v9555_v10  ;;  %v9876_v29 = vld [vmem:[#allocation28_spill] sm:$0xff]  ;;  %v2866_v33 = vpop.f32.mrf.mxu3 }
 0x210   :  { %v3323_v51 = vsel %vm3195_vm7, %v5773_v30, 0.0  ;;  %vm3880_vm6 = vmand %vm3720_vm12, %vm9872_vm11  ;;  %v1809_v42 = vpack.c.bf16 %v4430_v28, %v4430_v28  ;;  %vm9877_vm4 = vcmp.gt.f32.partialorder %v9876_v29, 0.0  ;;  %vm3100_vm11 = vcmp.eq.f32.partialorder %v2537_v25, %v5294_v55 }
 0x211   :  { %2564 = vmatmul.bf16.gmra.mxu2 %v2160_v52  ;;  %2893 = vmatmul.bf16.gmra.mxu3 %v2160_v52  ;;  %v3455_v43 = vadd.f32 %v3454_v0, %v3323_v51  ;;  %v4008_v22 = vsel %vm3880_vm6, %v5773_v30, 0.0  ;;  %vm9873_vm0 = vmmov %vm9864_vm13 }
 0x212   :  { %v4140_v44 = vadd.f32 %v4139_v19, %v4008_v22  ;;  %727 = vperm.xlu1 %4641, %v5849_v5   ;;  %4645 = vset.pattern.permute.xlu2 %v4930_v62  ;;  %vm6602_vm9 = vmand %vm1073_vm14, %vm9873_vm0  ;;  %v2082_v52 = vunpack.c.l.b16 %v1809_v42  ;;  %vm3785_vm14 = vcmp.eq.f32.partialorder %v2866_v33, %v5299_v60  ;;  %vm9878_vm0 = vnez %v9583_v3 }
 0x213   :  { %vm1361_vm6 = vmor %vm945_vm15, %vm6602_vm9 }
 0x214   :  { %v6598_v18 = vpop.permute.xlu1 %667  ;;  %v2377_v30 = vpop.f32.mrf.mxu0  ;;  %vm6637_vm9 = vmand %vm3100_vm11, %vm9878_vm0  ;;  %v4366_v28 = vsel %vm1361_vm6, 1.0, %v9555_v10 }
 0x215   :  { %vm1008_vm13 = vcmp.lt.f32.partialorder %v6508_v45, %v6598_v18  ;;  %vm1136_vm8 = vcmp.eq.f32.partialorder %v6508_v45, %v6598_v18  ;;  %v2706_v35 = vpop.f32.mrf.mxu1  ;;  %vm3036_vm12 = vcmp.eq.f32.partialorder %v2377_v30, %v5294_v55  ;;  %v6657_v25 = vpop.permute.xlu2 %291  ;;  %v1745_v46 = vpack.c.bf16 %v4366_v28, %v4366_v28 }
 0x216   :  { %vm1296_vm5 = vmand %vm1136_vm8, %vm9877_vm4  ;;  %vm3721_vm7 = vcmp.eq.f32.partialorder %v2706_v35, %v5299_v60 }
 0x217   :  { %vm1424_vm1 = vmor %vm1008_vm13, %vm1296_vm5  ;;  %vm9881_vm13 = vcmp.gt.f32.partialorder %v5413_v11, 0.5 }
 0x218   :  { %v4429_v31 = vsel %vm1424_vm1, 1.0, %v9555_v10  ;;  %vm6623_vm8 = vmand %vm3036_vm12, %vm9878_vm0 }
 0x219   :  { %v1808_v4 = vpack.c.bf16 %v4429_v31, %v4429_v31  ;;  %vm6631_vm4 = vmand %vm3721_vm7, %vm9881_vm13  ;;  %v3324_v30 = vsel %vm6623_vm8, %v5858_v6, 0.0  ;;  %vm9889_vm7 = vcmp.gt.f32.partialorder %v9876_v29, 0.0 }
 0x21a   :  { %339 = vperm.xlu1 %4641, %v6027_v39   ;;  %351 = vperm.xlu2 %4645, %v6027_v39   ;;  %vm9886_vm15 = vmmov %vm9881_vm13  ;;  %v4009_v33 = vsel %vm6631_vm4, %v5858_v6, 0.0  ;;  %v3456_v11 = vadd.f32 %v3455_v43, %v3324_v30  ;;  %vm9890_vm13 = vnez %v9599_v47  ;;  %vm9891_vm4 = vcmp.gt.f32.partialorder %v5460_v17, 0.5  ;;  %v9919_v17 = vld [vmem:[#allocation30_spill] sm:$0xff] }
 0x21b   :  { %v2081_v19 = vunpack.c.l.b16 %v1808_v4  ;;  %vm6646_vm5 = vmand %vm3785_vm14, %vm9886_vm15  ;;  %v6665_v4 = vpop.permute.xlu0 %679  ;;  %v3388_v43 = vsel %vm6637_vm9, %v5624_v56, 0.0  ;;  %vm1074_vm9 = vcmp.eq.f32.partialorder %v6578_v1, %v6657_v25 }
 0x21c   :  { %v6641_v22 = vpop.permute.xlu1 %279  ;;  %v2380_v35 = vpop.f32.mrf.mxu0  ;;  %v3540_v13 = vadd.f32 %v6526_v50, %v3388_v43 }
 0x21d   :  { %vm944_vm1 = vcmp.lt.f32.partialorder %v6578_v1, %v6641_v22  ;;  %vm1072_vm12 = vcmp.eq.f32.partialorder %v6578_v1, %v6641_v22  ;;  %v2161_v42 = vpack.c.b16 %v2082_v52, %v2081_v19  ;;  %vm3037_vm6 = vcmp.eq.f32.partialorder %v2380_v35, %v5294_v55  ;;  %v2709_v31 = vpop.f32.mrf.mxu1 }
 0x21e   :  { %vm1232_vm11 = vmand %vm1072_vm12, %vm9889_vm7  ;;  %vm3722_vm8 = vcmp.eq.f32.partialorder %v2709_v31, %v5299_v60  ;;  %v4141_v52 = vadd.f32 %v4140_v44, %v4009_v33  ;;  %v9892_v44 = vld [vmem:[#allocation31_spill] sm:$0xff]  ;;  %v4073_v35 = vsel %vm6646_vm5, %v5624_v56, 0.0 }
 0x21f   :  { %vm1360_vm14 = vmor %vm944_vm1, %vm1232_vm11  ;;  %vm1138_vm1 = vcmp.eq.f32.partialorder %v6508_v45, %v6665_v4 }
 0x220   :  { %vm3197_vm15 = vmand %vm3037_vm6, %vm9890_vm13  ;;  %v4365_v6 = vsel %vm1360_vm14, 1.0, %v9555_v10 }
 0x221   :  { %2569 = vmatmul.bf16.gmra.mxu2 %v2161_v42  ;;  %2898 = vmatmul.bf16.gmra.mxu3 %v2161_v42  ;;  %v3325_v0 = vsel %vm3197_vm15, %v5818_v63, 0.0  ;;  %vm3882_vm12 = vmand %vm3722_vm8, %vm9891_vm4  ;;  %v1744_v19 = vpack.c.bf16 %v4365_v6, %v4365_v6  ;;  %v2018_v6 = vunpack.c.l.b16 %v1745_v46  ;;  %vm1010_vm8 = vcmp.lt.f32.partialorder %v6508_v45, %v6665_v4  ;;  %v6704_v46 = vpop.permute.xlu2 %691 }
 0x222   :  { %v6679_v28 = vadd.f32 %v3456_v11, %v3325_v0  ;;  %v4010_v30 = vsel %vm3882_vm12, %v5818_v63, 0.0  ;;  %4644 = vset.pattern.permute.xlu1 %v4973_v26  ;;  %4646 = vset.pattern.permute.xlu2 %v9892_v44  ;;  %v9893_v11 = vld [vmem:[#allocation32_spill] sm:$0xff]  ;;  %9897 = vst [vmem:[#allocation25_spill] sm:$0xff] %v6704_v46  ;;  %v9898_v0 = vld [vmem:[#allocation79_spill] sm:$0xff]  ;;  %vm9899_vm15 = vmmov %vm9891_vm4  ;;  %vm946_vm12 = vcmp.lt.f32.partialorder %v6578_v1, %v6657_v25 }
 0x223   :  { %v6687_v42 = vadd.f32 %v4141_v52, %v4010_v30  ;;  %v2017_v31 = vunpack.c.l.b16 %v1744_v19  ;;  %vm9894_vm11 = vcmp.gt.f32.partialorder %v9893_v11, 0.0  ;;  %v4225_v52 = vadd.f32 %v6531_v37, %v4073_v35  ;;  %v6710_v30 = vpop.permute.xlu0 %697 }
 0x224   :  { %v2540_v33 = vpop.f32.mrf.mxu2  ;;  %v2869_v51 = vpop.f32.mrf.mxu3  ;;  %vm6694_vm6 = vmand %vm1138_vm1, %vm9894_vm11  ;;  %vm1012_vm10 = vcmp.lt.f32.partialorder %v6508_v45, %v6704_v46 }
 0x225   :  { %vm3101_vm7 = vcmp.eq.f32.partialorder %v2540_v33, %v5294_v55  ;;  %vm3786_vm14 = vcmp.eq.f32.partialorder %v2869_v51, %v5299_v60  ;;  %v2129_v56 = vpack.c.b16 %v2018_v6, %v2017_v31  ;;  %vm9900_vm1 = vmmov %vm9894_vm11  ;;  %v2382_v33 = vpop.f32.mrf.mxu0  ;;  %v9903_v51 = vld [vmem:[#allocation33_spill] sm:$0xff] }
 0x226   :  { %vm3261_vm5 = vmand %vm3101_vm7, %vm9890_vm13 }
 0x227   :  { %v3389_v19 = vsel %vm3261_vm5, %v9898_v0, 0.0  ;;  %vm3946_vm4 = vmand %vm3786_vm14, %vm9899_vm15  ;;  %2409 = vmatmul.bf16.gmra.mxu0 %v2129_v56  ;;  %2738 = vmatmul.bf16.gmra.mxu1 %v2129_v56  ;;  %vm1140_vm5 = vcmp.eq.f32.partialorder %v6508_v45, %v6704_v46  ;;  %vm1141_vm14 = vcmp.eq.f32.partialorder %v6508_v45, %v6710_v30 }
 0x228   :  { %v3541_v50 = vadd.f32 %v3540_v13, %v3389_v19  ;;  %v4074_v43 = vsel %vm3946_vm4, %v9898_v0, 0.0  ;;  %vm1234_vm7 = vmand %vm1074_vm9, %vm9900_vm1  ;;  %vm9904_vm9 = vcmp.gt.f32.partialorder %v9903_v51, 0.0  ;;  %vm9908_vm4 = vcmp.gt.f32.partialorder %v5006_v40, 0.0  ;;  %v9911_v0 = vld [vmem:[#allocation69_spill] sm:$0xff] }
 0x229   :  { %v4226_v37 = vadd.f32 %v4225_v52, %v4074_v43  ;;  %vm1426_vm11 = vmor %vm1010_vm8, %vm6694_vm6  ;;  %v9909_v52 = vmov 0  ;;  %vm9912_vm1 = vnez %v9911_v0  ;;  %v9915_v43 = vld [vmem:[#allocation68_spill] sm:$0xff] }
 0x22a   :  { %745 = vperm.xlu1 %4644, %v5849_v5   ;;  %vm6727_vm15 = vmor %vm946_vm12, %vm1234_vm7  ;;  %751 = vperm.xlu2 %4646, %v5849_v5   ;;  %v4431_v6 = vsel %vm1426_vm11, 1.0, %v9555_v10  ;;  %v2711_v5 = vpop.f32.mrf.mxu1 }
 0x22b   :  { %vm6735_vm6 = vmand %vm1140_vm5, %vm9904_vm9  ;;  %v1810_v11 = vpack.c.bf16 %v4431_v6, %v4431_v6  ;;  %vm3723_vm2 = vcmp.eq.f32.partialorder %v2711_v5, %v5299_v60  ;;  %v4367_v6 = vsel %vm6727_vm15, 1.0, %v9555_v10 }
 0x22c   :  { %v2542_v31 = vpop.f32.mrf.mxu2  ;;  %v2871_v13 = vpop.f32.mrf.mxu3  ;;  %vm6744_vm12 = vmand %vm1141_vm14, %vm9908_vm4  ;;  %vm3038_vm14 = vcmp.eq.f32.partialorder %v2382_v33, %v5294_v55  ;;  %vm9916_vm4 = vcmp.gt.f32.partialorder %v9915_v43, 0.5 }
 0x22d   :  { %vm3102_vm8 = vcmp.eq.f32.partialorder %v2542_v31, %v5294_v55  ;;  %v6740_v56 = vpop.permute.xlu1 %685  ;;  %v9910_v52 = vsel %vm6744_vm12, 4294967295, %v9909_v52  ;;  %vm3787_vm11 = vcmp.eq.f32.partialorder %v2871_v13, %v5299_v60  ;;  %vm6773_vm12 = vmand %vm3038_vm14, %vm9912_vm1  ;;  %v2083_v46 = vunpack.c.l.b16 %v1810_v11 }
 0x22e   :  { %9907 = vst [vmem:[#allocation29_spill] sm:$0xff] %v6740_v56  ;;  %vm6750_vm7 = vmand %vm3102_vm8, %vm9912_vm1  ;;  %vm1011_vm5 = vcmp.lt.f32.partialorder %v6508_v45, %v6740_v56  ;;  %vm1139_vm9 = vcmp.eq.f32.partialorder %v6508_v45, %v6740_v56  ;;  %vm9920_vm8 = vcmp.gt.f32.partialorder %v9919_v17, 0.0  ;;  %v9928_v56 = vld [vmem:[#allocation82_spill] sm:$0xff]  ;;  %vm9933_vm14 = vcmp.gt.f32.partialorder %v5567_v12, 0.5 }
 0x22f   :  { %vm6762_vm13 = vmand %vm3787_vm11, %vm9916_vm4  ;;  %vm1013_vm11 = vcmp.lt.f32.partialorder %v6508_v45, %v6710_v30  ;;  %v3390_v5 = vsel %vm6750_vm7, %v5997_v24, 0.0  ;;  %v3326_v63 = vsel %vm6773_vm12, %v9928_v56, 0.0 }
 0x230   :  { %vm1299_vm0 = vmand %vm1139_vm9, %vm9920_vm8  ;;  %v4075_v19 = vsel %vm6762_vm13, %v5997_v24, 0.0  ;;  %v1746_v24 = vpack.c.bf16 %v4367_v6, %v4367_v6  ;;  %v3542_v62 = vadd.f32 %v3541_v50, %v3390_v5  ;;  %vm9932_vm13 = vnez %v9619_v21  ;;  %v6829_v6 = vpop.permute.xlu2 %309 }
 0x231   :  { %vm1427_vm3 = vmor %vm1011_vm5, %vm1299_vm0  ;;  %9934 = vst [vmem:[#allocation71_spill] sm:$0xff] %v6829_v6 }
 0x232   :  { %v4432_v13 = vsel %vm1427_vm3, 1.0, %v9555_v10  ;;  %357 = vperm.xlu1 %4644, %v6027_v39   ;;  %vm6789_vm0 = vmor %vm1012_vm10, %vm6735_vm6  ;;  %4649 = vset.pattern.permute.xlu2 %v5030_v48 }
 0x233   :  { %v1811_v0 = vpack.c.bf16 %v4432_v13, %v4432_v13  ;;  %vm9925_vm3 = vmmov %vm9916_vm4 }
 0x234   :  { %vm6796_vm5 = vmand %vm3723_vm2, %vm9925_vm3  ;;  %v2545_v13 = vpop.f32.mrf.mxu2  ;;  %v2385_v11 = vpop.f32.mrf.mxu0  ;;  %vm9929_vm2 = vnez %v9910_v52 }
 0x235   :  { %vm3103_vm10 = vcmp.eq.f32.partialorder %v2545_v13, %v5294_v55  ;;  %v2874_v3 = vpop.f32.mrf.mxu3  ;;  %v6807_v29 = vpop.permute.xlu1 %297  ;;  %v2084_v43 = vunpack.c.l.b16 %v1811_v0  ;;  %vm6814_vm15 = vmor %vm1013_vm11, %vm9929_vm2  ;;  %v4227_v0 = vadd.f32 %v4226_v37, %v4075_v19  ;;  %vm3039_vm8 = vcmp.eq.f32.partialorder %v2385_v11, %v5294_v55 }
 0x236   :  { %vm3263_vm6 = vmand %vm3103_vm10, %vm9932_vm13  ;;  %vm3788_vm12 = vcmp.eq.f32.partialorder %v2874_v3, %v5299_v60  ;;  %vm947_vm7 = vcmp.lt.f32.partialorder %v6578_v1, %v6807_v29  ;;  %vm1075_vm9 = vcmp.eq.f32.partialorder %v6578_v1, %v6807_v29  ;;  %v2714_v52 = vpop.f32.mrf.mxu1  ;;  %v4011_v3 = vsel %vm6796_vm5, %v9928_v56, 0.0 }
 0x237   :  { %v3391_v33 = vsel %vm3263_vm6, %v6076_v61, 0.0  ;;  %vm3948_vm4 = vmand %vm3788_vm12, %vm9933_vm14  ;;  %v2162_v50 = vpack.c.b16 %v2084_v43, %v2083_v46  ;;  %vm9935_vm11 = vcmp.gt.f32.partialorder %v9919_v17, 0.0  ;;  %vm3724_vm10 = vcmp.eq.f32.partialorder %v2714_v52, %v5299_v60 }
 0x238   :  { %v6834_v5 = vadd.f32 %v3542_v62, %v3391_v33  ;;  %v4076_v13 = vsel %vm3948_vm4, %v6076_v61, 0.0  ;;  %vm1235_vm3 = vmand %vm1075_vm9, %vm9935_vm11  ;;  %v4433_v62 = vsel %vm6789_vm0, 1.0, %v9555_v10  ;;  %v3458_v46 = vadd.f32 %v6679_v28, %v3326_v63 }
 0x239   :  { %v6840_v37 = vadd.f32 %v4227_v0, %v4076_v13  ;;  %vm1363_vm2 = vmor %vm947_vm7, %vm1235_vm3  ;;  %2574 = vmatmul.bf16.gmra.mxu2 %v2162_v50  ;;  %2903 = vmatmul.bf16.gmra.mxu3 %v2162_v50  ;;  %vm1077_vm6 = vcmp.eq.f32.partialorder %v6578_v1, %v6829_v6  ;;  %v4434_v56 = vsel %vm6814_vm15, 1.0, %v9555_v10  ;;  %v4143_v43 = vadd.f32 %v6687_v42, %v4011_v3 }
 0x23a   :  { %vm3199_vm5 = vmand %vm3039_vm8, %vm9932_vm13  ;;  %v4368_v61 = vsel %vm1363_vm2, 1.0, %v9555_v10  ;;  %4648 = vset.pattern.permute.xlu1 %v9892_v44  ;;  %369 = vperm.xlu2 %4649, %v6027_v39   ;;  %v6864_v28 = vperm.slane %v6472_v16, 3  ;;  %v2019_v63 = vunpack.c.l.b16 %v1746_v24  ;;  %v1812_v31 = vpack.c.bf16 %v4433_v62, %v4433_v62 }
 0x23b   :  { %v3327_v35 = vsel %vm3199_vm5, %v6104_v38, 0.0  ;;  %vm9936_vm0 = vmmov %vm9933_vm14  ;;  %v1747_v47 = vpack.c.bf16 %v4368_v61, %v4368_v61  ;;  %vm949_vm15 = vcmp.lt.f32.partialorder %v6578_v1, %v6829_v6  ;;  %vm9937_vm7 = vcmp.gt.f32.partialorder %v5006_v40, 0.0  ;;  %v9938_v61 = vld [vmem:[#allocation18_spill] sm:$0xff] }
 0x23c   :  { %vm3884_vm12 = vmand %vm3724_vm10, %vm9936_vm0  ;;  %v6866_v19 = vadd.f32 %v3458_v46, %v3327_v35  ;;  %v1813_v0 = vpack.c.bf16 %v4434_v56, %v4434_v56  ;;  %376 = vperm.xlu0 %4652, %v6864_v28   ;;  %v2547_v33 = vpop.f32.mrf.mxu2  ;;  %v2387_v24 = vpop.f32.mrf.mxu0  ;;  %v2085_v3 = vunpack.c.l.b16 %v1812_v31  ;;  %vm9939_vm3 = vnez %v9625_v54  ;;  %v9953_v56 = vld [vmem:[#allocation42_spill] sm:$0xff] }
 0x23d   :  { %v4012_v11 = vsel %vm3884_vm12, %v6104_v38, 0.0  ;;  %v2020_v52 = vunpack.c.l.b16 %v1747_v47  ;;  %vm1237_vm9 = vmand %vm1077_vm6, %vm9937_vm7  ;;  %v2876_v50 = vpop.f32.mrf.mxu3  ;;  %vm3104_vm4 = vcmp.eq.f32.partialorder %v2547_v33, %v5294_v55  ;;  %vm3040_vm11 = vcmp.eq.f32.partialorder %v2387_v24, %v5294_v55 }
 0x23e   :  { %v6869_v42 = vadd.f32 %v4143_v43, %v4012_v11  ;;  %vm1365_vm14 = vmor %vm949_vm15, %vm1237_vm9  ;;  %v2086_v13 = vunpack.c.l.b16 %v1813_v0  ;;  %vm3789_vm8 = vcmp.eq.f32.partialorder %v2876_v50, %v5299_v60  ;;  %v2716_v62 = vpop.f32.mrf.mxu1  ;;  %vm9942_vm2 = vcmp.gt.f32.partialorder %v5606_v58, 0.5  ;;  %v9945_v11 = vld [vmem:[#allocation20_spill] sm:$0xff] }
 0x23f   :  { %v2130_v38 = vpack.c.b16 %v2020_v52, %v2019_v63  ;;  %v4370_v46 = vsel %vm1365_vm14, 1.0, %v9555_v10  ;;  %vm6887_vm10 = vmand %vm3104_vm4, %vm9939_vm3  ;;  %vm3725_vm0 = vcmp.eq.f32.partialorder %v2716_v62, %v5299_v60  ;;  %vm9948_vm7 = vcmp.gt.f32.partialorder %v9903_v51, 0.0  ;;  %v9949_v52 = vld [vmem:[#allocation41_spill] sm:$0xff]  ;;  %v9958_v63 = vld [vmem:[#allocation76_spill] sm:$0xff] }
 0x240   :  { %vm6893_vm5 = vmand %vm3789_vm8, %vm9942_vm2  ;;  %v2163_v47 = vpack.c.b16 %v2086_v13, %v2085_v3  ;;  %v1749_v31 = vpack.c.bf16 %v4370_v46, %v4370_v46  ;;  %v3392_v0 = vsel %vm6887_vm10, %v9949_v52, 0.0  ;;  %v9961_v51 = vld [vmem:[#allocation75_spill] sm:$0xff] }
 0x241   :  { %2414 = vmatmul.bf16.gmra.mxu0 %v2130_v38  ;;  %2743 = vmatmul.bf16.gmra.mxu1 %v2130_v38  ;;  %vm6904_vm6 = vmand %vm3040_vm11, %vm9939_vm3  ;;  %v6928_v38 = vperm.slane %v6472_v16, 7  ;;  %v4077_v24 = vsel %vm6893_vm5, %v9949_v52, 0.0  ;;  %v9954_v16 = vld [vmem:[#allocation34_spill] sm:$0xff] }
 0x242   :  { %363 = vperm.xlu1 %4648, %v6027_v39   ;;  %4651 = vset.pattern.permute.xlu2 %v9938_v61  ;;  %v6899_v39 = vpop.permute.xlu2 %709  ;;  %vm9950_vm8 = vmmov %vm9942_vm2  ;;  %v2022_v46 = vunpack.c.l.b16 %v1749_v31  ;;  %v3328_v58 = vsel %vm6904_vm6, %v9953_v56, 0.0  ;;  %vm9959_vm6 = vnez %v9958_v63  ;;  %v9989_v63 = vld [vmem:[#allocation80_spill] sm:$0xff] }
 0x243   :  { %vm1143_vm4 = vcmp.eq.f32.partialorder %v6508_v45, %v6899_v39  ;;  %vm6922_vm11 = vmand %vm3725_vm0, %vm9950_vm8  ;;  %vm9955_vm0 = vcmp.gt.f32.partialorder %v9954_v16, 0.0 }
 0x244   :  { %v6897_v35 = vpop.permute.xlu1 %303  ;;  %4656 = vset.pattern.permute.xlu0 %v9945_v11  ;;  %vm6944_vm5 = vmand %vm1143_vm4, %vm9955_vm0 }
 0x245   :  { %vm948_vm12 = vcmp.lt.f32.partialorder %v6578_v1, %v6897_v35  ;;  %vm1076_vm15 = vcmp.eq.f32.partialorder %v6578_v1, %v6897_v35 }
 0x246   :  { %vm1236_vm9 = vmand %vm1076_vm15, %vm9948_vm7  ;;  %vm1015_vm15 = vcmp.lt.f32.partialorder %v6508_v45, %v6899_v39  ;;  %vm9962_vm7 = vcmp.gt.f32.partialorder %v9961_v51, 0.5 }
 0x247   :  { %vm1364_vm14 = vmor %vm948_vm12, %vm1236_vm9 }
 0x248   :  { %v4369_v50 = vsel %vm1364_vm14, 1.0, %v9555_v10 }
 0x249   :  { %2579 = vmatmul.bf16.gmra.mxu2 %v2163_v47  ;;  %2908 = vmatmul.bf16.gmra.mxu3 %v2163_v47  ;;  %v1748_v62 = vpack.c.bf16 %v4369_v50, %v4369_v50  ;;  %v3544_v47 = vadd.f32 %v6834_v5, %v3392_v0  ;;  %v3460_v5 = vadd.f32 %v6866_v19, %v3328_v58 }
 0x24a   :  { %v2550_v3 = vpop.f32.mrf.mxu2  ;;  %v2879_v13 = vpop.f32.mrf.mxu3  ;;  %4650 = vset.pattern.permute.xlu1 %v9719_v23  ;;  %770 = vperm.xlu2 %4651, %v6928_v38   ;;  %v4013_v23 = vsel %vm6922_vm11, %v9953_v56, 0.0  ;;  %v9963_v56 = vld [vmem:[#allocation43_spill] sm:$0xff]  ;;  %vm9964_vm11 = vmmov %vm9962_vm7 }
 0x24b   :  { %vm3105_vm10 = vcmp.eq.f32.partialorder %v2550_v3, %v5294_v55  ;;  %vm3790_vm2 = vcmp.eq.f32.partialorder %v2879_v13, %v5299_v60  ;;  %v2021_v50 = vunpack.c.l.b16 %v1748_v62  ;;  %v4229_v3 = vadd.f32 %v6840_v37, %v4077_v24  ;;  %v9960_v13 = vld [vmem:[#allocation15_spill] sm:$0xff] }
 0x24c   :  { %vm3265_vm12 = vmand %vm3105_vm10, %vm9959_vm6  ;;  %v2390_v31 = vpop.f32.mrf.mxu0  ;;  %v2719_v52 = vpop.f32.mrf.mxu1  ;;  %394 = vperm.xlu0 %4656, %v6864_v28   ;;  %v4145_v24 = vadd.f32 %v6869_v42, %v4013_v23  ;;  %v9965_v42 = vld [vmem:[#allocation17_spill] sm:$0xff] }
 0x24d   :  { %v3393_v54 = vsel %vm3265_vm12, %v9960_v13, 0.0  ;;  %vm3950_vm9 = vmand %vm3790_vm2, %vm9962_vm7  ;;  %vm3041_vm14 = vcmp.eq.f32.partialorder %v2390_v31, %v5294_v55  ;;  %vm3726_vm4 = vcmp.eq.f32.partialorder %v2719_v52, %v5299_v60  ;;  %v2131_v37 = vpack.c.b16 %v2022_v46, %v2021_v50  ;;  %v9966_v46 = vld [vmem:[#allocation78_spill] sm:$0xff]  ;;  %v9970_v50 = vld [vmem:[#allocation77_spill] sm:$0xff] }
 0x24e   :  { %v3545_v0 = vadd.f32 %v3544_v47, %v3393_v54  ;;  %v4078_v33 = vsel %vm3950_vm9, %v9960_v13, 0.0  ;;  %vm3201_vm8 = vmand %vm3041_vm14, %vm9959_vm6  ;;  %vm9967_vm7 = vnez %v9966_v46  ;;  %vm9979_vm6 = vcmp.gt.f32.partialorder %v9970_v50, 0.5 }
 0x24f   :  { %v4230_v62 = vadd.f32 %v4229_v3, %v4078_v33  ;;  %v3329_v6 = vsel %vm3201_vm8, %v9963_v56, 0.0  ;;  %vm3886_vm10 = vmand %vm3726_vm4, %vm9964_vm11 }
 0x250   :  { %v3461_v31 = vadd.f32 %v3460_v5, %v3329_v6  ;;  %v4014_v52 = vsel %vm3886_vm10, %v9963_v56, 0.0  ;;  %vm1431_vm2 = vmor %vm1015_vm15, %vm6944_vm5  ;;  %vm9971_vm5 = vcmp.gt.f32.partialorder %v9970_v50, 0.5  ;;  %v6998_v5 = vpop.permute.xlu0 %315  ;;  %v9978_v56 = vld [vmem:[#allocation49_spill] sm:$0xff] }
 0x251   :  { %v4146_v58 = vadd.f32 %v4145_v24, %v4014_v52  ;;  %2419 = vmatmul.bf16.gmra.mxu0 %v2131_v37  ;;  %2748 = vmatmul.bf16.gmra.mxu1 %v2131_v37  ;;  %v4436_v6 = vsel %vm1431_vm2, 1.0, %v9555_v10  ;;  %v9976_v24 = vld [vmem:[#allocation35_spill] sm:$0xff] }
 0x252   :  { %v2552_v54 = vpop.f32.mrf.mxu2  ;;  %v2881_v19 = vpop.f32.mrf.mxu3  ;;  %764 = vperm.xlu1 %4650, %v6928_v38   ;;  %4654 = vset.pattern.permute.xlu2 %v9965_v42  ;;  %v1815_v37 = vpack.c.bf16 %v4436_v6, %v4436_v6  ;;  %vm9977_vm2 = vcmp.gt.f32.partialorder %v9976_v24, 0.0 }
 0x253   :  { %vm3106_vm0 = vcmp.eq.f32.partialorder %v2552_v54, %v5294_v55  ;;  %vm3791_vm12 = vcmp.eq.f32.partialorder %v2881_v19, %v5299_v60  ;;  %v7026_v6 = vpop.permute.xlu2 %715 }
 0x254   :  { %vm6985_vm9 = vmand %vm3106_vm0, %vm9967_vm7  ;;  %v2392_v47 = vpop.f32.mrf.mxu0  ;;  %v2721_v23 = vpop.f32.mrf.mxu1  ;;  %4659 = vset.pattern.permute.xlu0 %v9722_v49  ;;  %9982 = vst [vmem:[#allocation74_spill] sm:$0xff] %v7026_v6  ;;  %v2088_v51 = vunpack.c.l.b16 %v1815_v37  ;;  %v9986_v37 = vld [vmem:[#allocation81_spill] sm:$0xff] }
 0x255   :  { %vm6991_vm15 = vmand %vm3791_vm12, %vm9971_vm5  ;;  %v6995_v13 = vpop.permute.xlu1 %703  ;;  %vm3042_vm14 = vcmp.eq.f32.partialorder %v2392_v47, %v5294_v55  ;;  %vm3727_vm10 = vcmp.eq.f32.partialorder %v2721_v23, %v5299_v60  ;;  %vm1078_vm5 = vcmp.eq.f32.partialorder %v6578_v1, %v6998_v5  ;;  %v3394_v52 = vsel %vm6985_vm9, %v9978_v56, 0.0 }
 0x256   :  { %vm1014_vm4 = vcmp.lt.f32.partialorder %v6508_v45, %v6995_v13  ;;  %vm1142_vm8 = vcmp.eq.f32.partialorder %v6508_v45, %v6995_v13  ;;  %vm7007_vm11 = vmand %vm3042_vm14, %vm9967_vm7  ;;  %v4079_v42 = vsel %vm6991_vm15, %v9978_v56, 0.0  ;;  %v3546_v3 = vadd.f32 %v3545_v0, %v3394_v52 }
 0x257   :  { %vm1302_vm0 = vmand %vm1142_vm8, %vm9977_vm2  ;;  %v3330_v43 = vsel %vm7007_vm11, %v6239_v7, 0.0  ;;  %vm9987_vm15 = vnez %v9986_v37 }
 0x258   :  { %vm1430_vm12 = vmor %vm1014_vm4, %vm1302_vm0 }
 0x259   :  { %vm7021_vm14 = vmand %vm3727_vm10, %vm9979_vm6  ;;  %v4435_v19 = vsel %vm1430_vm12, 1.0, %v9555_v10  ;;  %vm950_vm10 = vcmp.lt.f32.partialorder %v6578_v1, %v6998_v5 }
 0x25a   :  { %v2555_v47 = vpop.f32.mrf.mxu2  ;;  %v2884_v23 = vpop.f32.mrf.mxu3  ;;  %v1814_v46 = vpack.c.bf16 %v4435_v19, %v4435_v19  ;;  %4653 = vset.pattern.permute.xlu1 %v9938_v61  ;;  %vm9983_vm4 = vmmov %vm9977_vm2  ;;  %776 = vperm.xlu2 %4654, %v6928_v38   ;;  %v4015_v33 = vsel %vm7021_vm14, %v6239_v7, 0.0  ;;  %vm9990_vm2 = vcmp.gt.f32.partialorder %v9989_v63, 0.5  ;;  %v3462_v7 = vadd.f32 %v3461_v31, %v3330_v43 }
 0x25b   :  { %vm3107_vm6 = vcmp.eq.f32.partialorder %v2555_v47, %v5294_v55  ;;  %vm3792_vm9 = vcmp.eq.f32.partialorder %v2884_v23, %v5299_v60  ;;  %vm7039_vm8 = vmand %vm1078_vm5, %vm9983_vm4  ;;  %v4231_v47 = vadd.f32 %v4230_v62, %v4079_v42  ;;  %v9988_v23 = vld [vmem:[#allocation23_spill] sm:$0xff]  ;;  %v4147_v52 = vadd.f32 %v4146_v58, %v4015_v33  ;;  %v7078_v58 = vpop.permute.xlu2 %327  ;;  %v7082_v43 = vpop.permute.xlu0 %333 }
 0x25c   :  { %vm3267_vm11 = vmand %vm3107_vm6, %vm9987_vm15  ;;  %v2395_v61 = vpop.f32.mrf.mxu0  ;;  %v2724_v56 = vpop.f32.mrf.mxu1  ;;  %v2087_v19 = vunpack.c.l.b16 %v1814_v46  ;;  %800 = vperm.xlu0 %4659, %v6928_v38   ;;  %9992 = vst [vmem:[#allocation31_spill] sm:$0xff] %v7082_v43 }
 0x25d   :  { %v3395_v24 = vsel %vm3267_vm11, %v9988_v23, 0.0  ;;  %vm3952_vm0 = vmand %vm3792_vm9, %vm9990_vm2  ;;  %vm3043_vm12 = vcmp.eq.f32.partialorder %v2395_v61, %v5294_v55  ;;  %vm3728_vm5 = vcmp.eq.f32.partialorder %v2724_v56, %v5299_v60  ;;  %v9994_v56 = vld [vmem:[#allocation36_spill] sm:$0xff] }
 0x25e   :  { %v7057_v0 = vadd.f32 %v3546_v3, %v3395_v24  ;;  %v4080_v46 = vsel %vm3952_vm0, %v9988_v23, 0.0  ;;  %vm3203_vm14 = vmand %vm3043_vm12, %vm9987_vm15  ;;  %v2164_v62 = vpack.c.b16 %v2088_v51, %v2087_v19  ;;  %vm1081_vm12 = vcmp.eq.f32.partialorder %v6578_v1, %v7082_v43 }
 0x25f   :  { %v7062_v54 = vadd.f32 %v4231_v47, %v4080_v46  ;;  %v3331_v42 = vsel %vm3203_vm14, %v6312_v53, 0.0  ;;  %vm9991_vm6 = vmmov %vm9990_vm2  ;;  %vm9993_vm2 = vcmp.gt.f32.partialorder %v9954_v16, 0.0  ;;  %v10000_v46 = vld [vmem:[#allocation19_spill] sm:$0xff] }
 0x260   :  { %vm3888_vm9 = vmand %vm3728_vm5, %vm9991_vm6  ;;  %v7067_v61 = vadd.f32 %v3462_v7, %v3331_v42  ;;  %2584 = vmatmul.bf16.gmra.mxu2 %v2164_v62  ;;  %2913 = vmatmul.bf16.gmra.mxu3 %v2164_v62  ;;  %vm1144_vm5 = vcmp.eq.f32.partialorder %v6508_v45, %v7026_v6  ;;  %vm952_vm6 = vcmp.lt.f32.partialorder %v6578_v1, %v7078_v58 }
 0x261   :  { %v4016_v31 = vsel %vm3888_vm9, %v6312_v53, 0.0  ;;  %vm1366_vm4 = vmor %vm950_vm10, %vm7039_vm8  ;;  %vm1080_vm10 = vcmp.eq.f32.partialorder %v6578_v1, %v7078_v58  ;;  %vm9995_vm9 = vcmp.gt.f32.partialorder %v9994_v56, 0.0 }
 0x262   :  { %v7075_v51 = vadd.f32 %v4147_v52, %v4016_v31  ;;  %382 = vperm.xlu1 %4653, %v6864_v28   ;;  %v4371_v24 = vsel %vm1366_vm4, 1.0, %v9555_v10  ;;  %388 = vperm.xlu2 %4654, %v6864_v28   ;;  %v2557_v3 = vpop.f32.mrf.mxu2  ;;  %v2886_v33 = vpop.f32.mrf.mxu3  ;;  %vm1240_vm4 = vmand %vm1080_vm10, %vm9995_vm9  ;;  %v10001_v52 = vld [vmem:[#allocation83_spill] sm:$0xff] }
 0x263   :  { %v1750_v50 = vpack.c.bf16 %v4371_v24, %v4371_v24  ;;  %vm3108_vm7 = vcmp.eq.f32.partialorder %v2557_v3, %v5294_v55  ;;  %vm3793_vm10 = vcmp.eq.f32.partialorder %v2886_v33, %v5299_v60  ;;  %v10009_v3 = vld [vmem:[#allocation46_spill] sm:$0xff] }
 0x264   :  { %v7084_v53 = vpop.permute.xlu1 %321  ;;  %4663 = vset.pattern.permute.xlu0 %v9743_v8 }
 0x265   :  { %vm951_vm11 = vcmp.lt.f32.partialorder %v6578_v1, %v7084_v53  ;;  %vm1079_vm8 = vcmp.eq.f32.partialorder %v6578_v1, %v7084_v53  ;;  %v2023_v23 = vunpack.c.l.b16 %v1750_v50  ;;  %v2397_v50 = vpop.f32.mrf.mxu0 }
 0x266   :  { %vm1239_vm0 = vmand %vm1079_vm8, %vm9993_vm2  ;;  %vm953_vm8 = vcmp.lt.f32.partialorder %v6578_v1, %v7082_v43  ;;  %vm9996_vm2 = vcmp.gt.f32.partialorder %v9775_v57, 0.0 }
 0x267   :  { %vm1367_vm14 = vmor %vm951_vm11, %vm1239_vm0 }
 0x268   :  { %v4372_v19 = vsel %vm1367_vm14, 1.0, %v9555_v10  ;;  %vm1241_vm15 = vmand %vm1081_vm12, %vm9996_vm2  ;;  %vm10002_vm12 = vnez %v10001_v52 }
 0x269   :  { %v1751_v47 = vpack.c.bf16 %v4372_v19, %v4372_v19  ;;  %vm9997_vm11 = vmmov %vm9995_vm9 }
 0x26a   :  { %vm7111_vm0 = vmand %vm1144_vm5, %vm9997_vm11  ;;  %4655 = vset.pattern.permute.xlu1 %v9945_v11  ;;  %4658 = vset.pattern.permute.xlu2 %v10000_v46  ;;  %vm1016_vm5 = vcmp.lt.f32.partialorder %v6508_v45, %v7026_v6  ;;  %v10005_v11 = vld [vmem:[#allocation84_spill] sm:$0xff] }
 0x26b   :  { %vm1368_vm14 = vmor %vm952_vm6, %vm1240_vm4  ;;  %v2024_v62 = vunpack.c.l.b16 %v1751_v47  ;;  %vm10006_vm11 = vcmp.gt.f32.partialorder %v10005_v11, 0.5 }
 0x26c   :  { %vm1369_vm9 = vmor %vm953_vm8, %vm1241_vm15  ;;  %818 = vperm.xlu0 %4663, %v6928_v38   ;;  %v4373_v19 = vsel %vm1368_vm14, 1.0, %v9555_v10  ;;  %vm3044_vm15 = vcmp.eq.f32.partialorder %v2397_v50, %v5294_v55  ;;  %v1855_v50 = vld [vmem:[#allocation8 + $0x78] sm:$0xff] }
 0x26d   :  { %vm7121_vm2 = vmand %vm3108_vm7, %vm10002_vm12  ;;  %v2132_v31 = vpack.c.b16 %v2024_v62, %v2023_v23  ;;  %v2726_v23 = vpop.f32.mrf.mxu1  ;;  %v4374_v62 = vsel %vm1369_vm9, 1.0, %v9555_v10  ;;  %v1752_v24 = vpack.c.bf16 %v4373_v19, %v4373_v19  ;;  %v3650_v52 = vrot.slane %v1855_v50, 4 }
 0x26e   :  { %vm7129_vm3 = vmand %vm3793_vm10, %vm10006_vm11  ;;  %v3396_v33 = vsel %vm7121_vm2, %v10009_v3, 0.0  ;;  %vm10018_vm11 = vcmp.gt.f32.partialorder %v9775_v57, 0.0 }
 0x26f   :  { %2424 = vmatmul.bf16.gmra.mxu0 %v2132_v31  ;;  %2753 = vmatmul.bf16.gmra.mxu1 %v2132_v31  ;;  %vm1432_vm7 = vmor %vm1016_vm5, %vm7111_vm0  ;;  %v4081_v47 = vsel %vm7129_vm3, %v10009_v3, 0.0  ;;  %v3548_v7 = vadd.f32 %v7057_v0, %v3396_v33  ;;  %v10010_v31 = vld [vmem:[#allocation39_spill] sm:$0xff]  ;;  %vm3729_vm0 = vcmp.eq.f32.partialorder %v2726_v23, %v5299_v60  ;;  %v7159_v0 = vpop.permute.xlu2 %733  ;;  %v1753_v33 = vpack.c.bf16 %v4374_v62, %v4374_v62 }
 0x270   :  { %vm10011_vm4 = vnez %v10010_v31  ;;  %v4437_v3 = vsel %vm1432_vm7, 1.0, %v9555_v10  ;;  %v4233_v63 = vadd.f32 %v7062_v54, %v4081_v47  ;;  %10015 = vst [vmem:[#allocation30_spill] sm:$0xff] %v7159_v0  ;;  %vm7166_vm9 = vmand %vm3044_vm15, %vm10002_vm12 }
 0x272   :  { %v2560_v46 = vpop.f32.mrf.mxu2  ;;  %782 = vperm.xlu1 %4655, %v6928_v38   ;;  %v2889_v42 = vpop.f32.mrf.mxu3  ;;  %794 = vperm.xlu2 %4658, %v6928_v38  }
 0x273   :  { %vm3109_vm6 = vcmp.eq.f32.partialorder %v2560_v46, %v5294_v55  ;;  %vm3794_vm3 = vcmp.eq.f32.partialorder %v2889_v42, %v5299_v60  ;;  %v10012_v46 = vld [vmem:[#allocation85_spill] sm:$0xff]  ;;  %v1816_v42 = vpack.c.bf16 %v4437_v3, %v4437_v3 }
 0x274   :  { %vm3269_vm8 = vmand %vm3109_vm6, %vm10011_vm4  ;;  %vm10013_vm10 = vcmp.gt.f32.partialorder %v10012_v46, 0.5  ;;  %v7157_v16 = vpop.permute.xlu1 %721  ;;  %4668 = vset.pattern.permute.xlu0 %v9862_v36  ;;  %vm10019_vm6 = vcmp.gt.f32.partialorder %v10005_v11, 0.5  ;;  %v10023_v11 = vld [vmem:[#allocation16_spill] sm:$0xff] }
 0x275   :  { %v3397_v37 = vsel %vm3269_vm8, %v6379_v27, 0.0  ;;  %vm3954_vm14 = vmand %vm3794_vm3, %vm10013_vm10  ;;  %10014 = vst [vmem:[#allocation79_spill] sm:$0xff] %v7157_v16  ;;  %vm1017_vm2 = vcmp.lt.f32.partialorder %v6508_v45, %v7157_v16  ;;  %vm1145_vm5 = vcmp.eq.f32.partialorder %v6508_v45, %v7157_v16  ;;  %vm1147_vm3 = vcmp.eq.f32.partialorder %v6508_v45, %v7159_v0  ;;  %v10022_v16 = vld [vmem:[#allocation24_spill] sm:$0xff] }
 0x276   :  { %v7170_v19 = vadd.f32 %v3548_v7, %v3397_v37  ;;  %v4082_v47 = vsel %vm3954_vm14, %v6379_v27, 0.0  ;;  %vm1305_vm7 = vmand %vm1145_vm5, %vm10018_vm11  ;;  %v2026_v7 = vunpack.c.l.b16 %v1753_v33  ;;  %v3332_v3 = vsel %vm7166_vm9, %v10022_v16, 0.0 }
 0x277   :  { %v7177_v62 = vadd.f32 %v4233_v63, %v4082_v47  ;;  %vm1433_vm15 = vmor %vm1017_vm2, %vm1305_vm7  ;;  %v2025_v63 = vunpack.c.l.b16 %v1752_v24  ;;  %v2089_v43 = vunpack.c.l.b16 %v1816_v42  ;;  %v10024_v24 = vld [vmem:[#allocation40_spill] sm:$0xff]  ;;  %v7214_v27 = vunpack.c.l.bf16 %v3650_v52 }
 0x278   :  { %vm7185_vm8 = vmand %vm3729_vm0, %vm10019_vm6  ;;  %v4438_v37 = vsel %vm1433_vm15, 1.0, %v9555_v10  ;;  %vm1019_vm0 = vcmp.lt.f32.partialorder %v6508_v45, %v7159_v0  ;;  %vm10025_vm10 = vcmp.gt.f32.partialorder %v10024_v24, 0.0  ;;  %vm10029_vm11 = vcmp.gt.f32.partialorder %v10012_v46, 0.5 }
 0x279   :  { %v1817_v47 = vpack.c.bf16 %v4438_v37, %v4438_v37  ;;  %v4017_v23 = vsel %vm7185_vm8, %v10022_v16, 0.0  ;;  %vm7204_vm14 = vmand %vm1147_vm3, %vm10025_vm10  ;;  %v2997_v16 = vunpack.c.l.bf16 %v1855_v50  ;;  %v2133_v54 = vpack.c.b16 %v2026_v7, %v2025_v63  ;;  %10028 = vst [vmem:[#allocation82_spill] sm:$0xff] %v7214_v27  ;;  %v10042_v7 = vld [vmem:[#allocation50_spill] sm:$0xff]  ;;  %v10056_v50 = vld [vmem:[#allocation48_spill] sm:$0xff] }
 0x27a   :  { %4657 = vset.pattern.permute.xlu1 %v10023_v11  ;;  %406 = vperm.xlu2 %4658, %v6864_v28   ;;  %v3464_v11 = vadd.f32 %v7067_v61, %v3332_v3  ;;  %v4149_v37 = vadd.f32 %v7075_v51, %v4017_v23  ;;  %vm3032_vm15 = vcmp.eq.f32.partialorder %v6404_v59, %v5294_v55  ;;  %vm1435_vm6 = vmor %vm1019_vm0, %vm7204_vm14  ;;  %v10031_v59 = vmov 0  ;;  %v2891_v33 = vpop.f32.mrf.mxu3 }
 0x27b   :  { %v2090_v6 = vunpack.c.l.b16 %v1817_v47  ;;  %vm3717_vm8 = vcmp.eq.f32.partialorder %v6406_v41, %v5299_v60  ;;  %vm7234_vm3 = vcmp.gt.f32.partialorder %v2997_v16, 0.5  ;;  %vm9418_vm0 = vcmp.gt.f32.partialorder %v7214_v27, 0.5  ;;  %v10046_v16 = vld [vmem:[#allocation38_spill] sm:$0xff] }
 0x27c   :  { %v2400_v57 = vpop.f32.mrf.mxu0  ;;  %v2729_v56 = vpop.f32.mrf.mxu1  ;;  %436 = vperm.xlu0 %4668, %v6864_v28   ;;  %v10032_v59 = vsel %vm7234_vm3, 4294967295, %v10031_v59  ;;  %vm7243_vm14 = vmand %vm3032_vm15, %vm7234_vm3  ;;  %v4440_v41 = vsel %vm1435_vm6, 1.0, %v9555_v10 }
 0x27d   :  { %vm3045_vm9 = vcmp.eq.f32.partialorder %v2400_v57, %v5294_v55  ;;  %vm3730_vm2 = vcmp.eq.f32.partialorder %v2729_v56, %v5299_v60  ;;  %v2165_v42 = vpack.c.b16 %v2090_v6, %v2089_v43  ;;  %v7220_v57 = vpop.permute.xlu2 %345  ;;  %10033 = vst [vmem:[#allocation20_spill] sm:$0xff] %v10032_v59  ;;  %v1819_v23 = vpack.c.bf16 %v4440_v41, %v4440_v41  ;;  %v10052_v41 = vld [vmem:[#allocation45_spill] sm:$0xff] }
 0x27e   :  { %vm3205_vm5 = vmand %vm3045_vm9, %vm10011_vm4  ;;  %10030 = vst [vmem:[#allocation18_spill] sm:$0xff] %v7220_v57  ;;  %vm1083_vm10 = vcmp.eq.f32.partialorder %v6578_v1, %v7220_v57 }
 0x27f   :  { %v3333_v47 = vsel %vm3205_vm5, %v6389_v14, 0.0  ;;  %vm3890_vm7 = vmand %vm3730_vm2, %vm10029_vm11  ;;  %2429 = vmatmul.bf16.gmra.mxu0 %v2133_v54  ;;  %2589 = vmatmul.bf16.gmra.mxu2 %v2165_v42  ;;  %vm10038_vm2 = vcmp.gt.f32.partialorder %v10024_v24, 0.0 }
 0x280   :  { %v3465_v6 = vadd.f32 %v3464_v11, %v3333_v47  ;;  %v4018_v61 = vsel %vm3890_vm7, %v6389_v14, 0.0  ;;  %2758 = vmatmul.bf16.gmra.mxu1 %v2133_v54  ;;  %2918 = vmatmul.bf16.gmra.mxu3 %v2165_v42  ;;  %vm7252_vm9 = vmand %vm3717_vm8, %vm9418_vm0  ;;  %vm955_vm7 = vcmp.lt.f32.partialorder %v6578_v1, %v7220_v57  ;;  %vm10043_vm8 = vnez %v10042_v7  ;;  %v10048_v11 = vld [vmem:[#allocation70_spill] sm:$0xff]  ;;  %v10068_v7 = vld [vmem:[#allocation51_spill] sm:$0xff] }
 0x281   :  { %v7232_v51 = vadd.f32 %v4149_v37, %v4018_v61  ;;  %vm7258_vm5 = vmand %vm1083_vm10, %vm10038_vm2  ;;  %vm10047_vm2 = vcmp.gt.f32.partialorder %v10046_v16, 0.0  ;;  %v3320_v54 = vsel %vm7243_vm14, %v10048_v11, 0.0  ;;  %v4005_v42 = vsel %vm7252_vm9, %v10048_v11, 0.0  ;;  %v10051_v61 = vld [vmem:[#allocation91_spill] sm:$0xff] }
 0x282   :  { %788 = vperm.xlu1 %4657, %v6928_v38   ;;  %4661 = vset.pattern.permute.xlu2 %v9722_v49  ;;  %v2562_v49 = vpop.f32.mrf.mxu2  ;;  %vm7290_vm13 = vmor %vm955_vm7, %vm7258_vm5  ;;  %vm10053_vm14 = vcmp.gt.f32.partialorder %v10052_v41, 0.5  ;;  %v10057_v11 = vld [vmem:[#allocation87_spill] sm:$0xff] }
 0x284   :  { %v2402_v56 = vpop.f32.mrf.mxu0  ;;  %v2731_v52 = vpop.f32.mrf.mxu1  ;;  %4672 = vset.pattern.permute.xlu0 %v4973_v26 }
 0x285   :  { %v7262_v63 = vpop.permute.xlu1 %727  ;;  %vm3046_vm11 = vcmp.eq.f32.partialorder %v2402_v56, %v5294_v55  ;;  %vm3731_vm4 = vcmp.eq.f32.partialorder %v2731_v52, %v5299_v60  ;;  %v2092_v52 = vunpack.c.l.b16 %v1819_v23 }
 0x286   :  { %10041 = vst [vmem:[#allocation41_spill] sm:$0xff] %v7262_v63  ;;  %vm1018_vm15 = vcmp.lt.f32.partialorder %v6508_v45, %v7262_v63  ;;  %vm1146_vm6 = vcmp.eq.f32.partialorder %v6508_v45, %v7262_v63  ;;  %vm7274_vm10 = vmand %vm3046_vm11, %vm10043_vm8  ;;  %vm3110_vm11 = vcmp.eq.f32.partialorder %v2562_v49, %v5294_v55  ;;  %v3447_v49 = vadd.f32 %v10056_v50, %v3320_v54 }
 0x287   :  { %vm1306_vm0 = vmand %vm1146_vm6, %vm10047_vm2  ;;  %v3334_v14 = vsel %vm7274_vm10, %v10051_v61, 0.0  ;;  %v4376_v50 = vsel %vm7290_vm13, 1.0, %v9555_v10 }
 0x288   :  { %vm1434_vm12 = vmor %vm1018_vm15, %vm1306_vm0  ;;  %vm3795_vm0 = vcmp.eq.f32.partialorder %v2891_v33, %v5299_v60  ;;  %v4132_v33 = vadd.f32 %v10057_v11, %v4005_v42 }
 0x289   :  { %v4439_v47 = vsel %vm1434_vm12, 1.0, %v9555_v10  ;;  %vm7301_vm15 = vmand %vm3731_vm4, %vm10053_vm14 }
 0x28a   :  { %v1818_v56 = vpack.c.bf16 %v4439_v47, %v4439_v47  ;;  %400 = vperm.xlu1 %4657, %v6864_v28   ;;  %412 = vperm.xlu2 %4661, %v6864_v28   ;;  %vm7311_vm12 = vmand %vm3110_vm11, %vm10043_vm8  ;;  %v3466_v47 = vadd.f32 %v3465_v6, %v3334_v14  ;;  %v4019_v54 = vsel %vm7301_vm15, %v10051_v61, 0.0  ;;  %v10064_v6 = vld [vmem:[#allocation57_spill] sm:$0xff]  ;;  %v3448_v14 = vrot.slane %v3447_v49, 4 }
 0x28b   :  { %vm10060_vm4 = vmmov %vm10053_vm14  ;;  %vm10065_vm10 = vnez %v10064_v6  ;;  %v4133_v11 = vrot.slane %v4132_v33, 4  ;;  %v4151_v41 = vadd.f32 %v7232_v51, %v4019_v54  ;;  %vm10069_vm15 = vcmp.gt.f32.partialorder %v10068_v7, 0.5  ;;  %v10072_v51 = vld [vmem:[#allocation21_spill] sm:$0xff] }
 0x28c   :  { %v2405_v46 = vpop.f32.mrf.mxu0  ;;  %v2734_v31 = vpop.f32.mrf.mxu1  ;;  %v2091_v24 = vunpack.c.l.b16 %v1818_v56  ;;  %vm7317_vm9 = vmand %vm3795_vm0, %vm10060_vm4  ;;  %454 = vperm.xlu0 %4672, %v6864_v28   ;;  %vm10066_vm0 = vcmp.gt.f32.partialorder %v10046_v16, 0.0  ;;  %v1755_v56 = vpack.c.bf16 %v4376_v50, %v4376_v50  ;;  %v10070_v16 = vld [vmem:[#allocation52_spill] sm:$0xff]  ;;  %v3449_v54 = vadd.f32 %v3448_v14, %v3447_v49 }
 0x28d   :  { %v7324_v42 = vpop.permute.xlu1 %339  ;;  %vm3047_vm5 = vcmp.eq.f32.partialorder %v2405_v46, %v5294_v55  ;;  %vm3732_vm11 = vcmp.eq.f32.partialorder %v2734_v31, %v5299_v60  ;;  %v10067_v46 = vld [vmem:[#allocation92_spill] sm:$0xff]  ;;  %v3398_v57 = vsel %vm7311_vm12, %v10070_v16, 0.0  ;;  %v7350_v50 = vpop.permute.xlu2 %351  ;;  %v4134_v3 = vadd.f32 %v4133_v11, %v4132_v33  ;;  %v10073_v33 = vld [vmem:[#allocation90_spill] sm:$0xff] }
 0x28e   :  { %10063 = vst [vmem:[#allocation42_spill] sm:$0xff] %v7324_v42  ;;  %vm954_vm7 = vcmp.lt.f32.partialorder %v6578_v1, %v7324_v42  ;;  %vm1082_vm6 = vcmp.eq.f32.partialorder %v6578_v1, %v7324_v42  ;;  %vm3207_vm2 = vmand %vm3047_vm5, %vm10065_vm10  ;;  %v2166_v61 = vpack.c.b16 %v2092_v52, %v2091_v24  ;;  %v2028_v63 = vunpack.c.l.b16 %v1755_v56 }
 0x28f   :  { %vm1242_vm14 = vmand %vm1082_vm6, %vm10066_vm0  ;;  %v3335_v37 = vsel %vm3207_vm2, %v10067_v46, 0.0  ;;  %v3450_v14 = vrot.slane %v3449_v54, 2 }
 0x290   :  { %vm1370_vm13 = vmor %vm954_vm7, %vm1242_vm14  ;;  %v3467_v43 = vadd.f32 %v3466_v47, %v3335_v37  ;;  %2594 = vmatmul.bf16.gmra.mxu2 %v2166_v61  ;;  %2923 = vmatmul.bf16.gmra.mxu3 %v2166_v61  ;;  %v10071_v47 = vld [vmem:[#allocation22_spill] sm:$0xff]  ;;  %v7352_v37 = vpop.permute.xlu0 %739  ;;  %v4083_v61 = vsel %vm7317_vm9, %v10070_v16, 0.0 }
 0x291   :  { %vm3892_vm4 = vmand %vm3732_vm11, %vm10069_vm15  ;;  %v4375_v31 = vsel %vm1370_vm13, 1.0, %v9555_v10  ;;  %v4235_v49 = vadd.f32 %v7177_v62, %v4083_v61  ;;  %vm1148_vm0 = vcmp.eq.f32.partialorder %v6508_v45, %v7352_v37  ;;  %vm10078_vm13 = vcmp.gt.f32.partialorder %v7214_v27, 0.5  ;;  %v10079_v61 = vld [vmem:[#allocation44_spill] sm:$0xff] }
 0x292   :  { %v4020_v24 = vsel %vm3892_vm4, %v10067_v46, 0.0  ;;  %v1754_v52 = vpack.c.bf16 %v4375_v31, %v4375_v31  ;;  %4660 = vset.pattern.permute.xlu1 %v10071_v47  ;;  %4662 = vset.pattern.permute.xlu2 %v10072_v51  ;;  %v3550_v47 = vadd.f32 %v7170_v19, %v3398_v57  ;;  %vm10074_vm2 = vmmov %vm10069_vm15  ;;  %vm1020_vm4 = vcmp.lt.f32.partialorder %v6508_v45, %v7352_v37 }
 0x293   :  { %v4152_v0 = vadd.f32 %v4151_v41, %v4020_v24 }
 0x294   :  { %v2565_v46 = vpop.f32.mrf.mxu2  ;;  %v2894_v31 = vpop.f32.mrf.mxu3  ;;  %v2027_v42 = vunpack.c.l.b16 %v1754_v52  ;;  %4675 = vset.pattern.permute.xlu0 %v5030_v48 }
 0x295   :  { %vm3111_vm12 = vcmp.eq.f32.partialorder %v2565_v46, %v5294_v55  ;;  %vm3796_vm5 = vcmp.eq.f32.partialorder %v2894_v31, %v5299_v60  ;;  %v2407_v41 = vpop.f32.mrf.mxu0  ;;  %v2736_v24 = vpop.f32.mrf.mxu1  ;;  %v3451_v31 = vadd.f32 %v3450_v14, %v3449_v54  ;;  %v10084_v14 = vld [vmem:[#allocation47_spill] sm:$0xff] }
 0x296   :  { %vm3271_vm7 = vmand %vm3111_vm12, %vm10065_vm10  ;;  %vm3048_vm9 = vcmp.eq.f32.partialorder %v2407_v41, %v5294_v55  ;;  %vm3733_vm6 = vcmp.eq.f32.partialorder %v2736_v24, %v5299_v60  ;;  %v2134_v16 = vpack.c.b16 %v2028_v63, %v2027_v42  ;;  %v4135_v63 = vrot.slane %v4134_v3, 2  ;;  %v10077_v42 = vld [vmem:[#allocation93_spill] sm:$0xff] }
 0x297   :  { %v3399_v23 = vsel %vm3271_vm7, %v10073_v33, 0.0  ;;  %vm3956_vm11 = vmand %vm3796_vm5, %vm10074_vm2  ;;  %vm10080_vm12 = vcmp.gt.f32.partialorder %v10079_v61, 0.0  ;;  %vm1084_vm7 = vcmp.eq.f32.partialorder %v6578_v1, %v7350_v50 }
 0x298   :  { %v7372_v19 = vadd.f32 %v3550_v47, %v3399_v23  ;;  %v4084_v57 = vsel %vm3956_vm11, %v10073_v33, 0.0  ;;  %vm3208_vm14 = vmand %vm3048_vm9, %vm7234_vm3  ;;  %2434 = vmatmul.bf16.gmra.mxu0 %v2134_v16  ;;  %2763 = vmatmul.bf16.gmra.mxu1 %v2134_v16 }
 0x299   :  { %v7377_v62 = vadd.f32 %v4235_v49, %v4084_v57  ;;  %v3336_v56 = vsel %vm3208_vm14, %v10077_v42, 0.0  ;;  %vm3893_vm15 = vmand %vm3733_vm6, %vm10078_vm13  ;;  %vm956_vm14 = vcmp.lt.f32.partialorder %v6578_v1, %v7350_v50  ;;  %vm10085_vm13 = vcmp.gt.f32.partialorder %v10084_v14, 0.0 }
 0x29a   :  { %10075 = vst [vmem:[#allocation15_spill] sm:$0xff] %v7372_v19  ;;  %v3468_v11 = vadd.f32 %v3467_v43, %v3336_v56  ;;  %v4021_v52 = vsel %vm3893_vm15, %v10077_v42, 0.0  ;;  %vm1308_vm5 = vmand %vm1148_vm0, %vm10080_vm12  ;;  %806 = vperm.xlu1 %4660, %v6928_v38   ;;  %812 = vperm.xlu2 %4662, %v6928_v38   ;;  %v4136_v43 = vadd.f32 %v4135_v63, %v4134_v3  ;;  %v3452_v3 = vrot.slane %v3451_v31, 1  ;;  %v7416_v56 = vpop.permute.xlu0 %757 }
 0x29b   :  { %10076 = vst [vmem:[#allocation43_spill] sm:$0xff] %v7377_v62  ;;  %v4153_v46 = vadd.f32 %v4152_v0, %v4021_v52  ;;  %vm1436_vm9 = vmor %vm1020_vm4, %vm1308_vm5  ;;  %v7401_v0 = vpop.permute.xlu2 %751 }
 0x29c   :  { %v3469_v41 = vrot.slane %v3468_v11, 4  ;;  %v7391_v47 = vpop.f32.mrf.mxu2  ;;  %v7393_v24 = vpop.f32.mrf.mxu3  ;;  %vm10083_vm11 = vmmov %vm10080_vm12  ;;  %v4441_v57 = vsel %vm1436_vm9, 1.0, %v9555_v10  ;;  %v4137_v63 = vrot.slane %v4136_v43, 1  ;;  %vm1150_vm5 = vcmp.eq.f32.partialorder %v6508_v45, %v7401_v0 }
 0x29d   :  { %10081 = vst [vmem:[#allocation17_spill] sm:$0xff] %v7391_v47  ;;  %v4154_v16 = vrot.slane %v4153_v46, 4  ;;  %v7399_v49 = vpop.permute.xlu1 %745  ;;  %vm1244_vm0 = vmand %vm1084_vm7, %vm10083_vm11  ;;  %v3453_v62 = vadd.f32 %v3452_v3, %v3451_v31  ;;  %vm1151_vm7 = vcmp.eq.f32.partialorder %v6508_v45, %v7416_v56 }
 0x29e   :  { %10082 = vst [vmem:[#allocation49_spill] sm:$0xff] %v7393_v24  ;;  %v3470_v33 = vadd.f32 %v3469_v41, %v3468_v11  ;;  %vm1021_vm6 = vcmp.lt.f32.partialorder %v6508_v45, %v7399_v49  ;;  %vm1149_vm2 = vcmp.eq.f32.partialorder %v6508_v45, %v7399_v49  ;;  %vm7419_vm12 = vmor %vm956_vm14, %vm1244_vm0  ;;  %vm3619_vm0 = vcmask 1041409  }
 0x29f   :  { %v4155_v54 = vadd.f32 %v4154_v16, %v4153_v46  ;;  %vm1309_vm15 = vmand %vm1149_vm2, %vm10085_vm13  ;;  %v1820_v16 = vpack.c.bf16 %v4441_v57, %v4441_v57  ;;  %vm1022_vm14 = vcmp.lt.f32.partialorder %v6508_v45, %v7401_v0  ;;  %vm10093_vm13 = vcmp.gt.f32.partialorder %v9834_v34, 0.0 }
 0x2a0   :  { %v3471_v23 = vrot.slane %v3470_v33, 2  ;;  %vm1437_vm4 = vmor %vm1021_vm6, %vm1309_vm15 }
 0x2a1   :  { %v4156_v42 = vrot.slane %v4155_v54, 2  ;;  %v4442_v52 = vsel %vm1437_vm4, 1.0, %v9555_v10  ;;  %v2093_v3 = vunpack.c.l.b16 %v1820_v16  ;;  %vm7457_vm15 = vmand %vm1151_vm7, %vm10093_vm13  ;;  %vm10097_vm4 = vcmp.gt.f32.partialorder %v10084_v14, 0.0 }
 0x2a2   :  { %v3472_v11 = vadd.f32 %v3471_v23, %v3470_v33  ;;  %418 = vperm.xlu1 %4660, %v6864_v28   ;;  %4665 = vset.pattern.permute.xlu2 %v9743_v8  ;;  %v7430_v33 = vstv %s7397_s3  ;;  %v1821_v47 = vpack.c.bf16 %v4442_v52, %v4442_v52  ;;  %v10089_v8 = vld [vmem:[#allocation62_spill] sm:$0xff]  ;;  %v7464_v52 = vstv %s7409_s12 }
 0x2a3   :  { %v4157_v46 = vadd.f32 %v4156_v42, %v4155_v54  ;;  %10088 = vst [vmem:[#allocation23_spill] sm:$0xff] %v7430_v33  ;;  %v4138_v54 = vadd.f32 %v4137_v63, %v4136_v43  ;;  %vm10090_vm2 = vcmp.gt.f32.partialorder %v10089_v8, 0.0  ;;  %v3603_v41 = vmul.f32 %v7430_v33, %v3453_v62  ;;  %v7510_v63 = vld [vmem:[#allocation2] sm:$0xff] }
 0x2a4   :  { %v3473_v19 = vrot.slane %v3472_v11, 1  ;;  %v2570_v42 = vpop.f32.mrf.mxu2  ;;  %v2899_v27 = vpop.f32.mrf.mxu3  ;;  %vm7443_vm11 = vmand %vm1150_vm5, %vm10090_vm2  ;;  %10096 = vst [vmem:[#allocation19_spill] sm:$0xff] %v7464_v52  ;;  %vm1023_vm5 = vcmp.lt.f32.partialorder %v6508_v45, %v7416_v56  ;;  %v2094_v59 = vunpack.c.l.b16 %v1821_v47 }
 0x2a5   :  { %v4158_v23 = vrot.slane %v4157_v46, 1  ;;  %v7432_v24 = vpop.permute.xlu1 %357  ;;  %v4288_v7 = vmul.f32 %v7464_v52, %v4138_v54  ;;  %v7492_v47 = vpop.f32.mrf.mxu1  ;;  %vm1439_vm2 = vmor %vm1023_vm5, %vm7457_vm15  ;;  %vm3113_vm15 = vcmp.eq.f32.partialorder %v2570_v42, %v5294_v55  ;;  %vm10103_vm5 = vnez %v9559_v20 }
 0x2a6   :  { %v3474_v57 = vadd.f32 %v3473_v19, %v3472_v11  ;;  %vm957_vm9 = vcmp.lt.f32.partialorder %v6578_v1, %v7432_v24  ;;  %vm1085_vm6 = vcmp.eq.f32.partialorder %v6578_v1, %v7432_v24  ;;  %v4377_v19 = vsel %vm7419_vm12, 1.0, %v9555_v10  ;;  %v7461_v11 = vpop.permute.xlu2 %369 }
 0x2a7   :  { %v4159_v43 = vadd.f32 %v4158_v23, %v4157_v46  ;;  %vm1245_vm12 = vmand %vm1085_vm6, %vm10097_vm4  ;;  %v2410_v23 = vpop.f32.mrf.mxu0  ;;  %v1756_v61 = vpack.c.bf16 %v4377_v19, %v4377_v19  ;;  %v2167_v54 = vpack.c.b16 %v2094_v59, %v2093_v3  ;;  %vm3734_vm8 = vcmp.eq.f32.partialorder %v7492_v47, %v5299_v60 }
 0x2a8   :  { %v3604_v46 = vmul.f32 %v7430_v33, %v3474_v57  ;;  %vm1373_vm7 = vmor %vm957_vm9, %vm1245_vm12  ;;  %vm1087_vm9 = vcmp.eq.f32.partialorder %v6578_v1, %v7461_v11  ;;  %vm3049_vm12 = vcmp.eq.f32.partialorder %v2410_v23, %v5294_v55 }
 0x2a9   :  { %v4289_v16 = vmul.f32 %v7464_v52, %v4159_v43  ;;  %vm7485_vm6 = vmor %vm1022_vm14, %vm7443_vm11  ;;  %v4378_v43 = vsel %vm1373_vm7, 1.0, %v9555_v10  ;;  %2599 = vmatmul.bf16.gmra.mxu2 %v2167_v54  ;;  %2928 = vmatmul.bf16.gmra.mxu3 %v2167_v54  ;;  %v2029_v19 = vunpack.c.l.b16 %v1756_v61  ;;  %vm959_vm11 = vcmp.lt.f32.partialorder %v6578_v1, %v7461_v11  ;;  %v10117_v52 = vld [vmem:[#allocation54_spill] sm:$0xff] }
 0x2aa   :  { %v7478_v62 = vsel %vm3619_vm0, %v3604_v46, %v3603_v41  ;;  %4664 = vset.pattern.permute.xlu1 %v10072_v51  ;;  %v1757_v31 = vpack.c.bf16 %v4378_v43, %v4378_v43  ;;  %430 = vperm.xlu2 %4665, %v6864_v28   ;;  %vm10102_vm14 = vmmov %vm10093_vm13  ;;  %v4443_v59 = vsel %vm7485_vm6, 1.0, %v9555_v10  ;;  %v4444_v51 = vsel %vm1439_vm2, 1.0, %v9555_v10  ;;  %v10106_v43 = vld [vmem:[#allocation53_spill] sm:$0xff] }
 0x2ab   :  { %10098 = vst [vmem:[#allocation46_spill] sm:$0xff] %v7478_v62  ;;  %v7499_v45 = vsel %vm3619_vm0, %v4289_v16, %v4288_v7  ;;  %vm1247_vm13 = vmand %vm1087_vm9, %vm10102_vm14  ;;  %v863_v61 = vrot.slane %v7510_v63, 7  ;;  %vm3798_vm0 = vcmp.eq.f32.partialorder %v2899_v27, %v5299_v60  ;;  %v1822_v16 = vpack.c.bf16 %v4443_v59, %v4443_v59 }
 0x2ac   :  { %10101 = vst [vmem:[#allocation24_spill] sm:$0xff] %v7499_v45  ;;  %v2030_v41 = vunpack.c.l.b16 %v1757_v31  ;;  %v2572_v7 = vpop.f32.mrf.mxu2  ;;  %v2901_v46 = vpop.f32.mrf.mxu3  ;;  %vm1375_vm4 = vmor %vm959_vm11, %vm1247_vm13  ;;  %v1823_v57 = vpack.c.bf16 %v4444_v51, %v4444_v51  ;;  %vm10107_vm9 = vcmp.gt.f32.partialorder %v10106_v43, 0.5  ;;  %v10113_v51 = vld [vmem:[#allocation56_spill] sm:$0xff] }
 0x2ad   :  { %vm7517_vm7 = vmand %vm3113_vm15, %vm10103_vm5  ;;  %vm3114_vm6 = vcmp.eq.f32.partialorder %v2572_v7, %v5294_v55  ;;  %vm3799_vm11 = vcmp.eq.f32.partialorder %v2901_v46, %v5299_v60  ;;  %v4380_v54 = vsel %vm1375_vm4, 1.0, %v9555_v10  ;;  %v7531_v31 = vperm.slane %v863_v61, 0 }
 0x2ae   :  { %v2135_v3 = vpack.c.b16 %v2030_v41, %v2029_v19  ;;  %vm7524_vm2 = vmand %vm3798_vm0, %vm10107_vm9  ;;  %v10110_v19 = vld [vmem:[#allocation26_spill] sm:$0xff]  ;;  %v7540_v59 = vpop.permute.xlu2 %770  ;;  %vm10114_vm13 = vnez %v10113_v51  ;;  %v2095_v61 = vunpack.c.l.b16 %v1822_v16  ;;  %v2096_v45 = vunpack.c.l.b16 %v1823_v57  ;;  %v10127_v51 = vld [vmem:[#allocation60_spill] sm:$0xff] }
 0x2af   :  { %v2412_v23 = vpop.f32.mrf.mxu0  ;;  %vm7536_vm14 = vmand %vm3049_vm12, %vm10103_vm5  ;;  %vm10118_vm0 = vcmp.gt.f32.partialorder %v10117_v52, 0.5  ;;  %v1759_v34 = vpack.c.bf16 %v4380_v54, %v4380_v54  ;;  %vm10121_vm5 = vcmp.gt.f32.partialorder %v10089_v8, 0.0  ;;  %vm1153_vm10 = vcmp.eq.f32.partialorder %v7531_v31, %v7540_v59 }
 0x2b0   :  { %2439 = vmatmul.bf16.gmra.mxu0 %v2135_v3  ;;  %2768 = vmatmul.bf16.gmra.mxu1 %v2135_v3  ;;  %vm7544_vm15 = vmand %vm3114_vm6, %vm10114_vm13  ;;  %v2741_v3 = vpop.f32.mrf.mxu1  ;;  %vm3050_vm12 = vcmp.eq.f32.partialorder %v2412_v23, %v5294_v55  ;;  %v859_v8 = vrot.slane %v7510_v63, 3  ;;  %v4086_v63 = vsel %vm7524_vm2, %v6598_v18, 0.0 }
 0x2b1   :  { %vm7552_vm4 = vmand %vm3799_vm11, %vm10118_vm0  ;;  %vm3735_vm11 = vcmp.eq.f32.partialorder %v2741_v3, %v5299_v60  ;;  %v2032_v54 = vunpack.c.l.b16 %v1759_v34  ;;  %v3402_v62 = vsel %vm7544_vm15, %v10127_v51, 0.0  ;;  %v3401_v34 = vsel %vm7517_vm7, %v6598_v18, 0.0 }
 0x2b2   :  { %424 = vperm.xlu1 %4664, %v6864_v28   ;;  %4667 = vset.pattern.permute.xlu2 %v10110_v19  ;;  %vm7570_vm1 = vmand %vm3050_vm12, %vm10114_vm13  ;;  %vm10128_vm12 = vcmp.gt.f32.partialorder %v10117_v52, 0.5  ;;  %v3337_v18 = vsel %vm7536_vm14, %v6641_v22, 0.0  ;;  %v3559_v47 = vadd.f32 %v3402_v62, %v3401_v34  ;;  %v7642_v62 = vpop.permute.xlu0 %376 }
 0x2b3   :  { %v3338_v27 = vsel %vm7570_vm1, %v6585_v32, 0.0  ;;  %vm10136_vm1 = vnez %v9576_v2 }
 0x2b4   :  { %v7548_v46 = vpop.permute.xlu1 %363 }
 0x2b5   :  { %vm958_vm9 = vcmp.lt.f32.partialorder %v6578_v1, %v7548_v46  ;;  %vm1086_vm6 = vcmp.eq.f32.partialorder %v6578_v1, %v7548_v46  ;;  %v2168_v1 = vpack.c.b16 %v2096_v45, %v2095_v61  ;;  %v3475_v45 = vadd.f32 %v3338_v27, %v3337_v18 }
 0x2b6   :  { %vm1246_vm3 = vmand %vm1086_vm6, %vm10121_vm5  ;;  %vm1025_vm5 = vcmp.lt.f32.partialorder %v7531_v31, %v7540_v59  ;;  %vm10124_vm6 = vcmp.gt.f32.partialorder %v9863_v15, 0.0 }
 0x2b7   :  { %vm1374_vm0 = vmor %vm958_vm9, %vm1246_vm3 }
 0x2b8   :  { %v4379_v57 = vsel %vm1374_vm0, 1.0, %v9555_v10  ;;  %vm7579_vm3 = vmand %vm1153_vm10, %vm10124_vm6  ;;  %vm10131_vm10 = vcmp.gt.f32.partialorder %v10106_v43, 0.5 }
 0x2b9   :  { %v1758_v23 = vpack.c.bf16 %v4379_v57, %v4379_v57  ;;  %vm7589_vm9 = vmand %vm3735_vm11, %vm10128_vm12  ;;  %2604 = vmatmul.bf16.gmra.mxu2 %v2168_v1  ;;  %2933 = vmatmul.bf16.gmra.mxu3 %v2168_v1 }
 0x2ba   :  { %4666 = vset.pattern.permute.xlu1 %v9862_v36  ;;  %830 = vperm.xlu2 %4667, %v6928_v38   ;;  %vm7606_vm15 = vmand %vm3734_vm8, %vm10131_vm10  ;;  %v4087_v36 = vsel %vm7552_vm4, %v10127_v51, 0.0  ;;  %v4023_v41 = vsel %vm7589_vm9, %v6585_v32, 0.0  ;;  %vm10137_vm4 = vcmp.gt.f32.partialorder %v5358_v9, 0.5 }
 0x2bb   :  { %v2031_v57 = vunpack.c.l.b16 %v1758_v23  ;;  %vm7626_vm2 = vmor %vm1025_vm5, %vm7579_vm3  ;;  %v7635_v23 = vperm.slane %v859_v8, 0  ;;  %v4244_v3 = vadd.f32 %v4087_v36, %v4086_v63  ;;  %v4022_v32 = vsel %vm7606_vm15, %v6641_v22, 0.0 }
 0x2bc   :  { %v2575_v61 = vpop.f32.mrf.mxu2  ;;  %v2904_v42 = vpop.f32.mrf.mxu3  ;;  %v4160_v34 = vadd.f32 %v4023_v41, %v4022_v32  ;;  %vm10138_vm3 = vmmov %vm10137_vm4  ;;  %v4446_v27 = vsel %vm7626_vm2, 1.0, %v9555_v10 }
 0x2bd   :  { %vm3115_vm8 = vcmp.eq.f32.partialorder %v2575_v61, %v5294_v55  ;;  %vm3800_vm7 = vcmp.eq.f32.partialorder %v2904_v42, %v5299_v60  ;;  %v2136_v1 = vpack.c.b16 %v2032_v54, %v2031_v57  ;;  %vm1088_vm9 = vcmp.eq.f32.partialorder %v7635_v23, %v7642_v62 }
 0x2be   :  { %vm3275_vm14 = vmand %vm3115_vm8, %vm10136_vm1  ;;  %v2415_v51 = vpop.f32.mrf.mxu0  ;;  %v2744_v16 = vpop.f32.mrf.mxu1  ;;  %v1825_v32 = vpack.c.bf16 %v4446_v27, %v4446_v27 }
 0x2bf   :  { %v3403_v61 = vsel %vm3275_vm14, %v6665_v4, 0.0  ;;  %vm3960_vm11 = vmand %vm3800_vm7, %vm10137_vm4  ;;  %vm3051_vm0 = vcmp.eq.f32.partialorder %v2415_v51, %v5294_v55  ;;  %vm3736_vm5 = vcmp.eq.f32.partialorder %v2744_v16, %v5299_v60  ;;  %v10144_v51 = vld [vmem:[#allocation63_spill] sm:$0xff] }
 0x2c0   :  { %v3560_v54 = vadd.f32 %v3559_v47, %v3403_v61  ;;  %v4088_v8 = vsel %vm3960_vm11, %v6665_v4, 0.0  ;;  %vm3211_vm6 = vmand %vm3051_vm0, %vm10136_vm1  ;;  %2444 = vmatmul.bf16.gmra.mxu0 %v2136_v1  ;;  %2773 = vmatmul.bf16.gmra.mxu1 %v2136_v1  ;;  %v10139_v4 = vld [vmem:[#allocation27_spill] sm:$0xff]  ;;  %vm10145_vm14 = vnez %v10144_v51  ;;  %v2098_v27 = vunpack.c.l.b16 %v1825_v32 }
 0x2c1   :  { %v4245_v63 = vadd.f32 %v4244_v3, %v4088_v8  ;;  %v3339_v36 = vsel %vm3211_vm6, %v6657_v25, 0.0  ;;  %vm3896_vm12 = vmand %vm3736_vm5, %vm10138_vm3  ;;  %v10148_v3 = vld [vmem:[#allocation61_spill] sm:$0xff] }
 0x2c2   :  { %v3476_v42 = vadd.f32 %v3475_v45, %v3339_v36  ;;  %v4024_v7 = vsel %vm3896_vm12, %v6657_v25, 0.0  ;;  %824 = vperm.xlu1 %4666, %v6928_v38   ;;  %4670 = vset.pattern.permute.xlu2 %v10139_v4  ;;  %v10140_v25 = vld [vmem:[#allocation28_spill] sm:$0xff]  ;;  %vm10149_vm0 = vcmp.gt.f32.partialorder %v10148_v3, 0.5  ;;  %v10155_v36 = vld [vmem:[#allocation29_spill] sm:$0xff] }
 0x2c3   :  { %v4161_v22 = vadd.f32 %v4160_v34, %v4024_v7  ;;  %vm10141_vm8 = vcmp.gt.f32.partialorder %v10140_v25, 0.0  ;;  %v7698_v34 = vpop.permute.xlu2 %776  ;;  %v10163_v3 = vld [vmem:[#allocation25_spill] sm:$0xff] }
 0x2c4   :  { %v2577_v57 = vpop.f32.mrf.mxu2  ;;  %v2906_v18 = vpop.f32.mrf.mxu3  ;;  %vm7667_vm7 = vmand %vm1088_vm9, %vm10141_vm8  ;;  %vm1026_vm1 = vcmp.lt.f32.partialorder %v7531_v31, %v7698_v34 }
 0x2c5   :  { %vm3116_vm10 = vcmp.eq.f32.partialorder %v2577_v57, %v5294_v55  ;;  %vm3801_vm15 = vcmp.eq.f32.partialorder %v2906_v18, %v5299_v60  ;;  %v7663_v47 = vpop.permute.xlu1 %764  ;;  %vm10152_vm3 = vmmov %vm10141_vm8 }
 0x2c6   :  { %vm7673_vm4 = vmand %vm3116_vm10, %vm10145_vm14  ;;  %vm1024_vm2 = vcmp.lt.f32.partialorder %v7531_v31, %v7663_v47  ;;  %vm1152_vm11 = vcmp.eq.f32.partialorder %v7531_v31, %v7663_v47  ;;  %v2417_v20 = vpop.f32.mrf.mxu0  ;;  %v2746_v1 = vpop.f32.mrf.mxu1 }
 0x2c7   :  { %vm7683_vm5 = vmand %vm3801_vm15, %vm10149_vm0  ;;  %vm3052_vm6 = vcmp.eq.f32.partialorder %v2417_v20, %v5294_v55  ;;  %vm3737_vm9 = vcmp.eq.f32.partialorder %v2746_v1, %v5299_v60  ;;  %vm960_vm15 = vcmp.lt.f32.partialorder %v7635_v23, %v7642_v62  ;;  %v3404_v7 = vsel %vm7673_vm4, %v10155_v36, 0.0 }
 0x2c8   :  { %vm1312_vm12 = vmand %vm1152_vm11, %vm10152_vm3  ;;  %v4089_v4 = vsel %vm7683_vm5, %v10155_v36, 0.0  ;;  %v10161_v36 = vld [vmem:[#allocation67_spill] sm:$0xff] }
 0x2c9   :  { %vm1440_vm10 = vmor %vm1024_vm2, %vm1312_vm12  ;;  %v4246_v32 = vadd.f32 %v4245_v63, %v4089_v4 }
 0x2ca   :  { %vm7693_vm8 = vmand %vm3052_vm6, %vm10145_vm14  ;;  %v4445_v8 = vsel %vm1440_vm10, 1.0, %v9555_v10  ;;  %4669 = vset.pattern.permute.xlu1 %v10110_v19  ;;  %836 = vperm.xlu2 %4670, %v6928_v38   ;;  %v3561_v19 = vadd.f32 %v3560_v54, %v3404_v7  ;;  %vm10162_vm6 = vnez %v10161_v36 }
 0x2cb   :  { %vm10156_vm2 = vmmov %vm10149_vm0  ;;  %v1824_v18 = vpack.c.bf16 %v4445_v8, %v4445_v8  ;;  %v3340_v16 = vsel %vm7693_vm8, %v6807_v29, 0.0 }
 0x2cc   :  { %vm7710_vm11 = vmand %vm3737_vm9, %vm10156_vm2  ;;  %v2580_v25 = vpop.f32.mrf.mxu2  ;;  %v2909_v20 = vpop.f32.mrf.mxu3  ;;  %v3477_v63 = vadd.f32 %v3476_v42, %v3340_v16 }
 0x2cd   :  { %vm3117_vm4 = vcmp.eq.f32.partialorder %v2580_v25, %v5294_v55  ;;  %vm3802_vm0 = vcmp.eq.f32.partialorder %v2909_v20, %v5299_v60  ;;  %v2097_v1 = vunpack.c.l.b16 %v1824_v18  ;;  %vm7723_vm5 = vmor %vm960_vm15, %vm7667_vm7  ;;  %v4025_v8 = vsel %vm7710_vm11, %v6807_v29, 0.0  ;;  %v10164_v18 = vld [vmem:[#allocation66_spill] sm:$0xff] }
 0x2ce   :  { %vm3277_vm3 = vmand %vm3117_vm4, %vm10162_vm6  ;;  %v2420_v45 = vpop.f32.mrf.mxu0  ;;  %v2749_v25 = vpop.f32.mrf.mxu1  ;;  %vm10165_vm12 = vcmp.gt.f32.partialorder %v10164_v18, 0.5  ;;  %v4162_v29 = vadd.f32 %v4161_v22, %v4025_v8 }
 0x2cf   :  { %v3405_v20 = vsel %vm3277_vm3, %v10163_v3, 0.0  ;;  %vm3962_vm9 = vmand %vm3802_vm0, %vm10165_vm12  ;;  %vm3053_vm7 = vcmp.eq.f32.partialorder %v2420_v45, %v5294_v55  ;;  %vm3738_vm10 = vcmp.eq.f32.partialorder %v2749_v25, %v5299_v60  ;;  %v2169_v54 = vpack.c.b16 %v2098_v27, %v2097_v1  ;;  %v7752_v22 = vpop.permute.xlu2 %388  ;;  %v7767_v1 = vpop.permute.xlu0 %394 }
 0x2d0   :  { %v3562_v41 = vadd.f32 %v3561_v19, %v3405_v20  ;;  %v4090_v7 = vsel %vm3962_vm9, %v10163_v3, 0.0  ;;  %vm3213_vm8 = vmand %vm3053_vm7, %vm10162_vm6  ;;  %v4381_v3 = vsel %vm7723_vm5, 1.0, %v9555_v10  ;;  %vm1090_vm0 = vcmp.eq.f32.partialorder %v7635_v23, %v7752_v22 }
 0x2d1   :  { %v7740_v4 = vadd.f32 %v4246_v32, %v4090_v7  ;;  %v3341_v57 = vsel %vm3213_vm8, %v6897_v35, 0.0  ;;  %vm10166_vm15 = vmmov %vm10165_vm12  ;;  %2609 = vmatmul.bf16.gmra.mxu2 %v2169_v54  ;;  %2938 = vmatmul.bf16.gmra.mxu3 %v2169_v54  ;;  %vm10167_vm3 = vcmp.gt.f32.partialorder %v9863_v15, 0.0  ;;  %vm1154_vm5 = vcmp.eq.f32.partialorder %v7531_v31, %v7698_v34  ;;  %v10168_v32 = vld [vmem:[#allocation32_spill] sm:$0xff] }
 0x2d2   :  { %vm3898_vm2 = vmand %vm3738_vm10, %vm10166_vm15  ;;  %v7745_v45 = vadd.f32 %v3477_v63, %v3341_v57  ;;  %442 = vperm.xlu1 %4669, %v6864_v28   ;;  %448 = vperm.xlu2 %4670, %v6864_v28   ;;  %vm962_vm7 = vcmp.lt.f32.partialorder %v7635_v23, %v7752_v22  ;;  %vm10169_vm10 = vcmp.gt.f32.partialorder %v10168_v32, 0.0  ;;  %vm1091_vm15 = vcmp.eq.f32.partialorder %v7635_v23, %v7767_v1  ;;  %v10176_v63 = vld [vmem:[#allocation68_spill] sm:$0xff] }
 0x2d3   :  { %v4026_v42 = vsel %vm3898_vm2, %v6897_v35, 0.0  ;;  %v1760_v35 = vpack.c.bf16 %v4381_v3, %v4381_v3  ;;  %vm1250_vm8 = vmand %vm1090_vm0, %vm10169_vm10  ;;  %vm963_vm0 = vcmp.lt.f32.partialorder %v7635_v23, %v7767_v1 }
 0x2d4   :  { %v7748_v27 = vadd.f32 %v4162_v29, %v4026_v42  ;;  %v7757_v16 = vpop.permute.xlu1 %382  ;;  %v2582_v19 = vpop.f32.mrf.mxu2 }
 0x2d5   :  { %vm961_vm11 = vcmp.lt.f32.partialorder %v7635_v23, %v7757_v16  ;;  %vm1089_vm4 = vcmp.eq.f32.partialorder %v7635_v23, %v7757_v16  ;;  %v2911_v61 = vpop.f32.mrf.mxu3  ;;  %v2033_v25 = vunpack.c.l.b16 %v1760_v35  ;;  %vm3118_vm2 = vcmp.eq.f32.partialorder %v2582_v19, %v5294_v55 }
 0x2d6   :  { %vm1249_vm12 = vmand %vm1089_vm4, %vm10167_vm3  ;;  %vm3803_vm3 = vcmp.eq.f32.partialorder %v2911_v61, %v5299_v60  ;;  %v2422_v42 = vpop.f32.mrf.mxu0  ;;  %v2751_v32 = vpop.f32.mrf.mxu1 }
 0x2d7   :  { %vm1377_vm9 = vmor %vm961_vm11, %vm1249_vm12 }
 0x2d8   :  { %v4382_v8 = vsel %vm1377_vm9, 1.0, %v9555_v10  ;;  %vm10170_vm11 = vmmov %vm10169_vm10  ;;  %vm10171_vm9 = vcmp.gt.f32.partialorder %v9919_v17, 0.0 }
 0x2d9   :  { %v1761_v15 = vpack.c.bf16 %v4382_v8, %v4382_v8  ;;  %vm1314_vm4 = vmand %vm1154_vm5, %vm10170_vm11  ;;  %vm10177_vm5 = vcmp.gt.f32.partialorder %v10176_v63, 0.5  ;;  %vm10182_vm11 = vnez %v9619_v21 }
 0x2da   :  { %4671 = vset.pattern.permute.xlu1 %v4973_v26  ;;  %4674 = vset.pattern.permute.xlu2 %v5030_v48  ;;  %vm1378_vm12 = vmor %vm962_vm7, %vm1250_vm8  ;;  %v10172_v26 = vld [vmem:[#allocation69_spill] sm:$0xff] }
 0x2db   :  { %v2034_v20 = vunpack.c.l.b16 %v1761_v15  ;;  %vm1251_vm10 = vmand %vm1091_vm15, %vm10171_vm9  ;;  %vm10173_vm6 = vnez %v10172_v26  ;;  %v4383_v3 = vsel %vm1378_vm12, 1.0, %v9555_v10  ;;  %v10390_v26 = vmov 0 }
 0x2dc   :  { %vm7790_vm14 = vmand %vm3118_vm2, %vm10173_vm6  ;;  %vm3054_vm2 = vcmp.eq.f32.partialorder %v2422_v42, %v5294_v55 }
 0x2dd   :  { %v2137_v48 = vpack.c.b16 %v2034_v20, %v2033_v25  ;;  %vm7798_vm7 = vmand %vm3803_vm3, %vm10177_vm5  ;;  %v3406_v29 = vsel %vm7790_vm14, %v6710_v30, 0.0  ;;  %v1762_v25 = vpack.c.bf16 %v4383_v3, %v4383_v3  ;;  %vm10183_vm3 = vcmp.gt.f32.partialorder %v5567_v12, 0.5 }
 0x2de   :  { %vm1379_vm8 = vmor %vm963_vm0, %vm1251_vm10  ;;  %v4091_v35 = vsel %vm7798_vm7, %v6710_v30, 0.0  ;;  %v3563_v15 = vadd.f32 %v3562_v41, %v3406_v29  ;;  %v7834_v41 = vpop.permute.xlu2 %794  ;;  %vm3739_vm10 = vcmp.eq.f32.partialorder %v2751_v32, %v5299_v60  ;;  %vm10185_vm5 = vcmp.gt.f32.partialorder %v9919_v17, 0.0  ;;  %v10192_v32 = vld [vmem:[#allocation71_spill] sm:$0xff] }
 0x2df   :  { %2449 = vmatmul.bf16.gmra.mxu0 %v2137_v48  ;;  %2778 = vmatmul.bf16.gmra.mxu1 %v2137_v48  ;;  %vm7805_vm15 = vmor %vm1026_vm1, %vm1314_vm4  ;;  %v4384_v8 = vsel %vm1379_vm8, 1.0, %v9555_v10  ;;  %v4248_v54 = vadd.f32 %v7740_v4, %v4091_v35  ;;  %10184 = vst [vmem:[#allocation16_spill] sm:$0xff] %v7834_v41  ;;  %v2035_v42 = vunpack.c.l.b16 %v1762_v25 }
 0x2e0   :  { %v4447_v20 = vsel %vm7805_vm15, 1.0, %v9555_v10  ;;  %v1763_v4 = vpack.c.bf16 %v4384_v8, %v4384_v8  ;;  %vm1157_vm15 = vcmp.eq.f32.partialorder %v7531_v31, %v7834_v41 }
 0x2e1   :  { %v1826_v3 = vpack.c.bf16 %v4447_v20, %v4447_v20 }
 0x2e2   :  { %842 = vperm.xlu1 %4671, %v6928_v38   ;;  %854 = vperm.xlu2 %4674, %v6928_v38  }
 0x2e3   :  { %v2585_v19 = vpop.f32.mrf.mxu2  ;;  %v2914_v61 = vpop.f32.mrf.mxu3 }
 0x2e4   :  { %vm3119_vm14 = vcmp.eq.f32.partialorder %v2585_v19, %v5294_v55  ;;  %vm3804_vm1 = vcmp.eq.f32.partialorder %v2914_v61, %v5299_v60  ;;  %v7821_v30 = vpop.permute.xlu1 %782  ;;  %v2036_v61 = vunpack.c.l.b16 %v1763_v4 }
 0x2e5   :  { %vm3279_vm4 = vmand %vm3119_vm14, %vm10182_vm11  ;;  %vm1027_vm0 = vcmp.lt.f32.partialorder %v7531_v31, %v7821_v30  ;;  %vm1155_vm9 = vcmp.eq.f32.partialorder %v7531_v31, %v7821_v30 }
 0x2e6   :  { %v3407_v48 = vsel %vm3279_vm4, %v6995_v13, 0.0  ;;  %vm3964_vm12 = vmand %vm3804_vm1, %vm10183_vm3  ;;  %vm10188_vm1 = vcmp.gt.f32.partialorder %v10176_v63, 0.5  ;;  %vm1029_vm3 = vcmp.lt.f32.partialorder %v7531_v31, %v7834_v41  ;;  %v7886_v17 = vpop.permute.xlu2 %406 }
 0x2e7   :  { %v7837_v7 = vadd.f32 %v3563_v15, %v3407_v48  ;;  %v4092_v29 = vsel %vm3964_vm12, %v6995_v13, 0.0  ;;  %vm1315_vm7 = vmand %vm1155_vm9, %vm10185_vm5  ;;  %vm10191_vm12 = vcmp.gt.f32.partialorder %v5006_v40, 0.0  ;;  %v2099_v15 = vunpack.c.l.b16 %v1826_v3  ;;  %10196 = vst [vmem:[#allocation70_spill] sm:$0xff] %v7886_v17 }
 0x2e8   :  { %v7842_v57 = vadd.f32 %v4248_v54, %v4092_v29  ;;  %vm1443_vm8 = vmor %vm1027_vm0, %vm1315_vm7  ;;  %v2138_v3 = vpack.c.b16 %v2036_v61, %v2035_v42  ;;  %vm10195_vm7 = vcmp.gt.f32.partialorder %v5567_v12, 0.5 }
 0x2e9   :  { %vm7850_vm14 = vmand %vm3054_vm2, %vm10173_vm6  ;;  %v4448_v13 = vsel %vm1443_vm8, 1.0, %v9555_v10 }
 0x2ea   :  { %vm7857_vm4 = vmand %vm3739_vm10, %vm10188_vm1  ;;  %v1827_v19 = vpack.c.bf16 %v4448_v13, %v4448_v13  ;;  %4673 = vset.pattern.permute.xlu1 %v9892_v44  ;;  %466 = vperm.xlu2 %4674, %v6864_v28   ;;  %v3342_v8 = vsel %vm7850_vm14, %v10192_v32, 0.0  ;;  %vm965_vm14 = vcmp.lt.f32.partialorder %v7635_v23, %v7886_v17 }
 0x2eb   :  { %vm1317_vm2 = vmand %vm1157_vm15, %vm10191_vm12  ;;  %v4027_v44 = vsel %vm7857_vm4, %v10192_v32, 0.0  ;;  %v3479_v4 = vadd.f32 %v7745_v45, %v3342_v8  ;;  %vm1093_vm15 = vcmp.eq.f32.partialorder %v7635_v23, %v7886_v17  ;;  %v2587_v8 = vpop.f32.mrf.mxu2 }
 0x2ec   :  { %v2100_v20 = vunpack.c.l.b16 %v1827_v19  ;;  %v2425_v54 = vpop.f32.mrf.mxu0  ;;  %v2754_v48 = vpop.f32.mrf.mxu1  ;;  %vm7873_vm0 = vmor %vm1029_vm3, %vm1317_vm2  ;;  %v4164_v35 = vadd.f32 %v7748_v27, %v4027_v44 }
 0x2ed   :  { %vm3055_vm9 = vcmp.eq.f32.partialorder %v2425_v54, %v5294_v55  ;;  %vm3740_vm10 = vcmp.eq.f32.partialorder %v2754_v48, %v5299_v60  ;;  %v4450_v27 = vsel %vm7873_vm0, 1.0, %v9555_v10  ;;  %vm10197_vm1 = vmmov %vm10191_vm12  ;;  %v10202_v54 = vld [vmem:[#allocation73_spill] sm:$0xff] }
 0x2ee   :  { %v2170_v25 = vpack.c.b16 %v2100_v20, %v2099_v15  ;;  %vm3215_vm5 = vmand %vm3055_vm9, %vm10182_vm11  ;;  %v10198_v15 = vld [vmem:[#allocation33_spill] sm:$0xff]  ;;  %v2916_v20 = vpop.f32.mrf.mxu3 }
 0x2ef   :  { %v3343_v13 = vsel %vm3215_vm5, %v6998_v5, 0.0  ;;  %vm3900_vm8 = vmand %vm3740_vm10, %vm10195_vm7  ;;  %2454 = vmatmul.bf16.gmra.mxu0 %v2138_v3  ;;  %2783 = vmatmul.bf16.gmra.mxu1 %v2138_v3  ;;  %vm10199_vm2 = vcmp.gt.f32.partialorder %v10198_v15, 0.0 }
 0x2f0   :  { %2614 = vmatmul.bf16.gmra.mxu2 %v2170_v25  ;;  %2943 = vmatmul.bf16.gmra.mxu3 %v2170_v25  ;;  %v3480_v19 = vadd.f32 %v3479_v4, %v3343_v13  ;;  %v4028_v32 = vsel %vm3900_vm8, %v6998_v5, 0.0  ;;  %vm1253_vm4 = vmand %vm1093_vm15, %vm10197_vm1  ;;  %v1829_v5 = vpack.c.bf16 %v4450_v27, %v4450_v27  ;;  %vm3120_vm8 = vcmp.eq.f32.partialorder %v2587_v8, %v5294_v55  ;;  %v10206_v4 = vld [vmem:[#allocation72_spill] sm:$0xff]  ;;  %v7929_v13 = vpop.permute.xlu2 %412 }
 0x2f1   :  { %v4165_v45 = vadd.f32 %v4164_v35, %v4028_v32  ;;  %vm7908_vm5 = vmor %vm965_vm14, %vm1253_vm4  ;;  %vm10203_vm15 = vnez %v10202_v54  ;;  %vm10207_vm14 = vcmp.gt.f32.partialorder %v10206_v4, 0.5  ;;  %10210 = vst [vmem:[#allocation91_spill] sm:$0xff] %v7929_v13  ;;  %v10222_v54 = vld [vmem:[#allocation35_spill] sm:$0xff] }
 0x2f2   :  { %848 = vperm.xlu1 %4673, %v6928_v38   ;;  %v2102_v25 = vunpack.c.l.b16 %v1829_v5 }
 0x2f4   :  { %v7895_v42 = vpop.permute.xlu1 %788  ;;  %v2427_v61 = vpop.f32.mrf.mxu0 }
 0x2f5   :  { %vm1028_vm3 = vcmp.lt.f32.partialorder %v7531_v31, %v7895_v42  ;;  %vm1156_vm12 = vcmp.eq.f32.partialorder %v7531_v31, %v7895_v42  ;;  %v2756_v38 = vpop.f32.mrf.mxu1  ;;  %vm3056_vm9 = vcmp.eq.f32.partialorder %v2427_v61, %v5294_v55 }
 0x2f6   :  { %vm1316_vm0 = vmand %vm1156_vm12, %vm10199_vm2  ;;  %vm3741_vm7 = vcmp.eq.f32.partialorder %v2756_v38, %v5299_v60  ;;  %v4386_v38 = vsel %vm7908_vm5, 1.0, %v9555_v10  ;;  %vm10217_vm5 = vcmp.gt.f32.partialorder %v10198_v15, 0.0 }
 0x2f7   :  { %vm1444_vm10 = vmor %vm1028_vm3, %vm1316_vm0  ;;  %vm3805_vm3 = vcmp.eq.f32.partialorder %v2916_v20, %v5299_v60  ;;  %v1765_v48 = vpack.c.bf16 %v4386_v38, %v4386_v38  ;;  %v10220_v38 = vld [vmem:[#allocation75_spill] sm:$0xff] }
 0x2f8   :  { %v4449_v40 = vsel %vm1444_vm10, 1.0, %v9555_v10  ;;  %vm7917_vm1 = vmand %vm3056_vm9, %vm10203_vm15 }
 0x2f9   :  { %v1828_v29 = vpack.c.bf16 %v4449_v40, %v4449_v40  ;;  %vm7925_vm4 = vmand %vm3741_vm7, %vm10207_vm14  ;;  %v3344_v27 = vsel %vm7917_vm1, %v7084_v53, 0.0  ;;  %v7956_v40 = vpop.permute.xlu0 %800  ;;  %v2038_v4 = vunpack.c.l.b16 %v1765_v48 }
 0x2fa   :  { %460 = vperm.xlu1 %4673, %v6864_v28   ;;  %vm7933_vm12 = vmand %vm3120_vm8, %vm10203_vm15  ;;  %10216 = vst [vmem:[#allocation48_spill] sm:$0xff] %v7956_v40  ;;  %v4029_v44 = vsel %vm7925_vm4, %v7084_v53, 0.0  ;;  %vm1158_vm4 = vcmp.eq.f32.partialorder %v7531_v31, %v7956_v40 }
 0x2fb   :  { %v2101_v35 = vunpack.c.l.b16 %v1828_v29  ;;  %vm10213_vm2 = vmmov %vm10207_vm14  ;;  %v3408_v29 = vsel %vm7933_vm12, %v6899_v39, 0.0  ;;  %v4166_v15 = vadd.f32 %v4165_v45, %v4029_v44  ;;  %v7986_v45 = vpop.permute.xlu2 %812 }
 0x2fc   :  { %v7940_v28 = vpop.permute.xlu1 %400  ;;  %v2430_v61 = vpop.f32.mrf.mxu0  ;;  %vm7947_vm0 = vmand %vm3805_vm3, %vm10213_vm2  ;;  %10226 = vst [vmem:[#allocation87_spill] sm:$0xff] %v7986_v45  ;;  %v3565_v5 = vadd.f32 %v7837_v7, %v3408_v29 }
 0x2fd   :  { %vm964_vm9 = vcmp.lt.f32.partialorder %v7635_v23, %v7940_v28  ;;  %vm1092_vm10 = vcmp.eq.f32.partialorder %v7635_v23, %v7940_v28  ;;  %vm3057_vm7 = vcmp.eq.f32.partialorder %v2430_v61, %v5294_v55  ;;  %v2759_v8 = vpop.f32.mrf.mxu1  ;;  %v2171_v20 = vpack.c.b16 %v2102_v25, %v2101_v35  ;;  %v10218_v35 = vld [vmem:[#allocation76_spill] sm:$0xff] }
 0x2fe   :  { %vm1252_vm8 = vmand %vm1092_vm10, %vm10217_vm5  ;;  %vm3742_vm1 = vcmp.eq.f32.partialorder %v2759_v8, %v5299_v60  ;;  %v3481_v25 = vadd.f32 %v3480_v19, %v3344_v27  ;;  %vm10219_vm14 = vnez %v10218_v35  ;;  %v4093_v53 = vsel %vm7947_vm0, %v6899_v39, 0.0 }
 0x2ff   :  { %vm1380_vm3 = vmor %vm964_vm9, %vm1252_vm8  ;;  %vm10221_vm9 = vcmp.gt.f32.partialorder %v10220_v38, 0.5  ;;  %v4250_v44 = vadd.f32 %v7842_v57, %v4093_v53  ;;  %v10230_v53 = vld [vmem:[#allocation78_spill] sm:$0xff] }
 0x300   :  { %2619 = vmatmul.bf16.gmra.mxu2 %v2171_v20  ;;  %2948 = vmatmul.bf16.gmra.mxu3 %v2171_v20  ;;  %vm3217_vm2 = vmand %vm3057_vm7, %vm10219_vm14  ;;  %v4385_v3 = vsel %vm1380_vm3, 1.0, %v9555_v10  ;;  %vm10223_vm7 = vcmp.gt.f32.partialorder %v10222_v54, 0.0 }
 0x301   :  { %v3345_v61 = vsel %vm3217_vm2, %v7078_v58, 0.0  ;;  %vm3902_vm10 = vmand %vm3742_vm1, %vm10221_vm9  ;;  %v1764_v32 = vpack.c.bf16 %v4385_v3, %v4385_v3  ;;  %v7999_v7 = vpop.permute.xlu0 %818 }
 0x302   :  { %v3482_v19 = vadd.f32 %v3481_v25, %v3345_v61  ;;  %v4030_v27 = vsel %vm3902_vm10, %v7078_v58, 0.0  ;;  %v2590_v8 = vpop.f32.mrf.mxu2  ;;  %vm7982_vm0 = vmand %vm1158_vm4, %vm10223_vm7  ;;  %v10227_v25 = vld [vmem:[#allocation74_spill] sm:$0xff]  ;;  %vm1030_vm4 = vcmp.lt.f32.partialorder %v7531_v31, %v7956_v40  ;;  %10229 = vst [vmem:[#allocation57_spill] sm:$0xff] %v7999_v7  ;;  %vm1094_vm7 = vcmp.eq.f32.partialorder %v7635_v23, %v7929_v13  ;;  %v10232_v61 = vld [vmem:[#allocation31_spill] sm:$0xff] }
 0x303   :  { %v4167_v20 = vadd.f32 %v4166_v15, %v4030_v27  ;;  %vm3121_vm12 = vcmp.eq.f32.partialorder %v2590_v8, %v5294_v55  ;;  %v2919_v17 = vpop.f32.mrf.mxu3  ;;  %v2037_v41 = vunpack.c.l.b16 %v1764_v32  ;;  %vm10228_vm1 = vmmov %vm10221_vm9  ;;  %vm10231_vm9 = vnez %v10230_v53 }
 0x304   :  { %vm3281_vm5 = vmand %vm3121_vm12, %vm10219_vm14  ;;  %vm3806_vm8 = vcmp.eq.f32.partialorder %v2919_v17, %v5299_v60  ;;  %v2432_v58 = vpop.f32.mrf.mxu0 }
 0x305   :  { %v3409_v48 = vsel %vm3281_vm5, %v10227_v25, 0.0  ;;  %vm3966_vm3 = vmand %vm3806_vm8, %vm10228_vm1  ;;  %vm3058_vm2 = vcmp.eq.f32.partialorder %v2432_v58, %v5294_v55  ;;  %v2761_v3 = vpop.f32.mrf.mxu1  ;;  %v2139_v15 = vpack.c.b16 %v2038_v4, %v2037_v41  ;;  %v10233_v41 = vld [vmem:[#allocation77_spill] sm:$0xff]  ;;  %vm1160_vm1 = vcmp.eq.f32.partialorder %v7531_v31, %v7986_v45 }
 0x306   :  { %v3566_v57 = vadd.f32 %v3565_v5, %v3409_v48  ;;  %v4094_v29 = vsel %vm3966_vm3, %v10227_v25, 0.0  ;;  %vm3218_vm10 = vmand %vm3058_vm2, %vm10231_vm9  ;;  %vm3743_vm12 = vcmp.eq.f32.partialorder %v2761_v3, %v5299_v60  ;;  %vm10234_vm5 = vcmp.gt.f32.partialorder %v10233_v41, 0.5  ;;  %v10247_v3 = vld [vmem:[#allocation79_spill] sm:$0xff] }
 0x307   :  { %v4251_v17 = vadd.f32 %v4250_v44, %v4094_v29  ;;  %v3346_v32 = vsel %vm3218_vm10, %v10232_v61, 0.0  ;;  %vm3903_vm8 = vmand %vm3743_vm12, %vm10234_vm5  ;;  %2459 = vmatmul.bf16.gmra.mxu0 %v2139_v15  ;;  %2788 = vmatmul.bf16.gmra.mxu1 %v2139_v15  ;;  %vm1161_vm2 = vcmp.eq.f32.partialorder %v7531_v31, %v7999_v7  ;;  %vm10235_vm10 = vcmp.gt.f32.partialorder %v10222_v54, 0.0  ;;  %v10238_v44 = vld [vmem:[#allocation36_spill] sm:$0xff]  ;;  %v8058_v29 = vpop.permute.xlu2 %430  ;;  %v10272_v5 = vld [vmem:[#allocation83_spill] sm:$0xff] }
 0x308   :  { %v8012_v4 = vadd.f32 %v3482_v19, %v3346_v32  ;;  %v4031_v27 = vsel %vm3903_vm8, %v10232_v61, 0.0  ;;  %vm1446_vm3 = vmor %vm1030_vm4, %vm7982_vm0  ;;  %vm10239_vm5 = vcmp.gt.f32.partialorder %v10238_v44, 0.0  ;;  %10249 = vst [vmem:[#allocation52_spill] sm:$0xff] %v8058_v29  ;;  %vm969_vm11 = vcmp.lt.f32.partialorder %v7635_v23, %v8058_v29 }
 0x309   :  { %v8022_v8 = vadd.f32 %v4167_v20, %v4031_v27  ;;  %vm8026_vm12 = vmand %vm1094_vm7, %vm10235_vm10  ;;  %v4451_v25 = vsel %vm1446_vm3, 1.0, %v9555_v10  ;;  %v10242_v20 = vld [vmem:[#allocation37_spill] sm:$0xff]  ;;  %vm966_vm3 = vcmp.lt.f32.partialorder %v7635_v23, %v7929_v13  ;;  %v10250_v27 = vld [vmem:[#allocation34_spill] sm:$0xff] }
 0x30a   :  { %v2592_v19 = vpop.f32.mrf.mxu2  ;;  %vm8032_vm8 = vmand %vm1160_vm1, %vm10239_vm5  ;;  %vm10243_vm4 = vcmp.gt.f32.partialorder %v10242_v20, 0.0  ;;  %vm10248_vm1 = vcmp.gt.f32.partialorder %v10233_v41, 0.5  ;;  %v10265_v13 = vld [vmem:[#allocation80_spill] sm:$0xff] }
 0x30b   :  { %vm3122_vm0 = vcmp.eq.f32.partialorder %v2592_v19, %v5294_v55  ;;  %v2921_v58 = vpop.f32.mrf.mxu3  ;;  %vm8040_vm14 = vmand %vm1161_vm2, %vm10243_vm4  ;;  %v1830_v19 = vpack.c.bf16 %v4451_v25, %v4451_v25 }
 0x30c   :  { %vm3282_vm7 = vmand %vm3122_vm0, %vm10231_vm9  ;;  %vm3807_vm10 = vcmp.eq.f32.partialorder %v2921_v58, %v5299_v60  ;;  %v8047_v48 = vpop.permute.xlu1 %806  ;;  %vm10251_vm0 = vcmp.gt.f32.partialorder %v10250_v27, 0.0  ;;  %vm1033_vm9 = vcmp.lt.f32.partialorder %v7531_v31, %v7999_v7 }
 0x30d   :  { %10246 = vst [vmem:[#allocation92_spill] sm:$0xff] %v8047_v48  ;;  %v3410_v15 = vsel %vm3282_vm7, %v10247_v3, 0.0  ;;  %vm3967_vm5 = vmand %vm3807_vm10, %vm10248_vm1  ;;  %vm1031_vm2 = vcmp.lt.f32.partialorder %v7531_v31, %v8047_v48  ;;  %vm1159_vm4 = vcmp.eq.f32.partialorder %v7531_v31, %v8047_v48  ;;  %vm1032_vm10 = vcmp.lt.f32.partialorder %v7531_v31, %v7986_v45  ;;  %v10264_v45 = vld [vmem:[#allocation41_spill] sm:$0xff] }
 0x30e   :  { %v3567_v61 = vadd.f32 %v3566_v57, %v3410_v15  ;;  %v4095_v32 = vsel %vm3967_vm5, %v10247_v3, 0.0  ;;  %vm1319_vm7 = vmand %vm1159_vm4, %vm10251_vm0  ;;  %vm1097_vm5 = vcmp.eq.f32.partialorder %v7635_v23, %v8058_v29  ;;  %v2103_v15 = vunpack.c.l.b16 %v1830_v19 }
 0x30f   :  { %v4252_v58 = vadd.f32 %v4251_v17, %v4095_v32  ;;  %vm1447_vm1 = vmor %vm1031_vm2, %vm1319_vm7  ;;  %vm10258_vm2 = vcmp.gt.f32.partialorder %v10242_v20, 0.0 }
 0x310   :  { %vm8069_vm15 = vmor %vm966_vm3, %vm8026_vm12  ;;  %v4452_v57 = vsel %vm1447_vm1, 1.0, %v9555_v10 }
 0x311   :  { %v1831_v25 = vpack.c.bf16 %v4452_v57, %v4452_v57  ;;  %vm8078_vm4 = vmor %vm1032_vm10, %vm8032_vm8  ;;  %v10261_v57 = vld [vmem:[#allocation81_spill] sm:$0xff] }
 0x312   :  { %vm8084_vm12 = vmor %vm1033_vm9, %vm8040_vm14  ;;  %vm10262_vm8 = vnez %v10261_v57  ;;  %vm10266_vm14 = vcmp.gt.f32.partialorder %v10265_v13, 0.5 }
 0x313   :  { %v2595_v3 = vpop.f32.mrf.mxu2  ;;  %v2924_v32 = vpop.f32.mrf.mxu3  ;;  %v2104_v7 = vunpack.c.l.b16 %v1831_v25  ;;  %vm8091_vm0 = vmand %vm1097_vm5, %vm10258_vm2  ;;  %vm10267_vm2 = vcmp.gt.f32.partialorder %v10250_v27, 0.0 }
 0x314   :  { %vm3123_vm3 = vcmp.eq.f32.partialorder %v2595_v3, %v5294_v55  ;;  %vm3808_vm10 = vcmp.eq.f32.partialorder %v2924_v32, %v5299_v60  ;;  %v8098_v54 = vpop.permute.xlu1 %418  ;;  %v4387_v3 = vsel %vm8069_vm15, 1.0, %v9555_v10 }
 0x315   :  { %vm3283_vm7 = vmand %vm3123_vm3, %vm10262_vm8  ;;  %10263 = vst [vmem:[#allocation22_spill] sm:$0xff] %v8098_v54  ;;  %v2435_v19 = vpop.f32.mrf.mxu0  ;;  %vm967_vm1 = vcmp.lt.f32.partialorder %v7635_v23, %v8098_v54  ;;  %vm1095_vm5 = vcmp.eq.f32.partialorder %v7635_v23, %v8098_v54  ;;  %v2764_v20 = vpop.f32.mrf.mxu1  ;;  %v2172_v48 = vpack.c.b16 %v2104_v7, %v2103_v15  ;;  %v1766_v53 = vpack.c.bf16 %v4387_v3, %v4387_v3 }
 0x316   :  { %v3411_v25 = vsel %vm3283_vm7, %v10264_v45, 0.0  ;;  %vm3968_vm9 = vmand %vm3808_vm10, %vm10266_vm14  ;;  %vm3059_vm3 = vcmp.eq.f32.partialorder %v2435_v19, %v5294_v55  ;;  %vm3744_vm7 = vcmp.eq.f32.partialorder %v2764_v20, %v5299_v60  ;;  %v4454_v7 = vsel %vm8084_vm12, 1.0, %v9555_v10 }
 0x317   :  { %v3568_v32 = vadd.f32 %v3567_v61, %v3411_v25  ;;  %v4096_v40 = vsel %vm3968_vm9, %v10264_v45, 0.0  ;;  %vm1255_vm15 = vmand %vm1095_vm5, %vm10267_vm2  ;;  %2624 = vmatmul.bf16.gmra.mxu2 %v2172_v48  ;;  %2953 = vmatmul.bf16.gmra.mxu3 %v2172_v48  ;;  %v10268_v45 = vld [vmem:[#allocation42_spill] sm:$0xff]  ;;  %vm10269_vm9 = vcmp.gt.f32.partialorder %v10265_v13, 0.5  ;;  %v2039_v48 = vunpack.c.l.b16 %v1766_v53 }
 0x318   :  { %v4253_v41 = vadd.f32 %v4252_v58, %v4096_v40  ;;  %vm1383_vm10 = vmor %vm967_vm1, %vm1255_vm15  ;;  %v4453_v40 = vsel %vm8078_vm4, 1.0, %v9555_v10  ;;  %vm10273_vm4 = vnez %v10272_v5 }
 0x319   :  { %vm3219_vm14 = vmand %vm3059_vm3, %vm10262_vm8  ;;  %v4388_v19 = vsel %vm1383_vm10, 1.0, %v9555_v10 }
 0x31a   :  { %v3347_v61 = vsel %vm3219_vm14, %v10268_v45, 0.0  ;;  %vm3904_vm5 = vmand %vm3744_vm7, %vm10269_vm9  ;;  %v1767_v27 = vpack.c.bf16 %v4388_v19, %v4388_v19 }
 0x31b   :  { %v3484_v58 = vadd.f32 %v8012_v4, %v3347_v61  ;;  %v4032_v15 = vsel %vm3904_vm5, %v10268_v45, 0.0  ;;  %v2597_v3 = vpop.f32.mrf.mxu2  ;;  %v2926_v20 = vpop.f32.mrf.mxu3  ;;  %vm8135_vm3 = vmor %vm969_vm11, %vm8091_vm0  ;;  %v1832_v45 = vpack.c.bf16 %v4453_v40, %v4453_v40  ;;  %v1833_v61 = vpack.c.bf16 %v4454_v7, %v4454_v7  ;;  %v10277_v40 = vld [vmem:[#allocation18_spill] sm:$0xff] }
 0x31c   :  { %v4169_v25 = vadd.f32 %v8022_v8, %v4032_v15  ;;  %vm3124_vm1 = vcmp.eq.f32.partialorder %v2597_v3, %v5294_v55  ;;  %v2040_v19 = vunpack.c.l.b16 %v1767_v27  ;;  %vm3809_vm2 = vcmp.eq.f32.partialorder %v2926_v20, %v5299_v60  ;;  %v10274_v8 = vld [vmem:[#allocation30_spill] sm:$0xff]  ;;  %v10275_v3 = vld [vmem:[#allocation84_spill] sm:$0xff] }
 0x31d   :  { %vm3284_vm12 = vmand %vm3124_vm1, %vm10273_vm4  ;;  %v2437_v4 = vpop.f32.mrf.mxu0  ;;  %vm10276_vm15 = vcmp.gt.f32.partialorder %v10275_v3, 0.5  ;;  %v2766_v53 = vpop.f32.mrf.mxu1 }
 0x31e   :  { %v3412_v15 = vsel %vm3284_vm12, %v10274_v8, 0.0  ;;  %vm3969_vm7 = vmand %vm3809_vm2, %vm10276_vm15  ;;  %vm3060_vm10 = vcmp.eq.f32.partialorder %v2437_v4, %v5294_v55  ;;  %v2140_v39 = vpack.c.b16 %v2040_v19, %v2039_v48  ;;  %vm3745_vm0 = vcmp.eq.f32.partialorder %v2766_v53, %v5299_v60  ;;  %v10282_v53 = vld [vmem:[#allocation40_spill] sm:$0xff] }
 0x31f   :  { %v3569_v27 = vadd.f32 %v3568_v32, %v3412_v15  ;;  %v4097_v29 = vsel %vm3969_vm7, %v10274_v8, 0.0  ;;  %vm3220_vm11 = vmand %vm3060_vm10, %vm10273_vm4  ;;  %v2105_v48 = vunpack.c.l.b16 %v1832_v45  ;;  %v2106_v32 = vunpack.c.l.b16 %v1833_v61 }
 0x320   :  { %v4254_v20 = vadd.f32 %v4253_v41, %v4097_v29  ;;  %v3348_v7 = vsel %vm3220_vm11, %v10277_v40, 0.0  ;;  %vm10278_vm14 = vmmov %vm10276_vm15  ;;  %2464 = vmatmul.bf16.gmra.mxu0 %v2140_v39  ;;  %2793 = vmatmul.bf16.gmra.mxu1 %v2140_v39  ;;  %v4390_v8 = vsel %vm8135_vm3, 1.0, %v9555_v10  ;;  %vm10281_vm12 = vcmp.gt.f32.partialorder %v10238_v44, 0.0 }
 0x321   :  { %vm3905_vm9 = vmand %vm3745_vm0, %vm10278_vm14  ;;  %v3485_v54 = vadd.f32 %v3484_v58, %v3348_v7  ;;  %v2173_v41 = vpack.c.b16 %v2106_v32, %v2105_v48  ;;  %v1769_v29 = vpack.c.bf16 %v4390_v8, %v4390_v8  ;;  %v8163_v58 = vpop.permute.xlu2 %830  ;;  %vm10283_vm10 = vcmp.gt.f32.partialorder %v10282_v53, 0.0  ;;  %v10286_v8 = vld [vmem:[#allocation39_spill] sm:$0xff] }
 0x322   :  { %v4033_v4 = vsel %vm3905_vm9, %v10277_v40, 0.0  ;;  %10280 = vst [vmem:[#allocation90_spill] sm:$0xff] %v8163_v58  ;;  %vm1163_vm3 = vcmp.eq.f32.partialorder %v7531_v31, %v8163_v58  ;;  %vm1035_vm7 = vcmp.lt.f32.partialorder %v7531_v31, %v8163_v58  ;;  %v10299_v58 = vld [vmem:[#allocation45_spill] sm:$0xff] }
 0x323   :  { %v4170_v19 = vadd.f32 %v4169_v25, %v4033_v4  ;;  %v2042_v45 = vunpack.c.l.b16 %v1769_v29  ;;  %vm1323_vm11 = vmand %vm1163_vm3, %vm10283_vm10  ;;  %v8180_v4 = vpop.permute.xlu0 %436  ;;  %v10288_v29 = vld [vmem:[#allocation85_spill] sm:$0xff] }
 0x324   :  { %v8157_v15 = vpop.permute.xlu1 %424  ;;  %vm8176_vm9 = vmor %vm1035_vm7, %vm1323_vm11 }
 0x325   :  { %10279 = vst [vmem:[#allocation21_spill] sm:$0xff] %v8157_v15  ;;  %vm968_vm5 = vcmp.lt.f32.partialorder %v7635_v23, %v8157_v15  ;;  %vm1096_vm1 = vcmp.eq.f32.partialorder %v7635_v23, %v8157_v15 }
 0x326   :  { %vm1256_vm2 = vmand %vm1096_vm1, %vm10281_vm12 }
 0x327   :  { %vm1384_vm15 = vmor %vm968_vm5, %vm1256_vm2  ;;  %2629 = vmatmul.bf16.gmra.mxu2 %v2173_v41  ;;  %2958 = vmatmul.bf16.gmra.mxu3 %v2173_v41  ;;  %vm10287_vm5 = vnez %v10286_v8 }
 0x328   :  { %v4389_v25 = vsel %vm1384_vm15, 1.0, %v9555_v10  ;;  %vm10289_vm15 = vcmp.gt.f32.partialorder %v10288_v29, 0.5 }
 0x329   :  { %v1768_v17 = vpack.c.bf16 %v4389_v25, %v4389_v25  ;;  %vm10290_vm10 = vmmov %vm10289_vm15 }
 0x32b   :  { %v2041_v61 = vunpack.c.l.b16 %v1768_v17 }
 0x32c   :  { %v2600_v48 = vpop.f32.mrf.mxu2  ;;  %v2929_v32 = vpop.f32.mrf.mxu3 }
 0x32d   :  { %v2440_v39 = vpop.f32.mrf.mxu0  ;;  %v2769_v44 = vpop.f32.mrf.mxu1  ;;  %v2141_v40 = vpack.c.b16 %v2042_v45, %v2041_v61  ;;  %vm3125_vm12 = vcmp.eq.f32.partialorder %v2600_v48, %v5294_v55  ;;  %vm3810_vm2 = vcmp.eq.f32.partialorder %v2929_v32, %v5299_v60 }
 0x32e   :  { %vm3061_vm0 = vcmp.eq.f32.partialorder %v2440_v39, %v5294_v55  ;;  %vm3746_vm14 = vcmp.eq.f32.partialorder %v2769_v44, %v5299_v60  ;;  %vm3285_vm7 = vmand %vm3125_vm12, %vm10287_vm5  ;;  %v4456_v39 = vsel %vm8176_vm9, 1.0, %v9555_v10 }
 0x32f   :  { %vm3221_vm1 = vmand %vm3061_vm0, %vm10287_vm5  ;;  %v3413_v45 = vsel %vm3285_vm7, %v7352_v37, 0.0  ;;  %vm1098_vm0 = vcmp.eq.f32.partialorder %v7635_v23, %v8180_v4  ;;  %v1835_v32 = vpack.c.bf16 %v4456_v39, %v4456_v39 }
 0x330   :  { %2469 = vmatmul.bf16.gmra.mxu0 %v2141_v40  ;;  %2798 = vmatmul.bf16.gmra.mxu1 %v2141_v40  ;;  %v3349_v41 = vsel %vm3221_vm1, %v7350_v50, 0.0  ;;  %vm3906_vm3 = vmand %vm3746_vm14, %vm10289_vm15  ;;  %v3570_v44 = vadd.f32 %v3569_v27, %v3413_v45 }
 0x331   :  { %v3486_v25 = vadd.f32 %v3485_v54, %v3349_v41  ;;  %v4034_v17 = vsel %vm3906_vm3, %v7350_v50, 0.0  ;;  %vm3970_vm11 = vmand %vm3810_vm2, %vm10290_vm10  ;;  %v8203_v50 = vpop.permute.xlu2 %836  ;;  %v10292_v41 = vld [vmem:[#allocation38_spill] sm:$0xff] }
 0x332   :  { %v4171_v61 = vadd.f32 %v4170_v19, %v4034_v17  ;;  %v4098_v40 = vsel %vm3970_vm11, %v7352_v37, 0.0  ;;  %vm10293_vm9 = vcmp.gt.f32.partialorder %v10292_v41, 0.0  ;;  %v10297_v17 = vld [vmem:[#allocation50_spill] sm:$0xff] }
 0x333   :  { %v4255_v48 = vadd.f32 %v4254_v20, %v4098_v40  ;;  %vm8211_vm12 = vmand %vm1098_vm0, %vm10293_vm9  ;;  %vm10298_vm5 = vnez %v10297_v17 }
 0x334   :  { %v8201_v54 = vpop.permute.xlu1 %824  ;;  %vm10296_vm2 = vmmov %vm10293_vm9  ;;  %v2602_v37 = vpop.f32.mrf.mxu2 }
 0x335   :  { %10291 = vst [vmem:[#allocation93_spill] sm:$0xff] %v8201_v54  ;;  %vm1034_vm14 = vcmp.lt.f32.partialorder %v7531_v31, %v8201_v54  ;;  %vm1162_vm1 = vcmp.eq.f32.partialorder %v7531_v31, %v8201_v54  ;;  %v2442_v19 = vpop.f32.mrf.mxu0  ;;  %v2771_v7 = vpop.f32.mrf.mxu1  ;;  %vm3126_vm10 = vcmp.eq.f32.partialorder %v2602_v37, %v5294_v55 }
 0x336   :  { %vm1322_vm15 = vmand %vm1162_vm1, %vm10296_vm2  ;;  %vm3062_vm3 = vcmp.eq.f32.partialorder %v2442_v19, %v5294_v55  ;;  %v2931_v20 = vpop.f32.mrf.mxu3  ;;  %vm3747_vm0 = vcmp.eq.f32.partialorder %v2771_v7, %v5299_v60  ;;  %v2108_v19 = vunpack.c.l.b16 %v1835_v32 }
 0x337   :  { %vm1450_vm7 = vmor %vm1034_vm14, %vm1322_vm15  ;;  %vm3811_vm11 = vcmp.eq.f32.partialorder %v2931_v20, %v5299_v60  ;;  %vm10300_vm14 = vcmp.gt.f32.partialorder %v10299_v58, 0.5 }
 0x338   :  { %vm3222_vm4 = vmand %vm3062_vm3, %vm10298_vm5  ;;  %v4455_v45 = vsel %vm1450_vm7, 1.0, %v9555_v10  ;;  %vm970_vm3 = vcmp.lt.f32.partialorder %v7635_v23, %v8180_v4 }
 0x339   :  { %vm3286_vm9 = vmand %vm3126_vm10, %vm10298_vm5  ;;  %v3350_v39 = vsel %vm3222_vm4, %v7432_v24, 0.0  ;;  %v1834_v40 = vpack.c.bf16 %v4455_v45, %v4455_v45 }
 0x33a   :  { %v3414_v41 = vsel %vm3286_vm9, %v7399_v49, 0.0  ;;  %vm3971_vm1 = vmand %vm3811_vm11, %vm10300_vm14  ;;  %v3487_v37 = vadd.f32 %v3486_v25, %v3350_v39  ;;  %v8244_v25 = vpop.permute.xlu2 %448  ;;  %vm10304_vm11 = vnez %v10064_v6 }
 0x33b   :  { %v3571_v20 = vadd.f32 %v3570_v44, %v3414_v41  ;;  %v4099_v29 = vsel %vm3971_vm1, %v7399_v49, 0.0  ;;  %vm10301_vm2 = vmmov %vm10300_vm14  ;;  %v2107_v7 = vunpack.c.l.b16 %v1834_v40  ;;  %v10313_v49 = vld [vmem:[#allocation20_spill] sm:$0xff] }
 0x33c   :  { %vm3907_vm15 = vmand %vm3747_vm0, %vm10301_vm2  ;;  %v4256_v17 = vadd.f32 %v4255_v48, %v4099_v29  ;;  %v2605_v44 = vpop.f32.mrf.mxu2 }
 0x33d   :  { %v4035_v45 = vsel %vm3907_vm15, %v7432_v24, 0.0  ;;  %v2445_v8 = vpop.f32.mrf.mxu0  ;;  %v2774_v54 = vpop.f32.mrf.mxu1  ;;  %v2174_v15 = vpack.c.b16 %v2108_v19, %v2107_v7  ;;  %vm8240_vm10 = vmor %vm970_vm3, %vm8211_vm12  ;;  %vm3127_vm9 = vcmp.eq.f32.partialorder %v2605_v44, %v5294_v55  ;;  %v10308_v7 = vld [vmem:[#allocation44_spill] sm:$0xff] }
 0x33e   :  { %v4172_v32 = vadd.f32 %v4171_v61, %v4035_v45  ;;  %vm3063_vm4 = vcmp.eq.f32.partialorder %v2445_v8, %v5294_v55  ;;  %vm3748_vm7 = vcmp.eq.f32.partialorder %v2774_v54, %v5299_v60  ;;  %v2934_v29 = vpop.f32.mrf.mxu3  ;;  %v10305_v8 = vld [vmem:[#allocation51_spill] sm:$0xff]  ;;  %vm3287_vm2 = vmand %vm3127_vm9, %vm10304_vm11  ;;  %v4391_v27 = vsel %vm8240_vm10, 1.0, %v9555_v10 }
 0x33f   :  { %vm3223_vm0 = vmand %vm3063_vm4, %vm10304_vm11  ;;  %2634 = vmatmul.bf16.gmra.mxu2 %v2174_v15  ;;  %2963 = vmatmul.bf16.gmra.mxu3 %v2174_v15  ;;  %vm3812_vm14 = vcmp.eq.f32.partialorder %v2934_v29, %v5299_v60  ;;  %vm10306_vm12 = vcmp.gt.f32.partialorder %v10305_v8, 0.5  ;;  %v3415_v54 = vsel %vm3287_vm2, %v7401_v0, 0.0  ;;  %vm1100_vm4 = vcmp.eq.f32.partialorder %v7635_v23, %v8244_v25 }
 0x340   :  { %v3351_v24 = vsel %vm3223_vm0, %v7548_v46, 0.0  ;;  %vm3908_vm1 = vmand %vm3748_vm7, %vm10306_vm12  ;;  %v3572_v39 = vadd.f32 %v3571_v20, %v3415_v54  ;;  %vm10309_vm9 = vcmp.gt.f32.partialorder %v10308_v7, 0.0  ;;  %v1770_v20 = vpack.c.bf16 %v4391_v27, %v4391_v27  ;;  %v10315_v54 = vld [vmem:[#allocation82_spill] sm:$0xff] }
 0x341   :  { %v3488_v61 = vadd.f32 %v3487_v37, %v3351_v24  ;;  %v4036_v48 = vsel %vm3908_vm1, %v7548_v46, 0.0  ;;  %vm10307_vm15 = vmmov %vm10306_vm12  ;;  %vm10312_vm10 = vcmp.gt.f32.partialorder %v10282_v53, 0.0 }
 0x342   :  { %vm3972_vm3 = vmand %vm3812_vm14, %vm10307_vm15  ;;  %v4173_v15 = vadd.f32 %v4172_v32, %v4036_v48  ;;  %v2043_v24 = vunpack.c.l.b16 %v1770_v20 }
 0x343   :  { %v4100_v40 = vsel %vm3972_vm3, %v7401_v0, 0.0  ;;  %vm8273_vm14 = vmand %vm1100_vm4, %vm10309_vm9  ;;  %v8280_v0 = vpop.permute.xlu0 %454  ;;  %vm10314_vm4 = vnez %v10313_v49  ;;  %v10435_v49 = vmov 0 }
 0x344   :  { %v4257_v19 = vadd.f32 %v4256_v17, %v4100_v40  ;;  %v8265_v41 = vpop.permute.xlu1 %442  ;;  %v2607_v17 = vpop.f32.mrf.mxu2 }
 0x345   :  { %vm971_vm7 = vcmp.lt.f32.partialorder %v7635_v23, %v8265_v41  ;;  %vm1099_vm0 = vcmp.eq.f32.partialorder %v7635_v23, %v8265_v41  ;;  %v2447_v46 = vpop.f32.mrf.mxu0  ;;  %v2776_v37 = vpop.f32.mrf.mxu1  ;;  %vm3128_vm15 = vcmp.eq.f32.partialorder %v2607_v17, %v5294_v55 }
 0x346   :  { %vm1259_vm12 = vmand %vm1099_vm0, %vm10312_vm10  ;;  %vm3064_vm1 = vcmp.eq.f32.partialorder %v2447_v46, %v5294_v55  ;;  %v2936_v32 = vpop.f32.mrf.mxu3  ;;  %vm3749_vm11 = vcmp.eq.f32.partialorder %v2776_v37, %v5299_v60  ;;  %vm1101_vm10 = vcmp.eq.f32.partialorder %v7635_v23, %v8280_v0 }
 0x347   :  { %vm1387_vm2 = vmor %vm971_vm7, %vm1259_vm12  ;;  %vm3813_vm3 = vcmp.eq.f32.partialorder %v2936_v32, %v5299_v60  ;;  %vm10316_vm7 = vcmp.gt.f32.partialorder %v10315_v54, 0.5 }
 0x348   :  { %vm3224_vm9 = vmand %vm3064_vm1, %vm10314_vm4  ;;  %v4392_v44 = vsel %vm1387_vm2, 1.0, %v9555_v10  ;;  %vm1164_vm1 = vcmp.eq.f32.partialorder %v7531_v31, %v8203_v50 }
 0x349   :  { %vm3288_vm0 = vmand %vm3128_vm15, %vm10314_vm4  ;;  %v3352_v53 = vsel %vm3224_vm9, %v7461_v11, 0.0  ;;  %v1771_v29 = vpack.c.bf16 %v4392_v44, %v4392_v44  ;;  %vm972_vm9 = vcmp.lt.f32.partialorder %v7635_v23, %v8244_v25  ;;  %v8321_v44 = vpop.permute.xlu2 %854 }
 0x34a   :  { %v3416_v48 = vsel %vm3288_vm0, %v7416_v56, 0.0  ;;  %vm3973_vm12 = vmand %vm3813_vm3, %vm10316_vm7  ;;  %v3489_v27 = vadd.f32 %v3488_v61, %v3352_v53  ;;  %vm973_vm3 = vcmp.lt.f32.partialorder %v7635_v23, %v8280_v0  ;;  %vm10319_vm0 = vcmp.gt.f32.partialorder %v10084_v14, 0.0  ;;  %10321 = vst [vmem:[#allocation53_spill] sm:$0xff] %v8321_v44 }
 0x34b   :  { %v8298_v40 = vadd.f32 %v3572_v39, %v3416_v48  ;;  %v4101_v46 = vsel %vm3973_vm12, %v7416_v56, 0.0  ;;  %vm10317_vm2 = vmmov %vm10316_vm7  ;;  %v2044_v37 = vunpack.c.l.b16 %v1771_v29 }
 0x34c   :  { %vm3909_vm15 = vmand %vm3749_vm11, %vm10317_vm2  ;;  %v8305_v20 = vadd.f32 %v4257_v19, %v4101_v46  ;;  %v3490_v17 = vrot.slane %v3489_v27, 4  ;;  %vm10320_vm11 = vcmp.gt.f32.partialorder %v10308_v7, 0.0  ;;  %vm1036_vm2 = vcmp.lt.f32.partialorder %v7531_v31, %v8203_v50 }
 0x34d   :  { %v4037_v32 = vsel %vm3909_vm15, %v7461_v11, 0.0  ;;  %vm1261_vm7 = vmand %vm1101_vm10, %vm10319_vm0  ;;  %v2142_v61 = vpack.c.b16 %v2044_v37, %v2043_v24 }
 0x34e   :  { %10318 = vst [vmem:[#allocation47_spill] sm:$0xff] %v8305_v20  ;;  %vm1324_vm12 = vmand %vm1164_vm1, %vm10320_vm11  ;;  %v4174_v56 = vadd.f32 %v4173_v15, %v4037_v32  ;;  %v3491_v39 = vadd.f32 %v3490_v17, %v3489_v27  ;;  %v10340_v20 = vld [vmem:[#allocation24_spill] sm:$0xff] }
 0x34f   :  { %vm1388_vm15 = vmor %vm972_vm9, %vm8273_vm14  ;;  %2474 = vmatmul.bf16.gmra.mxu0 %v2142_v61  ;;  %2803 = vmatmul.bf16.gmra.mxu1 %v2142_v61  ;;  %vm3621_vm9 = vcmask 1042434  }
 0x350   :  { %v4175_v11 = vrot.slane %v4174_v56, 4  ;;  %vm1389_vm5 = vmor %vm973_vm3, %vm1261_vm7  ;;  %v3492_v19 = vrot.slane %v3491_v39, 2  ;;  %v4393_v7 = vsel %vm1388_vm15, 1.0, %v9555_v10 }
 0x351   :  { %vm1452_vm10 = vmor %vm1036_vm2, %vm1324_vm12  ;;  %v4394_v29 = vsel %vm1389_vm5, 1.0, %v9555_v10  ;;  %v1772_v37 = vpack.c.bf16 %v4393_v7, %v4393_v7 }
 0x352   :  { %v4176_v53 = vadd.f32 %v4175_v11, %v4174_v56  ;;  %v3493_v15 = vadd.f32 %v3492_v19, %v3491_v39  ;;  %v4457_v17 = vsel %vm1452_vm10, 1.0, %v9555_v10  ;;  %v1773_v61 = vpack.c.bf16 %v4394_v29, %v4394_v29  ;;  %vm10323_vm5 = vmmov %vm10319_vm0 }
 0x353   :  { %vm1167_vm0 = vcmp.eq.f32.partialorder %v7531_v31, %v8321_v44  ;;  %v1836_v11 = vpack.c.bf16 %v4457_v17, %v4457_v17 }
 0x354   :  { %v4177_v24 = vrot.slane %v4176_v53, 2  ;;  %v2610_v48 = vpop.f32.mrf.mxu2  ;;  %v2939_v27 = vpop.f32.mrf.mxu3  ;;  %v3494_v46 = vrot.slane %v3493_v15, 1  ;;  %v2046_v29 = vunpack.c.l.b16 %v1773_v61 }
 0x355   :  { %v8325_v45 = vpop.permute.xlu1 %842  ;;  %vm3129_vm7 = vcmp.eq.f32.partialorder %v2610_v48, %v5294_v55  ;;  %vm3814_vm12 = vcmp.eq.f32.partialorder %v2939_v27, %v5299_v60  ;;  %v8350_v48 = vpop.permute.xlu2 %466 }
 0x356   :  { %10322 = vst [vmem:[#allocation26_spill] sm:$0xff] %v8325_v45  ;;  %v4178_v32 = vadd.f32 %v4177_v24, %v4176_v53  ;;  %vm1037_vm14 = vcmp.lt.f32.partialorder %v7531_v31, %v8325_v45  ;;  %vm1165_vm1 = vcmp.eq.f32.partialorder %v7531_v31, %v8325_v45  ;;  %v3495_v56 = vadd.f32 %v3494_v46, %v3493_v15  ;;  %v10324_v24 = vld [vmem:[#allocation46_spill] sm:$0xff]  ;;  %v10326_v46 = vld [vmem:[#allocation59_spill] sm:$0xff] }
 0x357   :  { %vm1325_vm3 = vmand %vm1165_vm1, %vm10323_vm5  ;;  %v2045_v53 = vunpack.c.l.b16 %v1772_v37  ;;  %vm10327_vm2 = vcmp.gt.f32.partialorder %v10326_v46, 0.0  ;;  %10330 = vst [vmem:[#allocation60_spill] sm:$0xff] %v8350_v48  ;;  %v10331_v37 = vld [vmem:[#allocation19_spill] sm:$0xff]  ;;  %vm10336_vm1 = vcmp.gt.f32.partialorder %v10106_v43, 0.5 }
 0x358   :  { %v4179_v39 = vrot.slane %v4178_v32, 1  ;;  %v3605_v19 = vmul.f32 %v7430_v33, %v3495_v56  ;;  %vm1453_vm11 = vmor %vm1037_vm14, %vm1325_vm3 }
 0x359   :  { %v4458_v15 = vsel %vm1453_vm11, 1.0, %v9555_v10  ;;  %vm8346_vm15 = vmand %vm1167_vm0, %vm10327_vm2  ;;  %vm1039_vm11 = vcmp.lt.f32.partialorder %v7531_v31, %v8321_v44  ;;  %vm10342_vm2 = vcmp.gt.f32.partialorder %v10117_v52, 0.5 }
 0x35a   :  { %v4180_v7 = vadd.f32 %v4179_v39, %v4178_v32  ;;  %v8342_v14 = vsel %vm3621_vm9, %v3605_v19, %v10324_v24  ;;  %v1837_v56 = vpack.c.bf16 %v4458_v15, %v4458_v15  ;;  %v10332_v39 = vld [vmem:[#allocation55_spill] sm:$0xff]  ;;  %v2109_v24 = vunpack.c.l.b16 %v1836_v11  ;;  %vm8361_vm5 = vmand %vm3814_vm12, %vm10336_vm1 }
 0x35b   :  { %10325 = vst [vmem:[#allocation54_spill] sm:$0xff] %v8342_v14  ;;  %vm10333_vm10 = vnez %v10332_v39  ;;  %v2143_v11 = vpack.c.b16 %v2046_v29, %v2045_v53  ;;  %vm1103_vm12 = vcmp.eq.f32.partialorder %v7635_v23, %v8350_v48  ;;  %v4102_v53 = vsel %vm8361_vm5, %v7663_v47, 0.0 }
 0x35c   :  { %v4290_v32 = vmul.f32 %v10331_v37, %v4180_v7  ;;  %vm8355_vm14 = vmand %vm3129_vm7, %vm10333_vm10  ;;  %v2612_v61 = vpop.f32.mrf.mxu2  ;;  %v2941_v19 = vpop.f32.mrf.mxu3  ;;  %v2110_v7 = vunpack.c.l.b16 %v1837_v56  ;;  %vm10343_vm5 = vcmp.gt.f32.partialorder %v10326_v46, 0.0 }
 0x35d   :  { %vm3130_vm3 = vcmp.eq.f32.partialorder %v2612_v61, %v5294_v55  ;;  %vm3815_vm0 = vcmp.eq.f32.partialorder %v2941_v19, %v5299_v60  ;;  %v2450_v37 = vpop.f32.mrf.mxu0  ;;  %v2779_v33 = vpop.f32.mrf.mxu1  ;;  %v3417_v61 = vsel %vm8355_vm14, %v7663_v47, 0.0  ;;  %vm975_vm14 = vcmp.lt.f32.partialorder %v7635_v23, %v8350_v48 }
 0x35e   :  { %vm3290_vm7 = vmand %vm3130_vm3, %vm10114_vm13  ;;  %v8375_v8 = vsel %vm3621_vm9, %v4290_v32, %v10340_v20  ;;  %v2175_v56 = vpack.c.b16 %v2110_v7, %v2109_v24  ;;  %v10351_v32 = vld [vmem:[#allocation62_spill] sm:$0xff] }
 0x35f   :  { %10341 = vst [vmem:[#allocation27_spill] sm:$0xff] %v8375_v8  ;;  %v3418_v19 = vsel %vm3290_vm7, %v7540_v59, 0.0  ;;  %vm3975_vm1 = vmand %vm3815_vm0, %vm10342_vm2  ;;  %2479 = vmatmul.bf16.gmra.mxu0 %v2143_v11  ;;  %2808 = vmatmul.bf16.gmra.mxu1 %v2143_v11  ;;  %vm3065_vm0 = vcmp.eq.f32.partialorder %v2450_v37, %v5294_v55  ;;  %vm3750_vm7 = vcmp.eq.f32.partialorder %v2779_v33, %v5299_v60 }
 0x360   :  { %v8386_v29 = vadd.f32 %v3418_v19, %v3417_v61  ;;  %v4103_v45 = vsel %vm3975_vm1, %v7540_v59, 0.0  ;;  %vm1455_vm9 = vmor %vm1039_vm11, %vm8346_vm15  ;;  %2639 = vmatmul.bf16.gmra.mxu2 %v2175_v56  ;;  %2968 = vmatmul.bf16.gmra.mxu3 %v2175_v56 }
 0x361   :  { %v8394_v20 = vadd.f32 %v4103_v45, %v4102_v53  ;;  %vm1263_vm3 = vmand %vm1103_vm12, %vm10343_vm5  ;;  %v4460_v59 = vsel %vm1455_vm9, 1.0, %v9555_v10  ;;  %vm10348_vm12 = vcmp.gt.f32.partialorder %v10106_v43, 0.5 }
 0x362   :  { %vm8406_vm15 = vmor %vm975_vm14, %vm1263_vm3  ;;  %v1839_v37 = vpack.c.bf16 %v4460_v59, %v4460_v59 }
 0x363   :  { %vm8412_vm11 = vmand %vm3065_vm0, %vm10333_vm10  ;;  %vm10352_vm10 = vcmp.gt.f32.partialorder %v10351_v32, 0.0  ;;  %v4396_v61 = vsel %vm8406_vm15, 1.0, %v9555_v10 }
 0x364   :  { %v8416_v14 = vpop.permute.xlu1 %848  ;;  %vm8420_vm2 = vmand %vm3750_vm7, %vm10348_vm12  ;;  %vm10353_vm12 = vcmp.gt.f32.partialorder %v10117_v52, 0.5  ;;  %v2112_v24 = vunpack.c.l.b16 %v1839_v37  ;;  %v1775_v45 = vpack.c.bf16 %v4396_v61, %v4396_v61 }
 0x365   :  { %vm1038_vm1 = vcmp.lt.f32.partialorder %v7531_v31, %v8416_v14  ;;  %vm1166_vm9 = vcmp.eq.f32.partialorder %v7531_v31, %v8416_v14  ;;  %v2452_v33 = vpop.f32.mrf.mxu0  ;;  %v2781_v17 = vpop.f32.mrf.mxu1  ;;  %v3353_v31 = vsel %vm8412_vm11, %v7642_v62, 0.0  ;;  %v4038_v7 = vsel %vm8420_vm2, %v7642_v62, 0.0 }
 0x366   :  { %vm1326_vm14 = vmand %vm1166_vm9, %vm10352_vm10  ;;  %vm3066_vm5 = vcmp.eq.f32.partialorder %v2452_v33, %v5294_v55  ;;  %vm3751_vm3 = vcmp.eq.f32.partialorder %v2781_v17, %v5299_v60  ;;  %v2048_v32 = vunpack.c.l.b16 %v1775_v45 }
 0x367   :  { %vm1454_vm0 = vmor %vm1038_vm1, %vm1326_vm14 }
 0x368   :  { %vm3226_vm7 = vmand %vm3066_vm5, %vm10114_vm13  ;;  %v4459_v43 = vsel %vm1454_vm0, 1.0, %v9555_v10  ;;  %vm10356_vm5 = vcmp.gt.f32.partialorder %v5358_v9, 0.5 }
 0x369   :  { %v3354_v39 = vsel %vm3226_vm7, %v7757_v16, 0.0  ;;  %vm3911_vm8 = vmand %vm3751_vm3, %vm10353_vm12  ;;  %v1838_v27 = vpack.c.bf16 %v4459_v43, %v4459_v43 }
 0x36a   :  { %v3496_v11 = vadd.f32 %v3354_v39, %v3353_v31  ;;  %v4039_v15 = vsel %vm3911_vm8, %v7757_v16, 0.0  ;;  %vm10354_vm8 = vmmov %vm10352_vm10  ;;  %vm10355_vm10 = vnez %v9576_v2  ;;  %v10359_v2 = vld [vmem:[#allocation61_spill] sm:$0xff] }
 0x36b   :  { %v4181_v19 = vadd.f32 %v4039_v15, %v4038_v7  ;;  %v2111_v56 = vunpack.c.l.b16 %v1838_v27 }
 0x36c   :  { %v8448_v53 = vpop.permute.xlu1 %460 }
 0x36d   :  { %vm974_vm13 = vcmp.lt.f32.partialorder %v7635_v23, %v8448_v53  ;;  %vm1102_vm11 = vcmp.eq.f32.partialorder %v7635_v23, %v8448_v53  ;;  %v2455_v52 = vpop.f32.mrf.mxu0  ;;  %v2784_v59 = vpop.f32.mrf.mxu1  ;;  %v2176_v62 = vpack.c.b16 %v2112_v24, %v2111_v56 }
 0x36e   :  { %vm1262_vm2 = vmand %vm1102_vm11, %vm10354_vm8  ;;  %vm3067_vm1 = vcmp.eq.f32.partialorder %v2455_v52, %v5294_v55  ;;  %vm3752_vm15 = vcmp.eq.f32.partialorder %v2784_v59, %v5299_v60 }
 0x36f   :  { %vm1390_vm9 = vmor %vm974_vm13, %vm1262_vm2 }
 0x370   :  { %v4395_v16 = vsel %vm1390_vm9, 1.0, %v9555_v10  ;;  %vm3227_vm14 = vmand %vm3067_vm1, %vm10355_vm10  ;;  %2644 = vmatmul.bf16.gmra.mxu2 %v2176_v62  ;;  %2973 = vmatmul.bf16.gmra.mxu3 %v2176_v62  ;;  %vm10358_vm1 = vnez %v10144_v51  ;;  %vm10360_vm9 = vcmp.gt.f32.partialorder %v10359_v2, 0.5 }
 0x371   :  { %v1774_v23 = vpack.c.bf16 %v4395_v16, %v4395_v16  ;;  %v3355_v47 = vsel %vm3227_vm14, %v7752_v22, 0.0  ;;  %vm3912_vm3 = vmand %vm3752_vm15, %vm10356_vm5 }
 0x372   :  { %v3497_v46 = vadd.f32 %v3496_v11, %v3355_v47  ;;  %v4040_v33 = vsel %vm3912_vm3, %v7752_v22, 0.0  ;;  %vm10357_vm13 = vmmov %vm10356_vm5 }
 0x373   :  { %v2615_v17 = vpop.f32.mrf.mxu2  ;;  %v2944_v37 = vpop.f32.mrf.mxu3  ;;  %v4182_v43 = vadd.f32 %v4181_v19, %v4040_v33  ;;  %v2047_v10 = vunpack.c.l.b16 %v1774_v23 }
 0x374   :  { %vm3131_vm0 = vcmp.eq.f32.partialorder %v2615_v17, %v5294_v55  ;;  %vm3816_vm7 = vcmp.eq.f32.partialorder %v2944_v37, %v5299_v60 }
 0x375   :  { %vm3291_vm12 = vmand %vm3131_vm0, %vm10355_vm10  ;;  %v2457_v39 = vpop.f32.mrf.mxu0  ;;  %v2786_v27 = vpop.f32.mrf.mxu1  ;;  %v2144_v22 = vpack.c.b16 %v2048_v32, %v2047_v10 }
 0x376   :  { %v3419_v31 = vsel %vm3291_vm12, %v7698_v34, 0.0  ;;  %vm3976_vm11 = vmand %vm3816_vm7, %vm10357_vm13  ;;  %vm3068_vm8 = vcmp.eq.f32.partialorder %v2457_v39, %v5294_v55  ;;  %vm3753_vm2 = vcmp.eq.f32.partialorder %v2786_v27, %v5299_v60 }
 0x377   :  { %v3581_v24 = vadd.f32 %v8386_v29, %v3419_v31  ;;  %v4104_v7 = vsel %vm3976_vm11, %v7698_v34, 0.0  ;;  %vm3228_vm15 = vmand %vm3068_vm8, %vm10358_vm1  ;;  %2484 = vmatmul.bf16.gmra.mxu0 %v2144_v22  ;;  %2813 = vmatmul.bf16.gmra.mxu1 %v2144_v22  ;;  %vm10362_vm11 = vnez %v10161_v36 }
 0x378   :  { %v4266_v11 = vadd.f32 %v8394_v20, %v4104_v7  ;;  %v3356_v9 = vsel %vm3228_vm15, %v7767_v1, 0.0  ;;  %vm3913_vm10 = vmand %vm3753_vm2, %vm10360_vm9  ;;  %vm10363_vm2 = vcmp.gt.f32.partialorder %v10164_v18, 0.5 }
 0x379   :  { %v3498_v15 = vadd.f32 %v3497_v46, %v3356_v9  ;;  %v4041_v29 = vsel %vm3913_vm10, %v7767_v1, 0.0  ;;  %vm10361_vm0 = vmmov %vm10360_vm9 }
 0x37a   :  { %v4183_v34 = vadd.f32 %v4182_v43, %v4041_v29 }
 0x37b   :  { %v2617_v61 = vpop.f32.mrf.mxu2  ;;  %v2946_v19 = vpop.f32.mrf.mxu3 }
 0x37c   :  { %vm3132_vm14 = vcmp.eq.f32.partialorder %v2617_v61, %v5294_v55  ;;  %vm3817_vm5 = vcmp.eq.f32.partialorder %v2946_v19, %v5299_v60  ;;  %v10365_v19 = vld [vmem:[#allocation88_spill] sm:$0xff] }
 0x37d   :  { %vm3292_vm3 = vmand %vm3132_vm14, %vm10358_vm1 }
 0x37e   :  { %v3420_v20 = vsel %vm3292_vm3, %v7821_v30, 0.0  ;;  %vm3977_vm7 = vmand %vm3817_vm5, %vm10361_vm0  ;;  %vm3096_vm3 = vcmp.eq.f32.partialorder %v10365_v19, %v5294_v55 }
 0x37f   :  { %v3582_v56 = vadd.f32 %v3581_v24, %v3420_v20  ;;  %v4105_v52 = vsel %vm3977_vm7, %v7821_v30, 0.0  ;;  %vm10364_vm14 = vmmov %vm10363_vm2  ;;  %v10366_v20 = vld [vmem:[#allocation89_spill] sm:$0xff] }
 0x380   :  { %v4267_v59 = vadd.f32 %v4266_v11, %v4105_v52  ;;  %vm3256_vm0 = vmand %vm3096_vm3, %vm10314_vm4  ;;  %vm3781_vm7 = vcmp.eq.f32.partialorder %v10366_v20, %v5299_v60 }
 0x383   :  { %v2620_v1 = vpop.f32.mrf.mxu2  ;;  %v2949_v62 = vpop.f32.mrf.mxu3 }
 0x384   :  { %vm3133_vm12 = vcmp.eq.f32.partialorder %v2620_v1, %v5294_v55  ;;  %vm3818_vm13 = vcmp.eq.f32.partialorder %v2949_v62, %v5299_v60  ;;  %v2460_v51 = vpop.f32.mrf.mxu0  ;;  %v2789_v45 = vpop.f32.mrf.mxu1 }
 0x385   :  { %vm3293_vm8 = vmand %vm3133_vm12, %vm10362_vm11  ;;  %vm3069_vm15 = vcmp.eq.f32.partialorder %v2460_v51, %v5294_v55  ;;  %vm3754_vm9 = vcmp.eq.f32.partialorder %v2789_v45, %v5299_v60  ;;  %vm10368_vm12 = vcmp.gt.f32.partialorder %v10315_v54, 0.5  ;;  %v10369_v45 = vld [vmem:[#allocation65_spill] sm:$0xff]  ;;  %v10428_v54 = vld [vmem:[#allocation78_spill] sm:$0xff] }
 0x386   :  { %v3421_v16 = vsel %vm3293_vm8, %v7895_v42, 0.0  ;;  %vm3978_vm1 = vmand %vm3818_vm13, %vm10363_vm2 }
 0x387   :  { %v8500_v30 = vadd.f32 %v3582_v56, %v3421_v16  ;;  %v4106_v23 = vsel %vm3978_vm1, %v7895_v42, 0.0  ;;  %vm3229_vm10 = vmand %vm3069_vm15, %vm10362_vm11 }
 0x388   :  { %v8505_v47 = vadd.f32 %v4267_v59, %v4106_v23  ;;  %v3357_v46 = vsel %vm3229_vm10, %v7940_v28, 0.0  ;;  %vm3914_vm5 = vmand %vm3754_vm9, %vm10364_vm14  ;;  %v10367_v59 = vld [vmem:[#allocation58_spill] sm:$0xff]  ;;  %v10370_v23 = vld [vmem:[#allocation17_spill] sm:$0xff] }
 0x389   :  { %v8510_v33 = vadd.f32 %v3498_v15, %v3357_v46  ;;  %v4042_v17 = vsel %vm3914_vm5, %v7940_v28, 0.0  ;;  %v3384_v1 = vsel %vm3256_vm0, %v10367_v59, 0.0  ;;  %vm3941_vm13 = vmand %vm3781_vm7, %vm10368_vm12  ;;  %vm3112_vm11 = vcmp.eq.f32.partialorder %v10370_v23, %v5294_v55  ;;  %v10380_v23 = vld [vmem:[#allocation64_spill] sm:$0xff] }
 0x38a   :  { %v8513_v37 = vadd.f32 %v4183_v34, %v4042_v17  ;;  %v3531_v16 = vadd.f32 %v10369_v45, %v3384_v1  ;;  %v4069_v46 = vsel %vm3941_vm13, %v10367_v59, 0.0  ;;  %v10371_v17 = vld [vmem:[#allocation49_spill] sm:$0xff]  ;;  %vm8561_vm1 = vmand %vm3112_vm11, %vm10314_vm4  ;;  %v10374_v1 = vld [vmem:[#allocation86_spill] sm:$0xff] }
 0x38b   :  { %v2622_v10 = vpop.f32.mrf.mxu2  ;;  %v2951_v42 = vpop.f32.mrf.mxu3  ;;  %vm3797_vm8 = vcmp.eq.f32.partialorder %v10371_v17, %v5299_v60  ;;  %v4216_v45 = vadd.f32 %v10374_v1, %v4069_v46  ;;  %vm10375_vm10 = vmmov %vm10368_vm12  ;;  %v3400_v46 = vsel %vm8561_vm1, %v10380_v23, 0.0  ;;  %vm10381_vm12 = vcmp.gt.f32.partialorder %v10176_v63, 0.5 }
 0x38c   :  { %v2462_v32 = vpop.f32.mrf.mxu0  ;;  %v2791_v43 = vpop.f32.mrf.mxu1  ;;  %vm3134_vm2 = vcmp.eq.f32.partialorder %v2622_v10, %v5294_v55  ;;  %vm3819_vm15 = vcmp.eq.f32.partialorder %v2951_v42, %v5299_v60  ;;  %v3532_v20 = vrot.slane %v3531_v16, 4  ;;  %vm8570_vm14 = vmand %vm3797_vm8, %vm10375_vm10  ;;  %v10393_v1 = vmov 0 }
 0x38d   :  { %vm3070_vm9 = vcmp.eq.f32.partialorder %v2462_v32, %v5294_v55  ;;  %vm3755_vm5 = vcmp.eq.f32.partialorder %v2791_v43, %v5299_v60  ;;  %vm8578_vm0 = vmand %vm3134_vm2, %vm10173_vm6 }
 0x38e   :  { %vm8592_vm13 = vmand %vm3819_vm15, %vm10381_vm12  ;;  %vm10389_vm15 = vnez %v9619_v21  ;;  %v3533_v19 = vadd.f32 %v3532_v20, %v3531_v16  ;;  %v10401_v21 = vld [vmem:[#allocation73_spill] sm:$0xff]  ;;  %v10403_v20 = vmov 0 }
 0x38f   :  { %vm8598_vm11 = vmand %vm3070_vm9, %vm10173_vm6  ;;  %vm10392_vm9 = vcmp.gt.f32.partialorder %v5567_v12, 0.5 }
 0x390   :  { %vm10386_vm2 = vmmov %vm10381_vm12  ;;  %v3534_v12 = vrot.slane %v3533_v19, 2 }
 0x391   :  { %vm8608_vm1 = vmand %vm3755_vm5, %vm10386_vm2 }
 0x39a   :  { %v2625_v39 = vpop.f32.mrf.mxu2  ;;  %v2954_v27 = vpop.f32.mrf.mxu3 }
 0x39b   :  { %vm3135_vm3 = vcmp.eq.f32.partialorder %v2625_v39, %v5294_v55  ;;  %vm3820_vm7 = vcmp.eq.f32.partialorder %v2954_v27, %v5299_v60  ;;  %v4085_v27 = vsel %vm8570_vm14, %v10380_v23, 0.0  ;;  %v10395_v23 = vld [vmem:[#allocation15_spill] sm:$0xff]  ;;  %v10437_v39 = vld [vmem:[#allocation48_spill] sm:$0xff] }
 0x39c   :  { %vm8614_vm10 = vmand %vm3135_vm3, %vm10389_vm15  ;;  %v3552_v8 = vadd.f32 %v10395_v23, %v3400_v46 }
 0x39d   :  { %v2465_v31 = vpop.f32.mrf.mxu0  ;;  %v2794_v36 = vpop.f32.mrf.mxu1  ;;  %v10391_v26 = vsel %vm8614_vm10, 4294967295, %v10390_v26  ;;  %vm8621_vm12 = vmand %vm3820_vm7, %vm10392_vm9 }
 0x39e   :  { %vm3071_vm8 = vcmp.eq.f32.partialorder %v2465_v31, %v5294_v55  ;;  %vm3756_vm6 = vcmp.eq.f32.partialorder %v2794_v36, %v5299_v60  ;;  %v4217_v31 = vrot.slane %v4216_v45, 4  ;;  %v10394_v1 = vsel %vm8621_vm12, 4294967295, %v10393_v1 }
 0x39f   :  { %vm8634_vm3 = vmand %vm3071_vm8, %vm10389_vm15  ;;  %v10396_v36 = vmov 0  ;;  %vm10402_vm15 = vnez %v10401_v21  ;;  %v3553_v23 = vrot.slane %v3552_v8, 4  ;;  %v10432_v21 = vld [vmem:[#allocation70_spill] sm:$0xff] }
 0x3a0   :  { %v10397_v36 = vsel %vm8634_vm3, 4294967295, %v10396_v36  ;;  %vm8645_vm4 = vmand %vm3756_vm6, %vm10392_vm9  ;;  %v8665_v46 = vadd.f32 %v4217_v31, %v4216_v45  ;;  %v4043_v43 = vsel %vm8608_vm1, %v10432_v21, 0.0  ;;  %vm10442_vm1 = vnez %v10394_v1 }
 0x3a1   :  { %v8735_v10 = vadd.f32 %v3553_v23, %v3552_v8  ;;  %v10448_v1 = vmov 0 }
 0x3a2   :  { %v2627_v18 = vpop.f32.mrf.mxu2  ;;  %v2956_v7 = vpop.f32.mrf.mxu3  ;;  %10409 = vst [vmem:[#allocation28_spill] sm:$0xff] %v8665_v46  ;;  %v10433_v46 = vld [vmem:[#allocation77_spill] sm:$0xff] }
 0x3a3   :  { %vm3136_vm14 = vcmp.eq.f32.partialorder %v2627_v18, %v5294_v55  ;;  %vm3821_vm5 = vcmp.eq.f32.partialorder %v2956_v7, %v5299_v60  ;;  %v10398_v18 = vld [vmem:[#allocation43_spill] sm:$0xff] }
 0x3a4   :  { %v4237_v7 = vadd.f32 %v10398_v18, %v4085_v27  ;;  %vm8653_vm3 = vmand %vm3136_vm14, %vm10402_vm15  ;;  %v10413_v27 = vmov 0  ;;  %v8711_v18 = vadd.f32 %v3534_v12, %v3533_v19 }
 0x3a5   :  { %v8515_v22 = vpop.f32.mrf.mxu0  ;;  %v8517_v24 = vpop.f32.mrf.mxu1  ;;  %v10404_v20 = vsel %vm8653_vm3, 4294967295, %v10403_v20 }
 0x3a6   :  { %vm3072_vm7 = vcmp.eq.f32.partialorder %v8515_v22, %v5294_v55  ;;  %vm3757_vm2 = vcmp.eq.f32.partialorder %v8517_v24, %v5299_v60  ;;  %v10405_v22 = vld [vmem:[#allocation72_spill] sm:$0xff]  ;;  %v10407_v24 = vmov 0  ;;  %v4238_v45 = vrot.slane %v4237_v7, 4  ;;  %10423 = vst [vmem:[#allocation63_spill] sm:$0xff] %v8711_v18 }
 0x3a7   :  { %vm10406_vm12 = vcmp.gt.f32.partialorder %v10405_v22, 0.5  ;;  %vm8669_vm9 = vmand %vm3072_vm7, %vm10402_vm15  ;;  %v10424_v22 = vld [vmem:[#allocation16_spill] sm:$0xff]  ;;  %v3358_v18 = vsel %vm8598_vm11, %v10432_v21, 0.0  ;;  %v10464_v21 = vld [vmem:[#allocation87_spill] sm:$0xff] }
 0x3a8   :  { %vm8659_vm10 = vmand %vm3821_vm5, %vm10406_vm12  ;;  %vm10415_vm5 = vnez %v10218_v35  ;;  %v3422_v48 = vsel %vm8578_vm0, %v10424_v22, 0.0  ;;  %vm10434_vm0 = vcmp.gt.f32.partialorder %v10433_v46, 0.5  ;;  %v8754_v8 = vadd.f32 %v4238_v45, %v4237_v7  ;;  %v10453_v7 = vld [vmem:[#allocation92_spill] sm:$0xff] }
 0x3a9   :  { %v10408_v24 = vsel %vm8659_vm10, 4294967295, %v10407_v24  ;;  %vm10412_vm14 = vmmov %vm10406_vm12  ;;  %v3584_v17 = vadd.f32 %v8500_v30, %v3422_v48  ;;  %v3500_v48 = vadd.f32 %v8510_v33, %v3358_v18  ;;  %v10445_v30 = vld [vmem:[#allocation91_spill] sm:$0xff] }
 0x3aa   :  { %v8523_v28 = vpop.f32.mrf.mxu2  ;;  %v8525_v2 = vpop.f32.mrf.mxu3  ;;  %vm8675_vm3 = vmand %vm3757_vm2, %vm10412_vm14  ;;  %vm10418_vm2 = vcmp.gt.f32.partialorder %v10220_v38, 0.5  ;;  %v4107_v38 = vsel %vm8592_vm13, %v10424_v22, 0.0  ;;  %vm10438_vm13 = vnez %v10391_v26  ;;  %v4108_v26 = vsel %vm10442_vm1, %v10437_v39, 0.0 }
 0x3ab   :  { %vm3137_vm8 = vcmp.eq.f32.partialorder %v8523_v28, %v5294_v55  ;;  %vm3822_vm6 = vcmp.eq.f32.partialorder %v8525_v2, %v5299_v60  ;;  %v10414_v27 = vsel %vm8675_vm3, 4294967295, %v10413_v27  ;;  %v10416_v2 = vmov 0 }
 0x3ac   :  { %vm8683_vm10 = vmand %vm3137_vm8, %vm10415_vm5  ;;  %v3423_v23 = vsel %vm10438_vm13, %v10437_v39, 0.0  ;;  %vm10447_vm1 = vnez %v10261_v57 }
 0x3ad   :  { %v8519_v11 = vpop.f32.mrf.mxu0  ;;  %v8521_v9 = vpop.f32.mrf.mxu1  ;;  %v10417_v2 = vsel %vm8683_vm10, 4294967295, %v10416_v2  ;;  %vm8693_vm14 = vmand %vm3822_vm6, %vm10418_vm2 }
 0x3ae   :  { %vm3073_vm12 = vcmp.eq.f32.partialorder %v8519_v11, %v5294_v55  ;;  %vm3758_vm7 = vcmp.eq.f32.partialorder %v8521_v9, %v5299_v60  ;;  %vm10425_vm6 = vmmov %vm10418_vm2  ;;  %v4110_v28 = vsel %vm8693_vm14, %v10464_v21, 0.0 }
 0x3af   :  { %vm8701_vm8 = vmand %vm3073_vm12, %vm10415_vm5  ;;  %vm10429_vm5 = vnez %v10428_v54  ;;  %v10443_v54 = vmov 0 }
 0x3b0   :  { %vm8719_vm12 = vmand %vm3758_vm7, %vm10425_vm6 }
 0x3b2   :  { %v8531_v34 = vpop.f32.mrf.mxu2  ;;  %v8533_v61 = vpop.f32.mrf.mxu3 }
 0x3b3   :  { %vm3138_vm15 = vcmp.eq.f32.partialorder %v8531_v34, %v5294_v55  ;;  %vm3823_vm3 = vcmp.eq.f32.partialorder %v8533_v61, %v5299_v60  ;;  %v10440_v61 = vmov 0 }
 0x3b4   :  { %vm8725_vm2 = vmand %vm3138_vm15, %vm10429_vm5 }
 0x3b5   :  { %v8527_v15 = vpop.f32.mrf.mxu0  ;;  %v8529_v29 = vpop.f32.mrf.mxu1  ;;  %vm8748_vm7 = vmand %vm3823_vm3, %vm10434_vm0 }
 0x3b6   :  { %vm3759_vm10 = vcmp.eq.f32.partialorder %v8529_v29, %v5299_v60  ;;  %v10436_v49 = vsel %vm8748_vm7, 4294967295, %v10435_v49  ;;  %vm10439_vm11 = vcmp.eq.f32.partialorder %v8527_v15, %v5294_v55  ;;  %v4269_v15 = vadd.f32 %v8505_v47, %v4107_v38 }
 0x3b7   :  { %vm8767_vm3 = vmand %vm10439_vm11, %vm10429_vm5  ;;  %vm10446_vm11 = vnez %v10397_v36  ;;  %v4185_v29 = vadd.f32 %v8513_v37, %v4043_v43  ;;  %v4044_v47 = vsel %vm8645_vm4, %v10445_v30, 0.0  ;;  %vm10456_vm4 = vnez %v10272_v5 }
 0x3b8   :  { %v10441_v61 = vsel %vm8767_vm3, 4294967295, %v10440_v61  ;;  %vm8783_vm5 = vmand %vm3759_vm10, %vm10434_vm0  ;;  %vm10450_vm0 = vcmp.gt.f32.partialorder %v10265_v13, 0.5  ;;  %v4270_v36 = vadd.f32 %v4269_v15, %v4108_v26  ;;  %v10477_v5 = vmov 0 }
 0x3b9   :  { %v10444_v54 = vsel %vm8783_vm5, 4294967295, %v10443_v54  ;;  %v4186_v18 = vadd.f32 %v4185_v29, %v4044_v47  ;;  %v10489_v47 = vld [vmem:[#allocation85_spill] sm:$0xff] }
 0x3c2   :  { %v8548_v62 = vpop.f32.mrf.mxu2  ;;  %v8550_v51 = vpop.f32.mrf.mxu3 }
 0x3c3   :  { %vm3139_vm15 = vcmp.eq.f32.partialorder %v8548_v62, %v5294_v55  ;;  %vm3824_vm6 = vcmp.eq.f32.partialorder %v8550_v51, %v5299_v60  ;;  %v3574_v62 = vrot.slane %v8298_v40, 4  ;;  %v3359_v51 = vsel %vm10446_vm11, %v10445_v30, 0.0  ;;  %v10473_v30 = vld [vmem:[#allocation57_spill] sm:$0xff] }
 0x3c4   :  { %vm8796_vm3 = vmand %vm3139_vm15, %vm10447_vm1  ;;  %vm10454_vm11 = vnez %v10404_v20  ;;  %v3501_v46 = vadd.f32 %v3500_v48, %v3359_v51  ;;  %v3426_v11 = vsel %vm8725_vm2, %v10473_v30, 0.0 }
 0x3c5   :  { %v10449_v1 = vsel %vm8796_vm3, 4294967295, %v10448_v1  ;;  %vm8808_vm5 = vmand %vm3824_vm6, %vm10450_vm0  ;;  %vm10455_vm3 = vnez %v10408_v24  ;;  %vm10460_vm0 = vnez %v10414_v27  ;;  %vm10465_vm6 = vnez %v10417_v2 }
 0x3c6   :  { %v4109_v37 = vsel %vm10455_vm3, %v10453_v7, 0.0  ;;  %vm10461_vm3 = vcmp.gt.f32.partialorder %v10275_v3, 0.5  ;;  %v3425_v22 = vsel %vm10465_vm6, %v10464_v21, 0.0  ;;  %vm10469_vm6 = vcmp.gt.f32.partialorder %v10265_v13, 0.5  ;;  %v10482_v3 = vld [vmem:[#allocation39_spill] sm:$0xff] }
 0x3c7   :  { %vm10476_vm2 = vmmov %vm10461_vm3 }
 0x3ca   :  { %v8627_v63 = vpop.f32.mrf.mxu2  ;;  %v8629_v59 = vpop.f32.mrf.mxu3 }
 0x3cb   :  { %vm3140_vm13 = vcmp.eq.f32.partialorder %v8627_v63, %v5294_v55  ;;  %vm3825_vm10 = vcmp.eq.f32.partialorder %v8629_v59, %v5299_v60  ;;  %v3585_v63 = vadd.f32 %v3584_v17, %v3423_v23  ;;  %v3424_v59 = vsel %vm10454_vm11, %v10453_v7, 0.0  ;;  %v10468_v17 = vld [vmem:[#allocation21_spill] sm:$0xff]  ;;  %v10493_v7 = vld [vmem:[#allocation90_spill] sm:$0xff] }
 0x3cc   :  { %v8541_v56 = vpop.f32.mrf.mxu0  ;;  %v8543_v52 = vpop.f32.mrf.mxu1  ;;  %vm8822_vm7 = vmand %vm3140_vm13, %vm10456_vm4  ;;  %v4271_v23 = vadd.f32 %v4270_v36, %v4109_v37  ;;  %v3361_v2 = vsel %vm8701_vm8, %v10468_v17, 0.0  ;;  %v4046_v29 = vsel %vm8719_vm12, %v10468_v17, 0.0  ;;  %vm10481_vm12 = vnez %v10449_v1 }
 0x3cd   :  { %vm3075_vm15 = vcmp.eq.f32.partialorder %v8541_v56, %v5294_v55  ;;  %v10459_v56 = vld [vmem:[#allocation22_spill] sm:$0xff]  ;;  %vm8836_vm11 = vmand %vm3825_vm10, %vm10461_vm3  ;;  %v3586_v39 = vadd.f32 %v3585_v63, %v3424_v59  ;;  %vm10470_vm14 = vcmp.eq.f32.partialorder %v8543_v52, %v5299_v60  ;;  %v10486_v63 = vld [vmem:[#allocation52_spill] sm:$0xff] }
 0x3ce   :  { %v3360_v45 = vsel %vm8669_vm9, %v10459_v56, 0.0  ;;  %v4045_v20 = vsel %vm10460_vm0, %v10459_v56, 0.0  ;;  %vm8850_vm9 = vmand %vm3075_vm15, %vm10447_vm1  ;;  %v4272_v51 = vadd.f32 %v4271_v23, %v4110_v28 }
 0x3cf   :  { %vm8864_vm1 = vmand %vm10470_vm14, %vm10469_vm6  ;;  %v3502_v15 = vadd.f32 %v3501_v46, %v3360_v45  ;;  %v4187_v48 = vadd.f32 %v4186_v18, %v4045_v20  ;;  %v3587_v52 = vadd.f32 %v3586_v39, %v3425_v22  ;;  %vm10483_vm6 = vnez %v10482_v3  ;;  %v10499_v20 = vld [vmem:[#allocation50_spill] sm:$0xff] }
 0x3d0   :  { %v3363_v46 = vsel %vm8850_vm9, %v8180_v4, 0.0  ;;  %v4048_v45 = vsel %vm8864_vm1, %v8180_v4, 0.0 }
 0x3d1   :  { %v3503_v44 = vadd.f32 %v3502_v15, %v3361_v2  ;;  %v4188_v36 = vadd.f32 %v4187_v48, %v4046_v29  ;;  %v4113_v2 = vsel %vm8836_vm11, %v10493_v7, 0.0 }
 0x3d4   :  { %v8583_v32 = vpop.f32.mrf.mxu0  ;;  %v8585_v42 = vpop.f32.mrf.mxu1 }
 0x3d5   :  { %vm3076_vm13 = vcmp.eq.f32.partialorder %v8583_v32, %v5294_v55  ;;  %vm3761_vm10 = vcmp.eq.f32.partialorder %v8585_v42, %v5299_v60  ;;  %v3575_v42 = vadd.f32 %v3574_v62, %v8298_v40 }
 0x3d6   :  { %vm8878_vm8 = vmand %vm3076_vm13, %vm10456_vm4  ;;  %vm10479_vm13 = vnez %v10436_v49 }
 0x3d7   :  { %vm8892_vm3 = vmand %vm3761_vm10, %vm10476_vm2  ;;  %v4111_v32 = vsel %vm10479_vm13, %v10473_v30, 0.0  ;;  %vm10487_vm2 = vnez %v10441_v61  ;;  %vm10488_vm13 = vnez %v10444_v54  ;;  %v3428_v61 = vsel %vm8822_vm7, %v10493_v7, 0.0 }
 0x3d8   :  { %v10478_v5 = vsel %vm8892_vm3, 4294967295, %v10477_v5  ;;  %v3362_v49 = vsel %vm10487_vm2, %v10486_v63, 0.0  ;;  %v4047_v1 = vsel %vm10488_vm13, %v10486_v63, 0.0  ;;  %v4273_v59 = vadd.f32 %v4272_v51, %v4111_v32  ;;  %v10516_v51 = vld [vmem:[#allocation51_spill] sm:$0xff] }
 0x3d9   :  { %v3504_v16 = vadd.f32 %v3503_v44, %v3362_v49  ;;  %v4189_v56 = vadd.f32 %v4188_v36, %v4047_v1  ;;  %v3364_v39 = vsel %vm8878_vm8, %v8265_v41, 0.0  ;;  %vm10506_vm8 = vnez %v10478_v5  ;;  %v10520_v5 = vld [vmem:[#allocation47_spill] sm:$0xff] }
 0x3da   :  { %v4259_v44 = vrot.slane %v10520_v5, 4  ;;  %v3576_v4 = vrot.slane %v3575_v42, 2 }
 0x3db   :  { %v3505_v57 = vadd.f32 %v3504_v16, %v3363_v46  ;;  %v4190_v15 = vadd.f32 %v4189_v56, %v4048_v45  ;;  %v10528_v16 = vld [vmem:[#allocation53_spill] sm:$0xff]  ;;  %v10529_v45 = vld [vmem:[#allocation82_spill] sm:$0xff] }
 0x3dc   :  { %v8707_v9 = vpop.f32.mrf.mxu0  ;;  %v8709_v34 = vpop.f32.mrf.mxu1 }
 0x3dd   :  { %vm3077_vm15 = vcmp.eq.f32.partialorder %v8707_v9, %v5294_v55  ;;  %vm3762_vm0 = vcmp.eq.f32.partialorder %v8709_v34, %v5299_v60  ;;  %v10480_v34 = vld [vmem:[#allocation93_spill] sm:$0xff] }
 0x3de   :  { %v3427_v35 = vsel %vm10481_vm12, %v10480_v34, 0.0  ;;  %vm8909_vm10 = vmand %vm3077_vm15, %vm10483_vm6  ;;  %vm10490_vm12 = vcmp.gt.f32.partialorder %v10489_v47, 0.5 }
 0x3df   :  { %vm8923_vm3 = vmand %vm3762_vm0, %vm10490_vm12  ;;  %v3365_v24 = vsel %vm8909_vm10, %v8244_v25, 0.0  ;;  %vm10512_vm10 = vnez %v10064_v6 }
 0x3e0   :  { %v4050_v30 = vsel %vm8923_vm3, %v8244_v25, 0.0  ;;  %vm10517_vm3 = vcmp.gt.f32.partialorder %v10516_v51, 0.5 }
 0x3e3   :  { %v8731_v19 = vpop.f32.mrf.mxu2  ;;  %v8733_v12 = vpop.f32.mrf.mxu3 }
 0x3e4   :  { %v2482_v31 = vpop.f32.mrf.mxu0  ;;  %v2811_v26 = vpop.f32.mrf.mxu1  ;;  %vm3141_vm4 = vcmp.eq.f32.partialorder %v8731_v19, %v5294_v55  ;;  %vm3826_vm14 = vcmp.eq.f32.partialorder %v8733_v12, %v5299_v60  ;;  %v3588_v19 = vadd.f32 %v3587_v52, %v3426_v11  ;;  %v4112_v12 = vsel %vm8808_vm5, %v10480_v34, 0.0  ;;  %vm10496_vm5 = vmmov %vm10490_vm12  ;;  %v10515_v52 = vld [vmem:[#allocation26_spill] sm:$0xff] }
 0x3e5   :  { %vm3078_vm15 = vcmp.eq.f32.partialorder %v2482_v31, %v5294_v55  ;;  %vm8936_vm2 = vmand %vm3141_vm4, %vm10483_vm6  ;;  %vm3763_vm0 = vcmp.eq.f32.partialorder %v2811_v26, %v5299_v60  ;;  %vm10500_vm4 = vnez %v10499_v20  ;;  %v4274_v28 = vadd.f32 %v4273_v59, %v4112_v12 }
 0x3e6   :  { %v3589_v37 = vadd.f32 %v3588_v19, %v3427_v35  ;;  %vm8946_vm13 = vmand %vm3826_vm14, %vm10496_vm5  ;;  %vm10503_vm14 = vcmp.gt.f32.partialorder %v10299_v58, 0.5  ;;  %v4049_v31 = vsel %vm10506_vm8, %v8265_v41, 0.0  ;;  %v3429_v48 = vsel %vm8936_vm2, %v8203_v50, 0.0 }
 0x3e7   :  { %vm8956_vm6 = vmand %vm3078_vm15, %vm10500_vm4  ;;  %v4114_v11 = vsel %vm8946_vm13, %v8203_v50, 0.0  ;;  %v4191_v13 = vadd.f32 %v4190_v15, %v4049_v31  ;;  %v3555_v20 = vrot.slane %v8735_v10, 2 }
 0x3e8   :  { %v3590_v27 = vadd.f32 %v3589_v37, %v3428_v61  ;;  %vm8968_vm1 = vmand %vm3763_vm0, %vm10503_vm14  ;;  %v3366_v25 = vsel %vm8956_vm6, %v8280_v0, 0.0  ;;  %v10526_v37 = vld [vmem:[#allocation20_spill] sm:$0xff] }
 0x3e9   :  { %vm10509_vm11 = vmmov %vm10503_vm14  ;;  %v4192_v19 = vadd.f32 %v4191_v13, %v4050_v30  ;;  %v4051_v47 = vsel %vm8968_vm1, %v8280_v0, 0.0  ;;  %vm10527_vm1 = vnez %v10526_v37  ;;  %v10535_v30 = vld [vmem:[#allocation63_spill] sm:$0xff]  ;;  %v3556_v58 = vadd.f32 %v3555_v20, %v8735_v10 }
 0x3ea   :  { %v3591_v34 = vadd.f32 %v3590_v27, %v3429_v48  ;;  %v10531_v27 = vld [vmem:[#allocation60_spill] sm:$0xff] }
 0x3eb   :  { %v2642_v38 = vpop.f32.mrf.mxu2  ;;  %v2971_v43 = vpop.f32.mrf.mxu3  ;;  %v4193_v46 = vadd.f32 %v4192_v19, %v4051_v47 }
 0x3ec   :  { %vm3142_vm7 = vcmp.eq.f32.partialorder %v2642_v38, %v5294_v55  ;;  %vm3827_vm9 = vcmp.eq.f32.partialorder %v2971_v43, %v5299_v60  ;;  %v3506_v38 = vadd.f32 %v3505_v57, %v3364_v39  ;;  %v4275_v43 = vadd.f32 %v4274_v28, %v4113_v2  ;;  %v10533_v57 = vld [vmem:[#allocation28_spill] sm:$0xff] }
 0x3ed   :  { %vm8983_vm15 = vmand %vm3142_vm7, %vm10500_vm4  ;;  %v10534_v31 = vrot.slane %v10533_v57, 2 }
 0x3ee   :  { %vm8998_vm5 = vmand %vm3827_vm9, %vm10509_vm11  ;;  %v3430_v50 = vsel %vm8983_vm15, %v10515_v52, 0.0  ;;  %v3507_v32 = vadd.f32 %v3506_v38, %v3365_v24  ;;  %v4276_v63 = vadd.f32 %v4275_v43, %v4114_v11  ;;  %v3536_v11 = vrot.slane %v10535_v30, 1 }
 0x3ef   :  { %v4115_v35 = vsel %vm8998_vm5, %v10515_v52, 0.0  ;;  %vm10523_vm9 = vmmov %vm10517_vm3  ;;  %v3592_v40 = vadd.f32 %v3591_v34, %v3430_v50  ;;  %vm10530_vm5 = vcmp.gt.f32.partialorder %v10529_v45, 0.5  ;;  %v4220_v26 = vadd.f32 %v10534_v31, %v10533_v57 }
 0x3f0   :  { %v3508_v1 = vadd.f32 %v3507_v32, %v3366_v25  ;;  %v4277_v12 = vadd.f32 %v4276_v63, %v4115_v35  ;;  %v3577_v25 = vadd.f32 %v3576_v4, %v3575_v42  ;;  %v3557_v35 = vrot.slane %v3556_v58, 1  ;;  %v10539_v4 = vld [vmem:[#allocation27_spill] sm:$0xff] }
 0x3f1   :  { %v4221_v51 = vrot.slane %v4220_v26, 1  ;;  %v3537_v10 = vadd.f32 %v3536_v11, %v10535_v30 }
 0x3f3   :  { %v2645_v21 = vpop.f32.mrf.mxu2  ;;  %v2974_v22 = vpop.f32.mrf.mxu3 }
 0x3f4   :  { %vm3143_vm12 = vcmp.eq.f32.partialorder %v2645_v21, %v5294_v55  ;;  %v2485_v23 = vpop.f32.mrf.mxu0  ;;  %v2814_v17 = vpop.f32.mrf.mxu1  ;;  %vm3828_vm0 = vcmp.eq.f32.partialorder %v2974_v22, %v5299_v60 }
 0x3f5   :  { %vm3079_vm7 = vcmp.eq.f32.partialorder %v2485_v23, %v5294_v55  ;;  %vm9013_vm2 = vmand %vm3143_vm12, %vm10512_vm10  ;;  %vm3764_vm4 = vcmp.eq.f32.partialorder %v2814_v17, %v5299_v60 }
 0x3f6   :  { %vm9028_vm13 = vmand %vm3828_vm0, %vm10517_vm3  ;;  %v3431_v49 = vsel %vm9013_vm2, %v8416_v14, 0.0  ;;  %vm3623_vm3 = vcmask 1043459  }
 0x3f7   :  { %vm9040_vm6 = vmand %vm3079_vm7, %vm10512_vm10  ;;  %v4116_v62 = vsel %vm9028_vm13, %v8416_v14, 0.0  ;;  %v3593_v59 = vadd.f32 %v3592_v40, %v3431_v49  ;;  %v4260_v14 = vadd.f32 %v4259_v44, %v10520_v5  ;;  %v3578_v49 = vrot.slane %v3577_v25, 1 }
 0x3f8   :  { %vm9054_vm14 = vmand %vm3764_vm4, %vm10523_vm9  ;;  %v3367_v7 = vsel %vm9040_vm6, %v8448_v53, 0.0  ;;  %v4278_v33 = vadd.f32 %v4277_v12, %v4116_v62  ;;  %v3558_v62 = vadd.f32 %v3557_v35, %v3556_v58  ;;  %v10536_v12 = vld [vmem:[#allocation23_spill] sm:$0xff]  ;;  %vm3625_vm13 = vcmask 1044484  }
 0x3f9   :  { %v4052_v0 = vsel %vm9054_vm14, %v8448_v53, 0.0  ;;  %v3509_v18 = vadd.f32 %v3508_v1, %v3367_v7  ;;  %vm10532_vm2 = vmmov %vm10530_vm5  ;;  %v4261_v15 = vrot.slane %v4260_v14, 2  ;;  %v3607_v7 = vmul.f32 %v10536_v12, %v3537_v10 }
 0x3fa   :  { %v4194_v22 = vadd.f32 %v4193_v46, %v4052_v0  ;;  %v10537_v0 = vld [vmem:[#allocation19_spill] sm:$0xff]  ;;  %v3608_v45 = vmul.f32 %v10536_v12, %v3558_v62  ;;  %vm3627_vm6 = vcmask 1045509   ;;  %vm3629_vm9 = vcmask 1046534  }
 0x3fb   :  { %v2647_v9 = vpop.f32.mrf.mxu2  ;;  %v2976_v36 = vpop.f32.mrf.mxu3  ;;  %v4262_v29 = vadd.f32 %v4261_v15, %v4260_v14  ;;  %vm3631_vm14 = vcmask 1047559  }
 0x3fc   :  { %vm3144_vm12 = vcmp.eq.f32.partialorder %v2647_v9, %v5294_v55  ;;  %vm3829_vm8 = vcmp.eq.f32.partialorder %v2976_v36, %v5299_v60  ;;  %v2487_v61 = vpop.f32.mrf.mxu0  ;;  %v2816_v54 = vpop.f32.mrf.mxu1 }
 0x3fd   :  { %vm3304_vm15 = vmand %vm3144_vm12, %vm10527_vm1  ;;  %vm3080_vm0 = vcmp.eq.f32.partialorder %v2487_v61, %v5294_v55  ;;  %vm3765_vm11 = vcmp.eq.f32.partialorder %v2816_v54, %v5299_v60  ;;  %v4240_v55 = vrot.slane %v8754_v8, 2  ;;  %v4263_v42 = vrot.slane %v4262_v29, 1 }
 0x3fe   :  { %v3432_v56 = vsel %vm3304_vm15, %v10528_v16, 0.0  ;;  %vm3989_vm7 = vmand %vm3829_vm8, %vm10530_vm5  ;;  %v3579_v54 = vadd.f32 %v3578_v49, %v3577_v25 }
 0x3ff   :  { %v3594_v53 = vadd.f32 %v3593_v59, %v3432_v56  ;;  %v4117_v21 = vsel %vm3989_vm7, %v10528_v16, 0.0  ;;  %vm3240_vm10 = vmand %vm3080_vm0, %vm10527_vm1  ;;  %v4241_v13 = vadd.f32 %v4240_v55, %v8754_v8  ;;  %v4222_v8 = vadd.f32 %v4221_v51, %v4220_v26 }
 0x400   :  { %v4279_v28 = vadd.f32 %v4278_v33, %v4117_v21  ;;  %v3368_v39 = vsel %vm3240_vm10, %v10531_v27, 0.0  ;;  %vm3925_vm4 = vmand %vm3765_vm11, %vm10532_vm2  ;;  %v4264_v14 = vadd.f32 %v4263_v42, %v4262_v29  ;;  %v2980_v56 = vstv %s9097_s13  ;;  %v10538_v21 = vld [vmem:[#allocation54_spill] sm:$0xff] }
 0x401   :  { %v3595_v23 = vrot.slane %v3594_v53, 4  ;;  %v3510_v17 = vadd.f32 %v3509_v18, %v3368_v39  ;;  %v4053_v2 = vsel %vm3925_vm4, %v10531_v27, 0.0  ;;  %v4242_v63 = vrot.slane %v4241_v13, 1 }
 0x402   :  { %v4280_v24 = vrot.slane %v4279_v28, 4  ;;  %v4195_v48 = vadd.f32 %v4194_v22, %v4053_v2  ;;  %v4292_v37 = vmul.f32 %v10537_v0, %v4222_v8  ;;  %v4294_v57 = vmul.f32 %v10537_v0, %v4264_v14 }
 0x403   :  { %v3596_v41 = vadd.f32 %v3595_v23, %v3594_v53  ;;  %v3511_v38 = vrot.slane %v3510_v17, 4  ;;  %v4243_v61 = vadd.f32 %v4242_v63, %v4241_v13  ;;  %v3609_v53 = vmul.f32 %v10536_v12, %v3579_v54 }
 0x404   :  { %v4281_v60 = vadd.f32 %v4280_v24, %v4279_v28  ;;  %v4196_v43 = vrot.slane %v4195_v48, 4  ;;  %v4679_v28 = vld [vmem:[#allocation2] sm:$0xff] }
 0x405   :  { %v3597_v52 = vrot.slane %v3596_v41, 2  ;;  %v3512_v50 = vadd.f32 %v3511_v38, %v3510_v17  ;;  %v4293_v22 = vmul.f32 %v10537_v0, %v4243_v61  ;;  %v2981_v27 = vmul.f32 %v4679_v28, %v2980_v56 }
 0x406   :  { %v4282_v5 = vrot.slane %v4281_v60, 2  ;;  %v4197_v44 = vadd.f32 %v4196_v43, %v4195_v48 }
 0x407   :  { %v3598_v32 = vadd.f32 %v3597_v52, %v3596_v41  ;;  %v3513_v34 = vrot.slane %v3512_v50, 2 }
 0x408   :  { %v4283_v3 = vadd.f32 %v4282_v5, %v4281_v60  ;;  %v4198_v19 = vrot.slane %v4197_v44, 2 }
 0x409   :  { %v3514_v6 = vadd.f32 %v3513_v34, %v3512_v50  ;;  %v3599_v47 = vrot.slane %v3598_v32, 1 }
 0x40a   :  { %v4199_v1 = vadd.f32 %v4198_v19, %v4197_v44  ;;  %v4284_v9 = vrot.slane %v4283_v3, 1 }
 0x40b   :  { %v3515_v40 = vrot.slane %v3514_v6, 1  ;;  %v3600_v33 = vadd.f32 %v3599_v47, %v3598_v32 }
 0x40c   :  { %v4200_v36 = vrot.slane %v4199_v1, 1  ;;  %v4285_v20 = vadd.f32 %v4284_v9, %v4283_v3 }
 0x40d   :  { %v3516_v59 = vadd.f32 %v3515_v40, %v3514_v6  ;;  %v3610_v17 = vmul.f32 %v10536_v12, %v3600_v33 }
 0x40e   :  { %v4201_v46 = vadd.f32 %v4200_v36, %v4199_v1  ;;  %v4295_v15 = vmul.f32 %v10537_v0, %v4285_v20 }
 0x40f   :  { %v3606_v16 = vmul.f32 %v10536_v12, %v3516_v59 }
 0x410   :  { %v4291_v18 = vmul.f32 %v10537_v0, %v4201_v46 }
 0x411   :  { %v3624_v55 = vsel %vm3623_vm3, %v3606_v16, %v10538_v21 }
 0x412   :  { %v3626_v39 = vsel %vm3625_vm13, %v3607_v7, %v3624_v55  ;;  %v4306_v23 = vsel %vm3623_vm3, %v4291_v18, %v10539_v4 }
 0x413   :  { %v3628_v2 = vsel %vm3627_vm6, %v3608_v45, %v3626_v39  ;;  %v4307_v31 = vsel %vm3625_vm13, %v4292_v37, %v4306_v23 }
 0x414   :  { %v3630_v26 = vsel %vm3629_vm9, %v3609_v53, %v3628_v2  ;;  %v4308_v24 = vsel %vm3627_vm6, %v4293_v22, %v4307_v31 }
 0x415   :  { %v3632_v48 = vsel %vm3631_vm14, %v3610_v17, %v3630_v26  ;;  %v4309_v41 = vsel %vm3629_vm9, %v4294_v57, %v4308_v24 }
 0x416   :  { %v3634_v38 = vadd.f32 %v3632_v48, %v2981_v27  ;;  %v4310_v30 = vsel %vm3631_vm14, %v4295_v15, %v4309_v41 }
 0x418   :  { %v4312_v11 = vadd.f32 %v4310_v30, %v3634_v38 }
 0x41a   :  { %4313 = vst [vmem:[#allocation10] sm:$0xff] %v4312_v11 }
 0x41b   :  { %4324 = dma.vmem_to_hbm [thread:$0]  %s4320_s15, 128, %s4322_s18, [#allocation4]  }
 0x41c   :  { %4794 = dma.done.wait [#allocation4], 128  }
 0x41d   :  { %4795 = vsyncadd [#allocation4], 4294967168 }
 0x41e   :  { %4329 = vsyncpa [#allocation3], 1 }
 0x41f   :  { %4330 = vsyncpa [#allocation7], 1 }
 0x420   :  { %4331 = vsyncpa [#allocation4], 1 }
 0x421   :  { %4332 = vsyncpa [#allocation5], 1 }

</bundles_post_ra>
